<compile_context>
chip_gen: v6e
topology: v6e:2x2x1
jax: 0.10.0
libtpu: 0.0.40
codegen_flags: <defaults>
</compile_context>

<pallas_src>
import functools

import jax
import jax.numpy as jnp
from jax.experimental import pallas as pl
from jax.experimental.pallas import tpu as pltpu


# ----------------------------------------------------------------------------
# Helpers
# ----------------------------------------------------------------------------
def _round_up(x, m):
    return ((x + m - 1) // m) * m


def _sigmoid(x):
    # sigmoid(x) = 0.5 * (tanh(x/2) + 1): single EUP op (no exp + reciprocal).
    return 0.5 * jnp.tanh(0.5 * x) + 0.5


def _lstm_cell(gates, c_prev, d_h):
    """One LSTM cell update.  PyTorch gate order: i, f, g, o (d_h-wide groups)."""
    i = _sigmoid(gates[:, 0 * d_h:1 * d_h])
    f = _sigmoid(gates[:, 1 * d_h:2 * d_h])
    g = jnp.tanh(gates[:, 2 * d_h:3 * d_h])
    o = _sigmoid(gates[:, 3 * d_h:4 * d_h])
    c_new = f * c_prev + i * g
    h_new = o * jnp.tanh(c_new)
    return h_new, c_new


# ----------------------------------------------------------------------------
# Kernel A: one direction per grid step.  grid = (n_dir, nTB).
# Used for v7x megacore (direction axis "parallel") and for birnn=False.
# ----------------------------------------------------------------------------
def _lstm_dir_kernel(x_ref, w_ih_ref, w_hh_ref, b_ref, out_ref, cN_ref,
                     gx_s, h_s, c_s, *, d_h, t_blk, bs, n_dir, compute_dtype):
    d = pl.program_id(0)          # direction: 0 = fwd, 1 = bwd
    tb = pl.program_id(1)         # time block (reversed for bwd via index_map)
    nTB = pl.num_programs(1)

    @pl.when(tb == 0)
    def _():
        # seq_lens=None path of the reference -> zero initial hidden/cell state.
        h_s[...] = jnp.zeros_like(h_s)
        c_s[...] = jnp.zeros_like(c_s)

    # Fused input projection for this time block (off the serial path):
    # gx[s] = x[s] @ W_ih^T + (b_ih + b_hh)
    b_full = jnp.broadcast_to(b_ref[...], (bs, 4 * d_h))      # hoisted broadcast
    for s in range(t_blk):
        gx_s[s] = jnp.dot(x_ref[s], w_ih_ref[...],
                          preferred_element_type=jnp.float32) + b_full

    # Serial recurrence: only h_prev @ W_hh^T remains per step.
    def run(rows):
        for row in rows:                      # static rows -> static offsets
            h_prev = h_s[...]
            c_prev = c_s[...]
            gates = gx_s[row] + jnp.dot(h_prev.astype(compute_dtype),
                                        w_hh_ref[...],
                                        preferred_element_type=jnp.float32)
            h_new, c_new = _lstm_cell(gates, c_prev, d_h)
            h_s[...] = h_new
            c_s[...] = c_new
            out_ref[row] = h_new

    @pl.when(d == 0)
    def _():
        run(range(t_blk))

    if n_dir == 2:
        @pl.when(d == 1)
        def _():
            run(range(t_blk - 1, -1, -1))

    @pl.when(tb == nTB - 1)
    def _():
        cN_ref[...] = c_s[...]


# ----------------------------------------------------------------------------
# Kernel B: both directions per grid step (interleaved chains).  grid = (nTB,).
# Best on single-TensorCore chips (v5e / v6e): two independent recurrence
# chains per unrolled step hide MXU/EUP latency.
# ----------------------------------------------------------------------------
def _lstm_bidir_kernel(xf_ref, xb_ref, w_ih_ref, w_hh_ref, b_ref,
                       outf_ref, outb_ref, cN_ref,
                       gxf_s, gxb_s, hf_s, cf_s, hb_s, cb_s,
                       *, d_h, t_blk, bs, compute_dtype):
    tb = pl.program_id(0)
    nTB = pl.num_programs(0)

    @pl.when(tb == 0)
    def _():
        hf_s[...] = jnp.zeros_like(hf_s)
        cf_s[...] = jnp.zeros_like(cf_s)
        hb_s[...] = jnp.zeros_like(hb_s)
        cb_s[...] = jnp.zeros_like(cb_s)

    # Fused input projections for both directions (off the serial path).
    bf_full = jnp.broadcast_to(b_ref[0], (bs, 4 * d_h))
    bb_full = jnp.broadcast_to(b_ref[1], (bs, 4 * d_h))
    for s in range(t_blk):
        gxf_s[s] = jnp.dot(xf_ref[s], w_ih_ref[0],
                           preferred_element_type=jnp.float32) + bf_full
        gxb_s[s] = jnp.dot(xb_ref[s], w_ih_ref[1],
                           preferred_element_type=jnp.float32) + bb_full

    # Interleaved serial recurrences (static row offsets).
    for s in range(t_blk):
        rf, rb = s, t_blk - 1 - s

        gates_f = gxf_s[rf] + jnp.dot(hf_s[...].astype(compute_dtype),
                                      w_hh_ref[0],
                                      preferred_element_type=jnp.float32)
        gates_b = gxb_s[rb] + jnp.dot(hb_s[...].astype(compute_dtype),
                                      w_hh_ref[1],
                                      preferred_element_type=jnp.float32)

        h_f, c_f = _lstm_cell(gates_f, cf_s[...], d_h)
        h_b, c_b = _lstm_cell(gates_b, cb_s[...], d_h)

        hf_s[...] = h_f
        cf_s[...] = c_f
        hb_s[...] = h_b
        cb_s[...] = c_b
        outf_ref[rf] = h_f
        outb_ref[rb] = h_b

    @pl.when(tb == nTB - 1)
    def _():
        cN_ref[0] = cf_s[...]
        cN_ref[1] = cb_s[...]


# ----------------------------------------------------------------------------
# Parameter init mirroring the PyTorch module
# ----------------------------------------------------------------------------
def init_lstm_params(key, d_input, d_h, birnn=True):
    n_dir = 2 if birnn else 1
    k = 1.0 / jnp.sqrt(jnp.float32(d_h))
    keys = jax.random.split(key, 4 * n_dir + 2)
    params = {}
    names = ["fwd"] + (["bwd"] if birnn else [])
    for d, name in enumerate(names):
        kk = keys[4 * d:4 * d + 4]
        params[f"w_ih_{name}"] = jax.random.uniform(kk[0], (4 * d_h, d_input), jnp.float32, -k, k)
        params[f"w_hh_{name}"] = jax.random.uniform(kk[1], (4 * d_h, d_h), jnp.float32, -k, k)
        params[f"b_ih_{name}"] = jax.random.uniform(kk[2], (4 * d_h,), jnp.float32, -k, k)
        params[f"b_hh_{name}"] = jax.random.uniform(kk[3], (4 * d_h,), jnp.float32, -k, k)
    # init_h / init_c exist on the module but are NOT used in the seq_lens=None path.
    params["init_h"] = jax.random.uniform(keys[-2], (n_dir, d_h), jnp.float32, -0.01, 0.01)
    params["init_c"] = jax.random.uniform(keys[-1], (n_dir, d_h), jnp.float32, -0.01, 0.01)
    return params


# ----------------------------------------------------------------------------
# Wrapper utilities
# ----------------------------------------------------------------------------
def _pad_gates(w, d_h, d_hp):
    """Zero-pad the 4*d_h gate axis (axis 0) to 4*d_hp, per gate block."""
    if d_hp == d_h:
        return w
    parts = jnp.split(w, 4, axis=0)
    pad = [(0, d_hp - d_h)] + [(0, 0)] * (w.ndim - 1)
    return jnp.concatenate([jnp.pad(p, pad) for p in parts], axis=0)


def _pick_t_blk(T, bs, d_in, d_hp, n_chains, x_item, budget_bytes, cap):
    """Largest divisor of T (<= cap) whose double-buffered blocks fit the budget."""
    best = 1
    for t in range(1, max(1, min(T, cap)) + 1):
        if T % t:
            continue
        x_blk = 2 * n_chains * t * bs * d_in * x_item      # x blocks, 2 buffers
        o_blk = 2 * n_chains * t * bs * d_hp * 4           # out blocks, 2 buffers
        gx = n_chains * t * bs * 4 * d_hp * 4              # gx scratch (f32)
        if x_blk + o_blk + gx <= budget_bytes:
            best = t
    return best


# ----------------------------------------------------------------------------
# Module-level wrapper mirroring LSTM.forward (seq_lens=None, init_states=None)
# ----------------------------------------------------------------------------
@functools.partial(jax.jit, static_argnames=("birnn", "fuse_directions",
                                             "compute_dtype", "t_blk_cap",
                                             "vmem_budget_bytes"))
def lstm_forward(params, seqs, birnn=True, fuse_directions=True,
                 compute_dtype=jnp.float32, t_blk_cap=32,
                 vmem_budget_bytes=40 * 1024 * 1024):
    """seqs: [bs, T, d_input]  ->  (out [bs, T, n_dir*d_h], (h_n, c_n))."""
    bs, T, d_in = seqs.shape
    d_h = params["w_hh_fwd"].shape[1]
    n_dir = 2 if birnn else 1

    # Lane/sublane-dense padding (exact: padded h/c dims stay identically zero,
    # padded batch rows are sliced off).
    d_hp = _round_up(d_h, 128)
    bs_p = _round_up(bs, 8)

    names = ["fwd"] + (["bwd"] if birnn else [])
    w_ih = jnp.stack([_pad_gates(params[f"w_ih_{n}"], d_h, d_hp).T
                      for n in names]).astype(compute_dtype)        # [n_dir, d_in, 4*d_hp]
    w_hh = jnp.stack([jnp.pad(_pad_gates(params[f"w_hh_{n}"], d_h, d_hp),
                              ((0, 0), (0, d_hp - d_h))).T
                      for n in names]).astype(compute_dtype)        # [n_dir, d_hp, 4*d_hp]
    bias = jnp.stack([_pad_gates(params[f"b_ih_{n}"] + params[f"b_hh_{n}"], d_h, d_hp)
                      for n in names]).astype(jnp.float32)[:, None, :]  # [n_dir,1,4*d_hp]

    # Time-major x, batch padded to a sublane multiple.
    x = jnp.transpose(seqs, (1, 0, 2)).astype(compute_dtype)        # [T, bs, d_in]
    if bs_p != bs:
        x = jnp.pad(x, ((0, 0), (0, bs_p - bs), (0, 0)))

    n_chains = n_dir if (birnn and fuse_directions) else 1
    x_item = jnp.dtype(compute_dtype).itemsize
    w_bytes = (w_ih.size + w_hh.size) * x_item + bias.size * 4
    carry_bytes = 6 * n_dir * bs_p * d_hp * 4
    budget = max(vmem_budget_bytes - 2 * w_bytes - carry_bytes, 1 << 20)
    t_blk = _pick_t_blk(T, bs_p, d_in, d_hp, n_chains, x_item, budget, t_blk_cap)
    nTB = T // t_blk
    x = x.reshape(nTB, t_blk, bs_p, d_in)

    est = (2 * n_chains * t_blk * bs_p * (d_in * x_item + d_hp * 4)
           + n_chains * t_blk * bs_p * 4 * d_hp * 4
           + 2 * w_bytes + carry_bytes)
    vmem_limit = int(min(max(2 * est, 32 * 1024 * 1024), 64 * 1024 * 1024))

    if birnn and fuse_directions:
        # ---------------- fused-directions layout: grid = (nTB,) ----------------
        kernel = functools.partial(_lstm_bidir_kernel, d_h=d_hp, t_blk=t_blk,
                                   bs=bs_p, compute_dtype=compute_dtype)
        grid_spec = pltpu.PrefetchScalarGridSpec(
            num_scalar_prefetch=0,
            grid=(nTB,),
            in_specs=[
                pl.BlockSpec((None, t_blk, bs_p, d_in), lambda tb: (tb, 0, 0, 0)),
                pl.BlockSpec((None, t_blk, bs_p, d_in), lambda tb: (nTB - 1 - tb, 0, 0, 0)),
                pl.BlockSpec((n_dir, d_in, 4 * d_hp), lambda tb: (0, 0, 0)),   # W_ih^T resident
                pl.BlockSpec((n_dir, d_hp, 4 * d_hp), lambda tb: (0, 0, 0)),   # W_hh^T resident
                pl.BlockSpec((n_dir, 1, 4 * d_hp), lambda tb: (0, 0, 0)),      # bias resident
            ],
            out_specs=[
                pl.BlockSpec((t_blk, bs_p, d_hp), lambda tb: (tb, 0, 0)),
                pl.BlockSpec((t_blk, bs_p, d_hp), lambda tb: (nTB - 1 - tb, 0, 0)),
                pl.BlockSpec((n_dir, bs_p, d_hp), lambda tb: (0, 0, 0)),
            ],
            scratch_shapes=[
                pltpu.VMEM((t_blk, bs_p, 4 * d_hp), jnp.float32),   # gx fwd
                pltpu.VMEM((t_blk, bs_p, 4 * d_hp), jnp.float32),   # gx bwd
                pltpu.VMEM((bs_p, d_hp), jnp.float32),              # h fwd carry
                pltpu.VMEM((bs_p, d_hp), jnp.float32),              # c fwd carry
                pltpu.VMEM((bs_p, d_hp), jnp.float32),              # h bwd carry
                pltpu.VMEM((bs_p, d_hp), jnp.float32),              # c bwd carry
            ],
        )
        out_f, out_b, c_n = pl.pallas_call(
            kernel,
            out_shape=(
                jax.ShapeDtypeStruct((T, bs_p, d_hp), jnp.float32),
                jax.ShapeDtypeStruct((T, bs_p, d_hp), jnp.float32),
                jax.ShapeDtypeStruct((n_dir, bs_p, d_hp), jnp.float32),
            ),
            grid_spec=grid_spec,
            compiler_params=pltpu.CompilerParams(
                dimension_semantics=("arbitrary",),
                vmem_limit_bytes=vmem_limit),
        )(x, x, w_ih, w_hh, bias)
        out = jnp.stack([out_f, out_b], axis=0)                     # [2, T, bs_p, d_hp]
    else:
        # ------------- split-directions layout: grid = (n_dir, nTB) -------------
        kernel = functools.partial(_lstm_dir_kernel, d_h=d_hp, t_blk=t_blk,
                                   bs=bs_p, n_dir=n_dir, compute_dtype=compute_dtype)

        def x_map(d, tb):
            return (tb + d * (nTB - 1 - 2 * tb), 0, 0, 0)

        def o_map(d, tb):
            return (d, tb + d * (nTB - 1 - 2 * tb), 0, 0)

        grid_spec = pltpu.PrefetchScalarGridSpec(
            num_scalar_prefetch=0,
            grid=(n_dir, nTB),
            in_specs=[
                pl.BlockSpec((None, t_blk, bs_p, d_in), x_map),
                pl.BlockSpec((None, d_in, 4 * d_hp), lambda d, tb: (d, 0, 0)),
                pl.BlockSpec((None, d_hp, 4 * d_hp), lambda d, tb: (d, 0, 0)),
                pl.BlockSpec((None, 1, 4 * d_hp), lambda d, tb: (d, 0, 0)),
            ],
            out_specs=[
                pl.BlockSpec((None, t_blk, bs_p, d_hp), o_map),
                pl.BlockSpec((None, bs_p, d_hp), lambda d, tb: (d, 0, 0)),
            ],
            scratch_shapes=[
                pltpu.VMEM((t_blk, bs_p, 4 * d_hp), jnp.float32),   # gx
                pltpu.VMEM((bs_p, d_hp), jnp.float32),              # h carry
                pltpu.VMEM((bs_p, d_hp), jnp.float32),              # c carry
            ],
        )
        out, c_n = pl.pallas_call(
            kernel,
            out_shape=(
                jax.ShapeDtypeStruct((n_dir, T, bs_p, d_hp), jnp.float32),
                jax.ShapeDtypeStruct((n_dir, bs_p, d_hp), jnp.float32),
            ),
            grid_spec=grid_spec,
            compiler_params=pltpu.CompilerParams(
                # Direction axis maps to the two TensorCores on v7x megacore.
                dimension_semantics=("parallel", "arbitrary"),
                vmem_limit_bytes=vmem_limit),
        )(x, w_ih, w_hh, bias)

    # Strip batch / hidden padding.
    out = out[:, :, :bs, :d_h]            # [n_dir, T, bs, d_h]
    c_n = c_n[:, :bs, :d_h]               # [n_dir, bs, d_h]

    # h_N = hidden written at the last step each direction processed:
    # forward -> time T-1, backward -> time 0 (full-length sequences).
    if birnn:
        lstm_out = jnp.concatenate([out[0], out[1]], axis=-1)       # [T, bs, 2*d_h]
        h_n = jnp.stack([out[0, T - 1], out[1, 0]], axis=0)
    else:
        lstm_out = out[0]
        h_n = out[0, T - 1][None]

    return jnp.transpose(lstm_out, (1, 0, 2)), (h_n, c_n)


# ----------------------------------------------------------------------------
# Pure-JAX reference (lax.scan) used to validate the kernel
# ----------------------------------------------------------------------------
def _ref_direction(x_tbd, w_ih, w_hh, b_ih, b_hh, h0, c0):
    def step(carry, x_t):
        h, c = carry
        gates = x_t @ w_ih.T + h @ w_hh.T + b_ih + b_hh
        i, f, g, o = jnp.split(gates, 4, axis=-1)
        i, f, o = jax.nn.sigmoid(i), jax.nn.sigmoid(f), jax.nn.sigmoid(o)
        g = jnp.tanh(g)
        c = f * c + i * g
        h = o * jnp.tanh(c)
        return (h, c), h
    (hN, cN), out = jax.lax.scan(step, (h0, c0), x_tbd)
    return out, hN, cN


def lstm_forward_ref(params, seqs, birnn=True):
    bs, T, _ = seqs.shape
    d_h = params["w_hh_fwd"].shape[1]
    x_tbd = jnp.transpose(seqs, (1, 0, 2))
    h0 = jnp.zeros((bs, d_h), jnp.float32)
    c0 = jnp.zeros((bs, d_h), jnp.float32)
    out_f, hN_f, cN_f = _ref_direction(
        x_tbd, params["w_ih_fwd"], params["w_hh_fwd"],
        params["b_ih_fwd"], params["b_hh_fwd"], h0, c0)
    if not birnn:
        return (jnp.transpose(out_f, (1, 0, 2)), (hN_f[None], cN_f[None]))
    out_b_rev, hN_b, cN_b = _ref_direction(
        jnp.flip(x_tbd, 0), params["w_ih_bwd"], params["w_hh_bwd"],
        params["b_ih_bwd"], params["b_hh_bwd"], h0, c0)
    out_b = jnp.flip(out_b_rev, 0)
    lstm_out = jnp.concatenate([out_f, out_b], axis=-1)
    return (jnp.transpose(lstm_out, (1, 0, 2)),
            (jnp.stack([hN_f, hN_b], 0), jnp.stack([cN_f, cN_b], 0)))


if __name__ == "__main__":
    bs, T, d_input, d_h = 2, 8, 16, 32

    key = jax.random.PRNGKey(0)
    k_param, k_x = jax.random.split(key)
    params = init_lstm_params(k_param, d_input, d_h, birnn=True)
    seqs = jax.random.normal(k_x, (bs, T, d_input), jnp.float32)

    out_r, (h_r, c_r) = lstm_forward_ref(params, seqs, birnn=True)

    # Both kernel layouts, with t_blk_cap=4 -> 2 time blocks, exercising the
    # cross-block h/c carry and the reversed backward-direction index_map.
    for fuse in (True, False):
        out, (h_n, c_n) = lstm_forward(params, seqs, birnn=True,
                                       fuse_directions=fuse, t_blk_cap=4)
        jax.block_until_ready((out, h_n, c_n))
        assert out.shape == (bs, T, 2 * d_h)
        assert h_n.shape == (2, bs, d_h) and c_n.shape == (2, bs, d_h)
        assert jnp.allclose(out, out_r, atol=5e-4, rtol=5e-4), f"out mismatch fuse={fuse}"
        assert jnp.allclose(h_n, h_r, atol=5e-4, rtol=5e-4), f"h_n mismatch fuse={fuse}"
        assert jnp.allclose(c_n, c_r, atol=5e-4, rtol=5e-4), f"c_n mismatch fuse={fuse}"

    # Unidirectional path (n_dir == 1, split-direction kernel).
    params_uni = init_lstm_params(k_param, d_input, d_h, birnn=False)
    out_u, (h_u, c_u) = lstm_forward(params_uni, seqs, birnn=False)
    jax.block_until_ready((out_u, h_u, c_u))
    out_ur, (h_ur, c_ur) = lstm_forward_ref(params_uni, seqs, birnn=False)
    assert out_u.shape == (bs, T, d_h)
    assert jnp.allclose(out_u, out_ur, atol=5e-4, rtol=5e-4)
    assert jnp.allclose(h_u, h_ur, atol=5e-4, rtol=5e-4)
    assert jnp.allclose(c_u, c_ur, atol=5e-4, rtol=5e-4)

    print("KERNEL_OK")
</pallas_src>

<mosaic_0001>
module attributes {stable_mosaic.version = 11 : i64} {
  func.func @_lstm_bidir_kernel(%arg0: i32, %arg1: memref<1x4x8x16xf32, #tpu.memory_space<vmem>>, %arg2: memref<1x4x8x16xf32, #tpu.memory_space<vmem>>, %arg3: memref<2x16x512xf32, #tpu.memory_space<vmem>>, %arg4: memref<2x128x512xf32, #tpu.memory_space<vmem>>, %arg5: memref<2x1x512xf32, #tpu.memory_space<vmem>>, %arg6: memref<4x8x128xf32, #tpu.memory_space<vmem>>, %arg7: memref<4x8x128xf32, #tpu.memory_space<vmem>>, %arg8: memref<2x8x128xf32, #tpu.memory_space<vmem>>, %arg9: memref<4x8x512xf32, #tpu.memory_space<vmem>>, %arg10: memref<4x8x512xf32, #tpu.memory_space<vmem>>, %arg11: memref<8x128xf32, #tpu.memory_space<vmem>>, %arg12: memref<8x128xf32, #tpu.memory_space<vmem>>, %arg13: memref<8x128xf32, #tpu.memory_space<vmem>>, %arg14: memref<8x128xf32, #tpu.memory_space<vmem>>) attributes {dimension_semantics = [#tpu.dimension_semantics<arbitrary>], iteration_bounds = array<i64: 2>, scalar_prefetch = 0 : i64, scratch_operands = 6 : i64, tpu.core_type = #tpu.core_type<tc>, window_params = [{transform_indices = @transform_0, window_bounds = array<i64: 1, 4, 8, 16>}, {transform_indices = @transform_1, window_bounds = array<i64: 1, 4, 8, 16>}, {pipeline_mode = #tpu.pipeline_mode<synchronous>, transform_indices = @transform_2, window_bounds = array<i64: 2, 16, 512>}, {pipeline_mode = #tpu.pipeline_mode<synchronous>, transform_indices = @transform_3, window_bounds = array<i64: 2, 128, 512>}, {pipeline_mode = #tpu.pipeline_mode<synchronous>, transform_indices = @transform_4, window_bounds = array<i64: 2, 1, 512>}, {transform_indices = @transform_5, window_bounds = array<i64: 4, 8, 128>}, {transform_indices = @transform_6, window_bounds = array<i64: 4, 8, 128>}, {pipeline_mode = #tpu.pipeline_mode<synchronous>, transform_indices = @transform_7, window_bounds = array<i64: 2, 8, 128>}]} {
    %c0_i32 = arith.constant 0 : i32
    %0 = arith.cmpi eq, %arg0, %c0_i32 : i32
    %1 = arith.extui %0 : i1 to i32
    %c0_i32_0 = arith.constant 0 : i32
    %2 = arith.cmpi ne, %1, %c0_i32_0 : i32
    scf.if %2 {
      %cst_307 = arith.constant 0.000000e+00 : f32
      %438 = vector.broadcast %cst_307 : f32 to vector<8x128xf32>
      %c0_308 = arith.constant 0 : index
      %c0_309 = arith.constant 0 : index
      %439 = vector.load %arg11[%c0_308, %c0_309] : memref<8x128xf32, #tpu.memory_space<vmem>>, vector<8x128xf32>
      tpu.vector_store %arg11[%c0_308, %c0_309], %438 {strides = array<i32>} : memref<8x128xf32, #tpu.memory_space<vmem>>, vector<8x128xf32>,
      %cst_310 = arith.constant 0.000000e+00 : f32
      %440 = vector.broadcast %cst_310 : f32 to vector<8x128xf32>
      %c0_311 = arith.constant 0 : index
      %c0_312 = arith.constant 0 : index
      %441 = vector.load %arg12[%c0_311, %c0_312] : memref<8x128xf32, #tpu.memory_space<vmem>>, vector<8x128xf32>
      tpu.vector_store %arg12[%c0_311, %c0_312], %440 {strides = array<i32>} : memref<8x128xf32, #tpu.memory_space<vmem>>, vector<8x128xf32>,
      %cst_313 = arith.constant 0.000000e+00 : f32
      %442 = vector.broadcast %cst_313 : f32 to vector<8x128xf32>
      %c0_314 = arith.constant 0 : index
      %c0_315 = arith.constant 0 : index
      %443 = vector.load %arg13[%c0_314, %c0_315] : memref<8x128xf32, #tpu.memory_space<vmem>>, vector<8x128xf32>
      tpu.vector_store %arg13[%c0_314, %c0_315], %442 {strides = array<i32>} : memref<8x128xf32, #tpu.memory_space<vmem>>, vector<8x128xf32>,
      %cst_316 = arith.constant 0.000000e+00 : f32
      %444 = vector.broadcast %cst_316 : f32 to vector<8x128xf32>
      %c0_317 = arith.constant 0 : index
      %c0_318 = arith.constant 0 : index
      %445 = vector.load %arg14[%c0_317, %c0_318] : memref<8x128xf32, #tpu.memory_space<vmem>>, vector<8x128xf32>
      tpu.vector_store %arg14[%c0_317, %c0_318], %444 {strides = array<i32>} : memref<8x128xf32, #tpu.memory_space<vmem>>, vector<8x128xf32>,
    } else {
    }
    %c0 = arith.constant 0 : index
    %c0_1 = arith.constant 0 : index
    %c0_2 = arith.constant 0 : index
    %3 = vector.load %arg5[%c0, %c0_1, %c0_2] : memref<2x1x512xf32, #tpu.memory_space<vmem>>, vector<1x1x512xf32>
    %4 = vector.shape_cast %3 : vector<1x1x512xf32> to vector<1x512xf32>
    %5 = vector.shape_cast %4 : vector<1x512xf32> to vector<1x512xf32>
    %6 = vector.broadcast %5 : vector<1x512xf32> to vector<8x512xf32>
    %c1 = arith.constant 1 : index
    %c0_3 = arith.constant 0 : index
    %c0_4 = arith.constant 0 : index
    %7 = vector.load %arg5[%c1, %c0_3, %c0_4] : memref<2x1x512xf32, #tpu.memory_space<vmem>>, vector<1x1x512xf32>
    %8 = vector.shape_cast %7 : vector<1x1x512xf32> to vector<1x512xf32>
    %9 = vector.shape_cast %8 : vector<1x512xf32> to vector<1x512xf32>
    %10 = vector.broadcast %9 : vector<1x512xf32> to vector<8x512xf32>
    %c0_5 = arith.constant 0 : index
    %c0_6 = arith.constant 0 : index
    %c0_7 = arith.constant 0 : index
    %c0_8 = arith.constant 0 : index
    %11 = vector.load %arg1[%c0_5, %c0_6, %c0_7, %c0_8] : memref<1x4x8x16xf32, #tpu.memory_space<vmem>>, vector<1x1x8x16xf32>
    %12 = vector.shape_cast %11 : vector<1x1x8x16xf32> to vector<8x16xf32>
    %c0_9 = arith.constant 0 : index
    %c0_10 = arith.constant 0 : index
    %c0_11 = arith.constant 0 : index
    %13 = vector.load %arg3[%c0_9, %c0_10, %c0_11] : memref<2x16x512xf32, #tpu.memory_space<vmem>>, vector<1x16x512xf32>
    %14 = vector.shape_cast %13 : vector<1x16x512xf32> to vector<16x512xf32>
    %cst = arith.constant dense<0.000000e+00> : vector<8x512xf32>
    %15 = tpu.matmul %12, %14, %cst {dimension_numbers = #tpu.dot_dimension_numbers<[1], [0], [0], [1], [0, 0, 1, 1], [], []>} : vector<8x16xf32>, vector<16x512xf32>, vector<8x512xf32> -> vector<8x512xf32>
    %16 = arith.addf %15, %6 : vector<8x512xf32>
    %c0_12 = arith.constant 0 : index
    %c0_13 = arith.constant 0 : index
    %c0_14 = arith.constant 0 : index
    %17 = vector.load %arg9[%c0_12, %c0_13, %c0_14] : memref<4x8x512xf32, #tpu.memory_space<vmem>>, vector<1x8x512xf32>
    %18 = vector.shape_cast %17 : vector<1x8x512xf32> to vector<8x512xf32>
    %19 = vector.shape_cast %16 : vector<8x512xf32> to vector<1x8x512xf32>
    tpu.vector_store %arg9[%c0_12, %c0_13, %c0_14], %19 {strides = array<i32>} : memref<4x8x512xf32, #tpu.memory_space<vmem>>, vector<1x8x512xf32>,
    %c0_15 = arith.constant 0 : index
    %c0_16 = arith.constant 0 : index
    %c0_17 = arith.constant 0 : index
    %c0_18 = arith.constant 0 : index
    %20 = vector.load %arg2[%c0_15, %c0_16, %c0_17, %c0_18] : memref<1x4x8x16xf32, #tpu.memory_space<vmem>>, vector<1x1x8x16xf32>
    %21 = vector.shape_cast %20 : vector<1x1x8x16xf32> to vector<8x16xf32>
    %c1_19 = arith.constant 1 : index
    %c0_20 = arith.constant 0 : index
    %c0_21 = arith.constant 0 : index
    %22 = vector.load %arg3[%c1_19, %c0_20, %c0_21] : memref<2x16x512xf32, #tpu.memory_space<vmem>>, vector<1x16x512xf32>
    %23 = vector.shape_cast %22 : vector<1x16x512xf32> to vector<16x512xf32>
    %cst_22 = arith.constant dense<0.000000e+00> : vector<8x512xf32>
    %24 = tpu.matmul %21, %23, %cst_22 {dimension_numbers = #tpu.dot_dimension_numbers<[1], [0], [0], [1], [0, 0, 1, 1], [], []>} : vector<8x16xf32>, vector<16x512xf32>, vector<8x512xf32> -> vector<8x512xf32>
    %25 = arith.addf %24, %10 : vector<8x512xf32>
    %c0_23 = arith.constant 0 : index
    %c0_24 = arith.constant 0 : index
    %c0_25 = arith.constant 0 : index
    %26 = vector.load %arg10[%c0_23, %c0_24, %c0_25] : memref<4x8x512xf32, #tpu.memory_space<vmem>>, vector<1x8x512xf32>
    %27 = vector.shape_cast %26 : vector<1x8x512xf32> to vector<8x512xf32>
    %28 = vector.shape_cast %25 : vector<8x512xf32> to vector<1x8x512xf32>
    tpu.vector_store %arg10[%c0_23, %c0_24, %c0_25], %28 {strides = array<i32>} : memref<4x8x512xf32, #tpu.memory_space<vmem>>, vector<1x8x512xf32>,
    %c0_26 = arith.constant 0 : index
    %c1_27 = arith.constant 1 : index
    %c0_28 = arith.constant 0 : index
    %c0_29 = arith.constant 0 : index
    %29 = vector.load %arg1[%c0_26, %c1_27, %c0_28, %c0_29] : memref<1x4x8x16xf32, #tpu.memory_space<vmem>>, vector<1x1x8x16xf32>
    %30 = vector.shape_cast %29 : vector<1x1x8x16xf32> to vector<8x16xf32>
    %c0_30 = arith.constant 0 : index
    %c0_31 = arith.constant 0 : index
    %c0_32 = arith.constant 0 : index
    %31 = vector.load %arg3[%c0_30, %c0_31, %c0_32] : memref<2x16x512xf32, #tpu.memory_space<vmem>>, vector<1x16x512xf32>
    %32 = vector.shape_cast %31 : vector<1x16x512xf32> to vector<16x512xf32>
    %cst_33 = arith.constant dense<0.000000e+00> : vector<8x512xf32>
    %33 = tpu.matmul %30, %32, %cst_33 {dimension_numbers = #tpu.dot_dimension_numbers<[1], [0], [0], [1], [0, 0, 1, 1], [], []>} : vector<8x16xf32>, vector<16x512xf32>, vector<8x512xf32> -> vector<8x512xf32>
    %34 = arith.addf %33, %6 : vector<8x512xf32>
    %c1_34 = arith.constant 1 : index
    %c0_35 = arith.constant 0 : index
    %c0_36 = arith.constant 0 : index
    %35 = vector.load %arg9[%c1_34, %c0_35, %c0_36] : memref<4x8x512xf32, #tpu.memory_space<vmem>>, vector<1x8x512xf32>
    %36 = vector.shape_cast %35 : vector<1x8x512xf32> to vector<8x512xf32>
    %37 = vector.shape_cast %34 : vector<8x512xf32> to vector<1x8x512xf32>
    tpu.vector_store %arg9[%c1_34, %c0_35, %c0_36], %37 {strides = array<i32>} : memref<4x8x512xf32, #tpu.memory_space<vmem>>, vector<1x8x512xf32>,
    %c0_37 = arith.constant 0 : index
    %c1_38 = arith.constant 1 : index
    %c0_39 = arith.constant 0 : index
    %c0_40 = arith.constant 0 : index
    %38 = vector.load %arg2[%c0_37, %c1_38, %c0_39, %c0_40] : memref<1x4x8x16xf32, #tpu.memory_space<vmem>>, vector<1x1x8x16xf32>
    %39 = vector.shape_cast %38 : vector<1x1x8x16xf32> to vector<8x16xf32>
    %c1_41 = arith.constant 1 : index
    %c0_42 = arith.constant 0 : index
    %c0_43 = arith.constant 0 : index
    %40 = vector.load %arg3[%c1_41, %c0_42, %c0_43] : memref<2x16x512xf32, #tpu.memory_space<vmem>>, vector<1x16x512xf32>
    %41 = vector.shape_cast %40 : vector<1x16x512xf32> to vector<16x512xf32>
    %cst_44 = arith.constant dense<0.000000e+00> : vector<8x512xf32>
    %42 = tpu.matmul %39, %41, %cst_44 {dimension_numbers = #tpu.dot_dimension_numbers<[1], [0], [0], [1], [0, 0, 1, 1], [], []>} : vector<8x16xf32>, vector<16x512xf32>, vector<8x512xf32> -> vector<8x512xf32>
    %43 = arith.addf %42, %10 : vector<8x512xf32>
    %c1_45 = arith.constant 1 : index
    %c0_46 = arith.constant 0 : index
    %c0_47 = arith.constant 0 : index
    %44 = vector.load %arg10[%c1_45, %c0_46, %c0_47] : memref<4x8x512xf32, #tpu.memory_space<vmem>>, vector<1x8x512xf32>
    %45 = vector.shape_cast %44 : vector<1x8x512xf32> to vector<8x512xf32>
    %46 = vector.shape_cast %43 : vector<8x512xf32> to vector<1x8x512xf32>
    tpu.vector_store %arg10[%c1_45, %c0_46, %c0_47], %46 {strides = array<i32>} : memref<4x8x512xf32, #tpu.memory_space<vmem>>, vector<1x8x512xf32>,
    %c0_48 = arith.constant 0 : index
    %c2 = arith.constant 2 : index
    %c0_49 = arith.constant 0 : index
    %c0_50 = arith.constant 0 : index
    %47 = vector.load %arg1[%c0_48, %c2, %c0_49, %c0_50] : memref<1x4x8x16xf32, #tpu.memory_space<vmem>>, vector<1x1x8x16xf32>
    %48 = vector.shape_cast %47 : vector<1x1x8x16xf32> to vector<8x16xf32>
    %c0_51 = arith.constant 0 : index
    %c0_52 = arith.constant 0 : index
    %c0_53 = arith.constant 0 : index
    %49 = vector.load %arg3[%c0_51, %c0_52, %c0_53] : memref<2x16x512xf32, #tpu.memory_space<vmem>>, vector<1x16x512xf32>
    %50 = vector.shape_cast %49 : vector<1x16x512xf32> to vector<16x512xf32>
    %cst_54 = arith.constant dense<0.000000e+00> : vector<8x512xf32>
    %51 = tpu.matmul %48, %50, %cst_54 {dimension_numbers = #tpu.dot_dimension_numbers<[1], [0], [0], [1], [0, 0, 1, 1], [], []>} : vector<8x16xf32>, vector<16x512xf32>, vector<8x512xf32> -> vector<8x512xf32>
    %52 = arith.addf %51, %6 : vector<8x512xf32>
    %c2_55 = arith.constant 2 : index
    %c0_56 = arith.constant 0 : index
    %c0_57 = arith.constant 0 : index
    %53 = vector.load %arg9[%c2_55, %c0_56, %c0_57] : memref<4x8x512xf32, #tpu.memory_space<vmem>>, vector<1x8x512xf32>
    %54 = vector.shape_cast %53 : vector<1x8x512xf32> to vector<8x512xf32>
    %55 = vector.shape_cast %52 : vector<8x512xf32> to vector<1x8x512xf32>
    tpu.vector_store %arg9[%c2_55, %c0_56, %c0_57], %55 {strides = array<i32>} : memref<4x8x512xf32, #tpu.memory_space<vmem>>, vector<1x8x512xf32>,
    %c0_58 = arith.constant 0 : index
    %c2_59 = arith.constant 2 : index
    %c0_60 = arith.constant 0 : index
    %c0_61 = arith.constant 0 : index
    %56 = vector.load %arg2[%c0_58, %c2_59, %c0_60, %c0_61] : memref<1x4x8x16xf32, #tpu.memory_space<vmem>>, vector<1x1x8x16xf32>
    %57 = vector.shape_cast %56 : vector<1x1x8x16xf32> to vector<8x16xf32>
    %c1_62 = arith.constant 1 : index
    %c0_63 = arith.constant 0 : index
    %c0_64 = arith.constant 0 : index
    %58 = vector.load %arg3[%c1_62, %c0_63, %c0_64] : memref<2x16x512xf32, #tpu.memory_space<vmem>>, vector<1x16x512xf32>
    %59 = vector.shape_cast %58 : vector<1x16x512xf32> to vector<16x512xf32>
    %cst_65 = arith.constant dense<0.000000e+00> : vector<8x512xf32>
    %60 = tpu.matmul %57, %59, %cst_65 {dimension_numbers = #tpu.dot_dimension_numbers<[1], [0], [0], [1], [0, 0, 1, 1], [], []>} : vector<8x16xf32>, vector<16x512xf32>, vector<8x512xf32> -> vector<8x512xf32>
    %61 = arith.addf %60, %10 : vector<8x512xf32>
    %c2_66 = arith.constant 2 : index
    %c0_67 = arith.constant 0 : index
    %c0_68 = arith.constant 0 : index
    %62 = vector.load %arg10[%c2_66, %c0_67, %c0_68] : memref<4x8x512xf32, #tpu.memory_space<vmem>>, vector<1x8x512xf32>
    %63 = vector.shape_cast %62 : vector<1x8x512xf32> to vector<8x512xf32>
    %64 = vector.shape_cast %61 : vector<8x512xf32> to vector<1x8x512xf32>
    tpu.vector_store %arg10[%c2_66, %c0_67, %c0_68], %64 {strides = array<i32>} : memref<4x8x512xf32, #tpu.memory_space<vmem>>, vector<1x8x512xf32>,
    %c0_69 = arith.constant 0 : index
    %c3 = arith.constant 3 : index
    %c0_70 = arith.constant 0 : index
    %c0_71 = arith.constant 0 : index
    %65 = vector.load %arg1[%c0_69, %c3, %c0_70, %c0_71] : memref<1x4x8x16xf32, #tpu.memory_space<vmem>>, vector<1x1x8x16xf32>
    %66 = vector.shape_cast %65 : vector<1x1x8x16xf32> to vector<8x16xf32>
    %c0_72 = arith.constant 0 : index
    %c0_73 = arith.constant 0 : index
    %c0_74 = arith.constant 0 : index
    %67 = vector.load %arg3[%c0_72, %c0_73, %c0_74] : memref<2x16x512xf32, #tpu.memory_space<vmem>>, vector<1x16x512xf32>
    %68 = vector.shape_cast %67 : vector<1x16x512xf32> to vector<16x512xf32>
    %cst_75 = arith.constant dense<0.000000e+00> : vector<8x512xf32>
    %69 = tpu.matmul %66, %68, %cst_75 {dimension_numbers = #tpu.dot_dimension_numbers<[1], [0], [0], [1], [0, 0, 1, 1], [], []>} : vector<8x16xf32>, vector<16x512xf32>, vector<8x512xf32> -> vector<8x512xf32>
    %70 = arith.addf %69, %6 : vector<8x512xf32>
    %c3_76 = arith.constant 3 : index
    %c0_77 = arith.constant 0 : index
    %c0_78 = arith.constant 0 : index
    %71 = vector.load %arg9[%c3_76, %c0_77, %c0_78] : memref<4x8x512xf32, #tpu.memory_space<vmem>>, vector<1x8x512xf32>
    %72 = vector.shape_cast %71 : vector<1x8x512xf32> to vector<8x512xf32>
    %73 = vector.shape_cast %70 : vector<8x512xf32> to vector<1x8x512xf32>
    tpu.vector_store %arg9[%c3_76, %c0_77, %c0_78], %73 {strides = array<i32>} : memref<4x8x512xf32, #tpu.memory_space<vmem>>, vector<1x8x512xf32>,
    %c0_79 = arith.constant 0 : index
    %c3_80 = arith.constant 3 : index
    %c0_81 = arith.constant 0 : index
    %c0_82 = arith.constant 0 : index
    %74 = vector.load %arg2[%c0_79, %c3_80, %c0_81, %c0_82] : memref<1x4x8x16xf32, #tpu.memory_space<vmem>>, vector<1x1x8x16xf32>
    %75 = vector.shape_cast %74 : vector<1x1x8x16xf32> to vector<8x16xf32>
    %c1_83 = arith.constant 1 : index
    %c0_84 = arith.constant 0 : index
    %c0_85 = arith.constant 0 : index
    %76 = vector.load %arg3[%c1_83, %c0_84, %c0_85] : memref<2x16x512xf32, #tpu.memory_space<vmem>>, vector<1x16x512xf32>
    %77 = vector.shape_cast %76 : vector<1x16x512xf32> to vector<16x512xf32>
    %cst_86 = arith.constant dense<0.000000e+00> : vector<8x512xf32>
    %78 = tpu.matmul %75, %77, %cst_86 {dimension_numbers = #tpu.dot_dimension_numbers<[1], [0], [0], [1], [0, 0, 1, 1], [], []>} : vector<8x16xf32>, vector<16x512xf32>, vector<8x512xf32> -> vector<8x512xf32>
    %79 = arith.addf %78, %10 : vector<8x512xf32>
    %c3_87 = arith.constant 3 : index
    %c0_88 = arith.constant 0 : index
    %c0_89 = arith.constant 0 : index
    %80 = vector.load %arg10[%c3_87, %c0_88, %c0_89] : memref<4x8x512xf32, #tpu.memory_space<vmem>>, vector<1x8x512xf32>
    %81 = vector.shape_cast %80 : vector<1x8x512xf32> to vector<8x512xf32>
    %82 = vector.shape_cast %79 : vector<8x512xf32> to vector<1x8x512xf32>
    tpu.vector_store %arg10[%c3_87, %c0_88, %c0_89], %82 {strides = array<i32>} : memref<4x8x512xf32, #tpu.memory_space<vmem>>, vector<1x8x512xf32>,
    %c0_90 = arith.constant 0 : index
    %c0_91 = arith.constant 0 : index
    %c0_92 = arith.constant 0 : index
    %83 = vector.load %arg9[%c0_90, %c0_91, %c0_92] : memref<4x8x512xf32, #tpu.memory_space<vmem>>, vector<1x8x512xf32>
    %84 = vector.shape_cast %83 : vector<1x8x512xf32> to vector<8x512xf32>
    %c0_93 = arith.constant 0 : index
    %c0_94 = arith.constant 0 : index
    %85 = vector.load %arg11[%c0_93, %c0_94] : memref<8x128xf32, #tpu.memory_space<vmem>>, vector<8x128xf32>
    %c0_95 = arith.constant 0 : index
    %c0_96 = arith.constant 0 : index
    %c0_97 = arith.constant 0 : index
    %86 = vector.load %arg4[%c0_95, %c0_96, %c0_97] : memref<2x128x512xf32, #tpu.memory_space<vmem>>, vector<1x128x512xf32>
    %87 = vector.shape_cast %86 : vector<1x128x512xf32> to vector<128x512xf32>
    %cst_98 = arith.constant dense<0.000000e+00> : vector<8x512xf32>
    %88 = tpu.matmul %85, %87, %cst_98 {dimension_numbers = #tpu.dot_dimension_numbers<[1], [0], [0], [1], [0, 0, 1, 1], [], []>} : vector<8x128xf32>, vector<128x512xf32>, vector<8x512xf32> -> vector<8x512xf32>
    %89 = arith.addf %84, %88 : vector<8x512xf32>
    %c3_99 = arith.constant 3 : index
    %c0_100 = arith.constant 0 : index
    %c0_101 = arith.constant 0 : index
    %90 = vector.load %arg10[%c3_99, %c0_100, %c0_101] : memref<4x8x512xf32, #tpu.memory_space<vmem>>, vector<1x8x512xf32>
    %91 = vector.shape_cast %90 : vector<1x8x512xf32> to vector<8x512xf32>
    %c0_102 = arith.constant 0 : index
    %c0_103 = arith.constant 0 : index
    %92 = vector.load %arg13[%c0_102, %c0_103] : memref<8x128xf32, #tpu.memory_space<vmem>>, vector<8x128xf32>
    %c1_104 = arith.constant 1 : index
    %c0_105 = arith.constant 0 : index
    %c0_106 = arith.constant 0 : index
    %93 = vector.load %arg4[%c1_104, %c0_105, %c0_106] : memref<2x128x512xf32, #tpu.memory_space<vmem>>, vector<1x128x512xf32>
    %94 = vector.shape_cast %93 : vector<1x128x512xf32> to vector<128x512xf32>
    %cst_107 = arith.constant dense<0.000000e+00> : vector<8x512xf32>
    %95 = tpu.matmul %92, %94, %cst_107 {dimension_numbers = #tpu.dot_dimension_numbers<[1], [0], [0], [1], [0, 0, 1, 1], [], []>} : vector<8x128xf32>, vector<128x512xf32>, vector<8x512xf32> -> vector<8x512xf32>
    %96 = arith.addf %91, %95 : vector<8x512xf32>
    %c0_108 = arith.constant 0 : index
    %c0_109 = arith.constant 0 : index
    %97 = vector.load %arg12[%c0_108, %c0_109] : memref<8x128xf32, #tpu.memory_space<vmem>>, vector<8x128xf32>
    %98 = vector.extract_strided_slice %89 {offsets = [0, 0], sizes = [8, 128], strides = [1, 1]} : vector<8x512xf32> to vector<8x128xf32>
    %cst_110 = arith.constant 5.000000e-01 : f32
    %99 = vector.broadcast %cst_110 : f32 to vector<8x128xf32>
    %100 = arith.mulf %99, %98 : vector<8x128xf32>
    %101 = math.tanh %100 : vector<8x128xf32>
    %cst_111 = arith.constant 5.000000e-01 : f32
    %102 = vector.broadcast %cst_111 : f32 to vector<8x128xf32>
    %103 = arith.mulf %102, %101 : vector<8x128xf32>
    %cst_112 = arith.constant 5.000000e-01 : f32
    %104 = vector.broadcast %cst_112 : f32 to vector<8x128xf32>
    %105 = arith.addf %103, %104 : vector<8x128xf32>
    %106 = vector.extract_strided_slice %89 {offsets = [0, 128], sizes = [8, 128], strides = [1, 1]} : vector<8x512xf32> to vector<8x128xf32>
    %cst_113 = arith.constant 5.000000e-01 : f32
    %107 = vector.broadcast %cst_113 : f32 to vector<8x128xf32>
    %108 = arith.mulf %107, %106 : vector<8x128xf32>
    %109 = math.tanh %108 : vector<8x128xf32>
    %cst_114 = arith.constant 5.000000e-01 : f32
    %110 = vector.broadcast %cst_114 : f32 to vector<8x128xf32>
    %111 = arith.mulf %110, %109 : vector<8x128xf32>
    %cst_115 = arith.constant 5.000000e-01 : f32
    %112 = vector.broadcast %cst_115 : f32 to vector<8x128xf32>
    %113 = arith.addf %111, %112 : vector<8x128xf32>
    %114 = vector.extract_strided_slice %89 {offsets = [0, 256], sizes = [8, 128], strides = [1, 1]} : vector<8x512xf32> to vector<8x128xf32>
    %115 = math.tanh %114 : vector<8x128xf32>
    %116 = vector.extract_strided_slice %89 {offsets = [0, 384], sizes = [8, 128], strides = [1, 1]} : vector<8x512xf32> to vector<8x128xf32>
    %cst_116 = arith.constant 5.000000e-01 : f32
    %117 = vector.broadcast %cst_116 : f32 to vector<8x128xf32>
    %118 = arith.mulf %117, %116 : vector<8x128xf32>
    %119 = math.tanh %118 : vector<8x128xf32>
    %cst_117 = arith.constant 5.000000e-01 : f32
    %120 = vector.broadcast %cst_117 : f32 to vector<8x128xf32>
    %121 = arith.mulf %120, %119 : vector<8x128xf32>
    %cst_118 = arith.constant 5.000000e-01 : f32
    %122 = vector.broadcast %cst_118 : f32 to vector<8x128xf32>
    %123 = arith.addf %121, %122 : vector<8x128xf32>
    %124 = arith.mulf %113, %97 : vector<8x128xf32>
    %125 = arith.mulf %105, %115 : vector<8x128xf32>
    %126 = arith.addf %124, %125 : vector<8x128xf32>
    %127 = math.tanh %126 : vector<8x128xf32>
    %128 = arith.mulf %123, %127 : vector<8x128xf32>
    %c0_119 = arith.constant 0 : index
    %c0_120 = arith.constant 0 : index
    %129 = vector.load %arg14[%c0_119, %c0_120] : memref<8x128xf32, #tpu.memory_space<vmem>>, vector<8x128xf32>
    %130 = vector.extract_strided_slice %96 {offsets = [0, 0], sizes = [8, 128], strides = [1, 1]} : vector<8x512xf32> to vector<8x128xf32>
    %cst_121 = arith.constant 5.000000e-01 : f32
    %131 = vector.broadcast %cst_121 : f32 to vector<8x128xf32>
    %132 = arith.mulf %131, %130 : vector<8x128xf32>
    %133 = math.tanh %132 : vector<8x128xf32>
    %cst_122 = arith.constant 5.000000e-01 : f32
    %134 = vector.broadcast %cst_122 : f32 to vector<8x128xf32>
    %135 = arith.mulf %134, %133 : vector<8x128xf32>
    %cst_123 = arith.constant 5.000000e-01 : f32
    %136 = vector.broadcast %cst_123 : f32 to vector<8x128xf32>
    %137 = arith.addf %135, %136 : vector<8x128xf32>
    %138 = vector.extract_strided_slice %96 {offsets = [0, 128], sizes = [8, 128], strides = [1, 1]} : vector<8x512xf32> to vector<8x128xf32>
    %cst_124 = arith.constant 5.000000e-01 : f32
    %139 = vector.broadcast %cst_124 : f32 to vector<8x128xf32>
    %140 = arith.mulf %139, %138 : vector<8x128xf32>
    %141 = math.tanh %140 : vector<8x128xf32>
    %cst_125 = arith.constant 5.000000e-01 : f32
    %142 = vector.broadcast %cst_125 : f32 to vector<8x128xf32>
    %143 = arith.mulf %142, %141 : vector<8x128xf32>
    %cst_126 = arith.constant 5.000000e-01 : f32
    %144 = vector.broadcast %cst_126 : f32 to vector<8x128xf32>
    %145 = arith.addf %143, %144 : vector<8x128xf32>
    %146 = vector.extract_strided_slice %96 {offsets = [0, 256], sizes = [8, 128], strides = [1, 1]} : vector<8x512xf32> to vector<8x128xf32>
    %147 = math.tanh %146 : vector<8x128xf32>
    %148 = vector.extract_strided_slice %96 {offsets = [0, 384], sizes = [8, 128], strides = [1, 1]} : vector<8x512xf32> to vector<8x128xf32>
    %cst_127 = arith.constant 5.000000e-01 : f32
    %149 = vector.broadcast %cst_127 : f32 to vector<8x128xf32>
    %150 = arith.mulf %149, %148 : vector<8x128xf32>
    %151 = math.tanh %150 : vector<8x128xf32>
    %cst_128 = arith.constant 5.000000e-01 : f32
    %152 = vector.broadcast %cst_128 : f32 to vector<8x128xf32>
    %153 = arith.mulf %152, %151 : vector<8x128xf32>
    %cst_129 = arith.constant 5.000000e-01 : f32
    %154 = vector.broadcast %cst_129 : f32 to vector<8x128xf32>
    %155 = arith.addf %153, %154 : vector<8x128xf32>
    %156 = arith.mulf %145, %129 : vector<8x128xf32>
    %157 = arith.mulf %137, %147 : vector<8x128xf32>
    %158 = arith.addf %156, %157 : vector<8x128xf32>
    %159 = math.tanh %158 : vector<8x128xf32>
    %160 = arith.mulf %155, %159 : vector<8x128xf32>
    %c0_130 = arith.constant 0 : index
    %c0_131 = arith.constant 0 : index
    %161 = vector.load %arg11[%c0_130, %c0_131] : memref<8x128xf32, #tpu.memory_space<vmem>>, vector<8x128xf32>
    tpu.vector_store %arg11[%c0_130, %c0_131], %128 {strides = array<i32>} : memref<8x128xf32, #tpu.memory_space<vmem>>, vector<8x128xf32>,
    %c0_132 = arith.constant 0 : index
    %c0_133 = arith.constant 0 : index
    %162 = vector.load %arg12[%c0_132, %c0_133] : memref<8x128xf32, #tpu.memory_space<vmem>>, vector<8x128xf32>
    tpu.vector_store %arg12[%c0_132, %c0_133], %126 {strides = array<i32>} : memref<8x128xf32, #tpu.memory_space<vmem>>, vector<8x128xf32>,
    %c0_134 = arith.constant 0 : index
    %c0_135 = arith.constant 0 : index
    %163 = vector.load %arg13[%c0_134, %c0_135] : memref<8x128xf32, #tpu.memory_space<vmem>>, vector<8x128xf32>
    tpu.vector_store %arg13[%c0_134, %c0_135], %160 {strides = array<i32>} : memref<8x128xf32, #tpu.memory_space<vmem>>, vector<8x128xf32>,
    %c0_136 = arith.constant 0 : index
    %c0_137 = arith.constant 0 : index
    %164 = vector.load %arg14[%c0_136, %c0_137] : memref<8x128xf32, #tpu.memory_space<vmem>>, vector<8x128xf32>
    tpu.vector_store %arg14[%c0_136, %c0_137], %158 {strides = array<i32>} : memref<8x128xf32, #tpu.memory_space<vmem>>, vector<8x128xf32>,
    %c0_138 = arith.constant 0 : index
    %c0_139 = arith.constant 0 : index
    %c0_140 = arith.constant 0 : index
    %165 = vector.load %arg6[%c0_138, %c0_139, %c0_140] : memref<4x8x128xf32, #tpu.memory_space<vmem>>, vector<1x8x128xf32>
    %166 = vector.shape_cast %165 : vector<1x8x128xf32> to vector<8x128xf32>
    %167 = vector.shape_cast %128 : vector<8x128xf32> to vector<1x8x128xf32>
    tpu.vector_store %arg6[%c0_138, %c0_139, %c0_140], %167 {strides = array<i32>} : memref<4x8x128xf32, #tpu.memory_space<vmem>>, vector<1x8x128xf32>,
    %c3_141 = arith.constant 3 : index
    %c0_142 = arith.constant 0 : index
    %c0_143 = arith.constant 0 : index
    %168 = vector.load %arg7[%c3_141, %c0_142, %c0_143] : memref<4x8x128xf32, #tpu.memory_space<vmem>>, vector<1x8x128xf32>
    %169 = vector.shape_cast %168 : vector<1x8x128xf32> to vector<8x128xf32>
    %170 = vector.shape_cast %160 : vector<8x128xf32> to vector<1x8x128xf32>
    tpu.vector_store %arg7[%c3_141, %c0_142, %c0_143], %170 {strides = array<i32>} : memref<4x8x128xf32, #tpu.memory_space<vmem>>, vector<1x8x128xf32>,
    %c1_144 = arith.constant 1 : index
    %c0_145 = arith.constant 0 : index
    %c0_146 = arith.constant 0 : index
    %171 = vector.load %arg9[%c1_144, %c0_145, %c0_146] : memref<4x8x512xf32, #tpu.memory_space<vmem>>, vector<1x8x512xf32>
    %172 = vector.shape_cast %171 : vector<1x8x512xf32> to vector<8x512xf32>
    %c0_147 = arith.constant 0 : index
    %c0_148 = arith.constant 0 : index
    %173 = vector.load %arg11[%c0_147, %c0_148] : memref<8x128xf32, #tpu.memory_space<vmem>>, vector<8x128xf32>
    %c0_149 = arith.constant 0 : index
    %c0_150 = arith.constant 0 : index
    %c0_151 = arith.constant 0 : index
    %174 = vector.load %arg4[%c0_149, %c0_150, %c0_151] : memref<2x128x512xf32, #tpu.memory_space<vmem>>, vector<1x128x512xf32>
    %175 = vector.shape_cast %174 : vector<1x128x512xf32> to vector<128x512xf32>
    %cst_152 = arith.constant dense<0.000000e+00> : vector<8x512xf32>
    %176 = tpu.matmul %173, %175, %cst_152 {dimension_numbers = #tpu.dot_dimension_numbers<[1], [0], [0], [1], [0, 0, 1, 1], [], []>} : vector<8x128xf32>, vector<128x512xf32>, vector<8x512xf32> -> vector<8x512xf32>
    %177 = arith.addf %172, %176 : vector<8x512xf32>
    %c2_153 = arith.constant 2 : index
    %c0_154 = arith.constant 0 : index
    %c0_155 = arith.constant 0 : index
    %178 = vector.load %arg10[%c2_153, %c0_154, %c0_155] : memref<4x8x512xf32, #tpu.memory_space<vmem>>, vector<1x8x512xf32>
    %179 = vector.shape_cast %178 : vector<1x8x512xf32> to vector<8x512xf32>
    %c0_156 = arith.constant 0 : index
    %c0_157 = arith.constant 0 : index
    %180 = vector.load %arg13[%c0_156, %c0_157] : memref<8x128xf32, #tpu.memory_space<vmem>>, vector<8x128xf32>
    %c1_158 = arith.constant 1 : index
    %c0_159 = arith.constant 0 : index
    %c0_160 = arith.constant 0 : index
    %181 = vector.load %arg4[%c1_158, %c0_159, %c0_160] : memref<2x128x512xf32, #tpu.memory_space<vmem>>, vector<1x128x512xf32>
    %182 = vector.shape_cast %181 : vector<1x128x512xf32> to vector<128x512xf32>
    %cst_161 = arith.constant dense<0.000000e+00> : vector<8x512xf32>
    %183 = tpu.matmul %180, %182, %cst_161 {dimension_numbers = #tpu.dot_dimension_numbers<[1], [0], [0], [1], [0, 0, 1, 1], [], []>} : vector<8x128xf32>, vector<128x512xf32>, vector<8x512xf32> -> vector<8x512xf32>
    %184 = arith.addf %179, %183 : vector<8x512xf32>
    %c0_162 = arith.constant 0 : index
    %c0_163 = arith.constant 0 : index
    %185 = vector.load %arg12[%c0_162, %c0_163] : memref<8x128xf32, #tpu.memory_space<vmem>>, vector<8x128xf32>
    %186 = vector.extract_strided_slice %177 {offsets = [0, 0], sizes = [8, 128], strides = [1, 1]} : vector<8x512xf32> to vector<8x128xf32>
    %cst_164 = arith.constant 5.000000e-01 : f32
    %187 = vector.broadcast %cst_164 : f32 to vector<8x128xf32>
    %188 = arith.mulf %187, %186 : vector<8x128xf32>
    %189 = math.tanh %188 : vector<8x128xf32>
    %cst_165 = arith.constant 5.000000e-01 : f32
    %190 = vector.broadcast %cst_165 : f32 to vector<8x128xf32>
    %191 = arith.mulf %190, %189 : vector<8x128xf32>
    %cst_166 = arith.constant 5.000000e-01 : f32
    %192 = vector.broadcast %cst_166 : f32 to vector<8x128xf32>
    %193 = arith.addf %191, %192 : vector<8x128xf32>
    %194 = vector.extract_strided_slice %177 {offsets = [0, 128], sizes = [8, 128], strides = [1, 1]} : vector<8x512xf32> to vector<8x128xf32>
    %cst_167 = arith.constant 5.000000e-01 : f32
    %195 = vector.broadcast %cst_167 : f32 to vector<8x128xf32>
    %196 = arith.mulf %195, %194 : vector<8x128xf32>
    %197 = math.tanh %196 : vector<8x128xf32>
    %cst_168 = arith.constant 5.000000e-01 : f32
    %198 = vector.broadcast %cst_168 : f32 to vector<8x128xf32>
    %199 = arith.mulf %198, %197 : vector<8x128xf32>
    %cst_169 = arith.constant 5.000000e-01 : f32
    %200 = vector.broadcast %cst_169 : f32 to vector<8x128xf32>
    %201 = arith.addf %199, %200 : vector<8x128xf32>
    %202 = vector.extract_strided_slice %177 {offsets = [0, 256], sizes = [8, 128], strides = [1, 1]} : vector<8x512xf32> to vector<8x128xf32>
    %203 = math.tanh %202 : vector<8x128xf32>
    %204 = vector.extract_strided_slice %177 {offsets = [0, 384], sizes = [8, 128], strides = [1, 1]} : vector<8x512xf32> to vector<8x128xf32>
    %cst_170 = arith.constant 5.000000e-01 : f32
    %205 = vector.broadcast %cst_170 : f32 to vector<8x128xf32>
    %206 = arith.mulf %205, %204 : vector<8x128xf32>
    %207 = math.tanh %206 : vector<8x128xf32>
    %cst_171 = arith.constant 5.000000e-01 : f32
    %208 = vector.broadcast %cst_171 : f32 to vector<8x128xf32>
    %209 = arith.mulf %208, %207 : vector<8x128xf32>
    %cst_172 = arith.constant 5.000000e-01 : f32
    %210 = vector.broadcast %cst_172 : f32 to vector<8x128xf32>
    %211 = arith.addf %209, %210 : vector<8x128xf32>
    %212 = arith.mulf %201, %185 : vector<8x128xf32>
    %213 = arith.mulf %193, %203 : vector<8x128xf32>
    %214 = arith.addf %212, %213 : vector<8x128xf32>
    %215 = math.tanh %214 : vector<8x128xf32>
    %216 = arith.mulf %211, %215 : vector<8x128xf32>
    %c0_173 = arith.constant 0 : index
    %c0_174 = arith.constant 0 : index
    %217 = vector.load %arg14[%c0_173, %c0_174] : memref<8x128xf32, #tpu.memory_space<vmem>>, vector<8x128xf32>
    %218 = vector.extract_strided_slice %184 {offsets = [0, 0], sizes = [8, 128], strides = [1, 1]} : vector<8x512xf32> to vector<8x128xf32>
    %cst_175 = arith.constant 5.000000e-01 : f32
    %219 = vector.broadcast %cst_175 : f32 to vector<8x128xf32>
    %220 = arith.mulf %219, %218 : vector<8x128xf32>
    %221 = math.tanh %220 : vector<8x128xf32>
    %cst_176 = arith.constant 5.000000e-01 : f32
    %222 = vector.broadcast %cst_176 : f32 to vector<8x128xf32>
    %223 = arith.mulf %222, %221 : vector<8x128xf32>
    %cst_177 = arith.constant 5.000000e-01 : f32
    %224 = vector.broadcast %cst_177 : f32 to vector<8x128xf32>
    %225 = arith.addf %223, %224 : vector<8x128xf32>
    %226 = vector.extract_strided_slice %184 {offsets = [0, 128], sizes = [8, 128], strides = [1, 1]} : vector<8x512xf32> to vector<8x128xf32>
    %cst_178 = arith.constant 5.000000e-01 : f32
    %227 = vector.broadcast %cst_178 : f32 to vector<8x128xf32>
    %228 = arith.mulf %227, %226 : vector<8x128xf32>
    %229 = math.tanh %228 : vector<8x128xf32>
    %cst_179 = arith.constant 5.000000e-01 : f32
    %230 = vector.broadcast %cst_179 : f32 to vector<8x128xf32>
    %231 = arith.mulf %230, %229 : vector<8x128xf32>
    %cst_180 = arith.constant 5.000000e-01 : f32
    %232 = vector.broadcast %cst_180 : f32 to vector<8x128xf32>
    %233 = arith.addf %231, %232 : vector<8x128xf32>
    %234 = vector.extract_strided_slice %184 {offsets = [0, 256], sizes = [8, 128], strides = [1, 1]} : vector<8x512xf32> to vector<8x128xf32>
    %235 = math.tanh %234 : vector<8x128xf32>
    %236 = vector.extract_strided_slice %184 {offsets = [0, 384], sizes = [8, 128], strides = [1, 1]} : vector<8x512xf32> to vector<8x128xf32>
    %cst_181 = arith.constant 5.000000e-01 : f32
    %237 = vector.broadcast %cst_181 : f32 to vector<8x128xf32>
    %238 = arith.mulf %237, %236 : vector<8x128xf32>
    %239 = math.tanh %238 : vector<8x128xf32>
    %cst_182 = arith.constant 5.000000e-01 : f32
    %240 = vector.broadcast %cst_182 : f32 to vector<8x128xf32>
    %241 = arith.mulf %240, %239 : vector<8x128xf32>
    %cst_183 = arith.constant 5.000000e-01 : f32
    %242 = vector.broadcast %cst_183 : f32 to vector<8x128xf32>
    %243 = arith.addf %241, %242 : vector<8x128xf32>
    %244 = arith.mulf %233, %217 : vector<8x128xf32>
    %245 = arith.mulf %225, %235 : vector<8x128xf32>
    %246 = arith.addf %244, %245 : vector<8x128xf32>
    %247 = math.tanh %246 : vector<8x128xf32>
    %248 = arith.mulf %243, %247 : vector<8x128xf32>
    %c0_184 = arith.constant 0 : index
    %c0_185 = arith.constant 0 : index
    %249 = vector.load %arg11[%c0_184, %c0_185] : memref<8x128xf32, #tpu.memory_space<vmem>>, vector<8x128xf32>
    tpu.vector_store %arg11[%c0_184, %c0_185], %216 {strides = array<i32>} : memref<8x128xf32, #tpu.memory_space<vmem>>, vector<8x128xf32>,
    %c0_186 = arith.constant 0 : index
    %c0_187 = arith.constant 0 : index
    %250 = vector.load %arg12[%c0_186, %c0_187] : memref<8x128xf32, #tpu.memory_space<vmem>>, vector<8x128xf32>
    tpu.vector_store %arg12[%c0_186, %c0_187], %214 {strides = array<i32>} : memref<8x128xf32, #tpu.memory_space<vmem>>, vector<8x128xf32>,
    %c0_188 = arith.constant 0 : index
    %c0_189 = arith.constant 0 : index
    %251 = vector.load %arg13[%c0_188, %c0_189] : memref<8x128xf32, #tpu.memory_space<vmem>>, vector<8x128xf32>
    tpu.vector_store %arg13[%c0_188, %c0_189], %248 {strides = array<i32>} : memref<8x128xf32, #tpu.memory_space<vmem>>, vector<8x128xf32>,
    %c0_190 = arith.constant 0 : index
    %c0_191 = arith.constant 0 : index
    %252 = vector.load %arg14[%c0_190, %c0_191] : memref<8x128xf32, #tpu.memory_space<vmem>>, vector<8x128xf32>
    tpu.vector_store %arg14[%c0_190, %c0_191], %246 {strides = array<i32>} : memref<8x128xf32, #tpu.memory_space<vmem>>, vector<8x128xf32>,
    %c1_192 = arith.constant 1 : index
    %c0_193 = arith.constant 0 : index
    %c0_194 = arith.constant 0 : index
    %253 = vector.load %arg6[%c1_192, %c0_193, %c0_194] : memref<4x8x128xf32, #tpu.memory_space<vmem>>, vector<1x8x128xf32>
    %254 = vector.shape_cast %253 : vector<1x8x128xf32> to vector<8x128xf32>
    %255 = vector.shape_cast %216 : vector<8x128xf32> to vector<1x8x128xf32>
    tpu.vector_store %arg6[%c1_192, %c0_193, %c0_194], %255 {strides = array<i32>} : memref<4x8x128xf32, #tpu.memory_space<vmem>>, vector<1x8x128xf32>,
    %c2_195 = arith.constant 2 : index
    %c0_196 = arith.constant 0 : index
    %c0_197 = arith.constant 0 : index
    %256 = vector.load %arg7[%c2_195, %c0_196, %c0_197] : memref<4x8x128xf32, #tpu.memory_space<vmem>>, vector<1x8x128xf32>
    %257 = vector.shape_cast %256 : vector<1x8x128xf32> to vector<8x128xf32>
    %258 = vector.shape_cast %248 : vector<8x128xf32> to vector<1x8x128xf32>
    tpu.vector_store %arg7[%c2_195, %c0_196, %c0_197], %258 {strides = array<i32>} : memref<4x8x128xf32, #tpu.memory_space<vmem>>, vector<1x8x128xf32>,
    %c2_198 = arith.constant 2 : index
    %c0_199 = arith.constant 0 : index
    %c0_200 = arith.constant 0 : index
    %259 = vector.load %arg9[%c2_198, %c0_199, %c0_200] : memref<4x8x512xf32, #tpu.memory_space<vmem>>, vector<1x8x512xf32>
    %260 = vector.shape_cast %259 : vector<1x8x512xf32> to vector<8x512xf32>
    %c0_201 = arith.constant 0 : index
    %c0_202 = arith.constant 0 : index
    %261 = vector.load %arg11[%c0_201, %c0_202] : memref<8x128xf32, #tpu.memory_space<vmem>>, vector<8x128xf32>
    %c0_203 = arith.constant 0 : index
    %c0_204 = arith.constant 0 : index
    %c0_205 = arith.constant 0 : index
    %262 = vector.load %arg4[%c0_203, %c0_204, %c0_205] : memref<2x128x512xf32, #tpu.memory_space<vmem>>, vector<1x128x512xf32>
    %263 = vector.shape_cast %262 : vector<1x128x512xf32> to vector<128x512xf32>
    %cst_206 = arith.constant dense<0.000000e+00> : vector<8x512xf32>
    %264 = tpu.matmul %261, %263, %cst_206 {dimension_numbers = #tpu.dot_dimension_numbers<[1], [0], [0], [1], [0, 0, 1, 1], [], []>} : vector<8x128xf32>, vector<128x512xf32>, vector<8x512xf32> -> vector<8x512xf32>
    %265 = arith.addf %260, %264 : vector<8x512xf32>
    %c1_207 = arith.constant 1 : index
    %c0_208 = arith.constant 0 : index
    %c0_209 = arith.constant 0 : index
    %266 = vector.load %arg10[%c1_207, %c0_208, %c0_209] : memref<4x8x512xf32, #tpu.memory_space<vmem>>, vector<1x8x512xf32>
    %267 = vector.shape_cast %266 : vector<1x8x512xf32> to vector<8x512xf32>
    %c0_210 = arith.constant 0 : index
    %c0_211 = arith.constant 0 : index
    %268 = vector.load %arg13[%c0_210, %c0_211] : memref<8x128xf32, #tpu.memory_space<vmem>>, vector<8x128xf32>
    %c1_212 = arith.constant 1 : index
    %c0_213 = arith.constant 0 : index
    %c0_214 = arith.constant 0 : index
    %269 = vector.load %arg4[%c1_212, %c0_213, %c0_214] : memref<2x128x512xf32, #tpu.memory_space<vmem>>, vector<1x128x512xf32>
    %270 = vector.shape_cast %269 : vector<1x128x512xf32> to vector<128x512xf32>
    %cst_215 = arith.constant dense<0.000000e+00> : vector<8x512xf32>
    %271 = tpu.matmul %268, %270, %cst_215 {dimension_numbers = #tpu.dot_dimension_numbers<[1], [0], [0], [1], [0, 0, 1, 1], [], []>} : vector<8x128xf32>, vector<128x512xf32>, vector<8x512xf32> -> vector<8x512xf32>
    %272 = arith.addf %267, %271 : vector<8x512xf32>
    %c0_216 = arith.constant 0 : index
    %c0_217 = arith.constant 0 : index
    %273 = vector.load %arg12[%c0_216, %c0_217] : memref<8x128xf32, #tpu.memory_space<vmem>>, vector<8x128xf32>
    %274 = vector.extract_strided_slice %265 {offsets = [0, 0], sizes = [8, 128], strides = [1, 1]} : vector<8x512xf32> to vector<8x128xf32>
    %cst_218 = arith.constant 5.000000e-01 : f32
    %275 = vector.broadcast %cst_218 : f32 to vector<8x128xf32>
    %276 = arith.mulf %275, %274 : vector<8x128xf32>
    %277 = math.tanh %276 : vector<8x128xf32>
    %cst_219 = arith.constant 5.000000e-01 : f32
    %278 = vector.broadcast %cst_219 : f32 to vector<8x128xf32>
    %279 = arith.mulf %278, %277 : vector<8x128xf32>
    %cst_220 = arith.constant 5.000000e-01 : f32
    %280 = vector.broadcast %cst_220 : f32 to vector<8x128xf32>
    %281 = arith.addf %279, %280 : vector<8x128xf32>
    %282 = vector.extract_strided_slice %265 {offsets = [0, 128], sizes = [8, 128], strides = [1, 1]} : vector<8x512xf32> to vector<8x128xf32>
    %cst_221 = arith.constant 5.000000e-01 : f32
    %283 = vector.broadcast %cst_221 : f32 to vector<8x128xf32>
    %284 = arith.mulf %283, %282 : vector<8x128xf32>
    %285 = math.tanh %284 : vector<8x128xf32>
    %cst_222 = arith.constant 5.000000e-01 : f32
    %286 = vector.broadcast %cst_222 : f32 to vector<8x128xf32>
    %287 = arith.mulf %286, %285 : vector<8x128xf32>
    %cst_223 = arith.constant 5.000000e-01 : f32
    %288 = vector.broadcast %cst_223 : f32 to vector<8x128xf32>
    %289 = arith.addf %287, %288 : vector<8x128xf32>
    %290 = vector.extract_strided_slice %265 {offsets = [0, 256], sizes = [8, 128], strides = [1, 1]} : vector<8x512xf32> to vector<8x128xf32>
    %291 = math.tanh %290 : vector<8x128xf32>
    %292 = vector.extract_strided_slice %265 {offsets = [0, 384], sizes = [8, 128], strides = [1, 1]} : vector<8x512xf32> to vector<8x128xf32>
    %cst_224 = arith.constant 5.000000e-01 : f32
    %293 = vector.broadcast %cst_224 : f32 to vector<8x128xf32>
    %294 = arith.mulf %293, %292 : vector<8x128xf32>
    %295 = math.tanh %294 : vector<8x128xf32>
    %cst_225 = arith.constant 5.000000e-01 : f32
    %296 = vector.broadcast %cst_225 : f32 to vector<8x128xf32>
    %297 = arith.mulf %296, %295 : vector<8x128xf32>
    %cst_226 = arith.constant 5.000000e-01 : f32
    %298 = vector.broadcast %cst_226 : f32 to vector<8x128xf32>
    %299 = arith.addf %297, %298 : vector<8x128xf32>
    %300 = arith.mulf %289, %273 : vector<8x128xf32>
    %301 = arith.mulf %281, %291 : vector<8x128xf32>
    %302 = arith.addf %300, %301 : vector<8x128xf32>
    %303 = math.tanh %302 : vector<8x128xf32>
    %304 = arith.mulf %299, %303 : vector<8x128xf32>
    %c0_227 = arith.constant 0 : index
    %c0_228 = arith.constant 0 : index
    %305 = vector.load %arg14[%c0_227, %c0_228] : memref<8x128xf32, #tpu.memory_space<vmem>>, vector<8x128xf32>
    %306 = vector.extract_strided_slice %272 {offsets = [0, 0], sizes = [8, 128], strides = [1, 1]} : vector<8x512xf32> to vector<8x128xf32>
    %cst_229 = arith.constant 5.000000e-01 : f32
    %307 = vector.broadcast %cst_229 : f32 to vector<8x128xf32>
    %308 = arith.mulf %307, %306 : vector<8x128xf32>
    %309 = math.tanh %308 : vector<8x128xf32>
    %cst_230 = arith.constant 5.000000e-01 : f32
    %310 = vector.broadcast %cst_230 : f32 to vector<8x128xf32>
    %311 = arith.mulf %310, %309 : vector<8x128xf32>
    %cst_231 = arith.constant 5.000000e-01 : f32
    %312 = vector.broadcast %cst_231 : f32 to vector<8x128xf32>
    %313 = arith.addf %311, %312 : vector<8x128xf32>
    %314 = vector.extract_strided_slice %272 {offsets = [0, 128], sizes = [8, 128], strides = [1, 1]} : vector<8x512xf32> to vector<8x128xf32>
    %cst_232 = arith.constant 5.000000e-01 : f32
    %315 = vector.broadcast %cst_232 : f32 to vector<8x128xf32>
    %316 = arith.mulf %315, %314 : vector<8x128xf32>
    %317 = math.tanh %316 : vector<8x128xf32>
    %cst_233 = arith.constant 5.000000e-01 : f32
    %318 = vector.broadcast %cst_233 : f32 to vector<8x128xf32>
    %319 = arith.mulf %318, %317 : vector<8x128xf32>
    %cst_234 = arith.constant 5.000000e-01 : f32
    %320 = vector.broadcast %cst_234 : f32 to vector<8x128xf32>
    %321 = arith.addf %319, %320 : vector<8x128xf32>
    %322 = vector.extract_strided_slice %272 {offsets = [0, 256], sizes = [8, 128], strides = [1, 1]} : vector<8x512xf32> to vector<8x128xf32>
    %323 = math.tanh %322 : vector<8x128xf32>
    %324 = vector.extract_strided_slice %272 {offsets = [0, 384], sizes = [8, 128], strides = [1, 1]} : vector<8x512xf32> to vector<8x128xf32>
    %cst_235 = arith.constant 5.000000e-01 : f32
    %325 = vector.broadcast %cst_235 : f32 to vector<8x128xf32>
    %326 = arith.mulf %325, %324 : vector<8x128xf32>
    %327 = math.tanh %326 : vector<8x128xf32>
    %cst_236 = arith.constant 5.000000e-01 : f32
    %328 = vector.broadcast %cst_236 : f32 to vector<8x128xf32>
    %329 = arith.mulf %328, %327 : vector<8x128xf32>
    %cst_237 = arith.constant 5.000000e-01 : f32
    %330 = vector.broadcast %cst_237 : f32 to vector<8x128xf32>
    %331 = arith.addf %329, %330 : vector<8x128xf32>
    %332 = arith.mulf %321, %305 : vector<8x128xf32>
    %333 = arith.mulf %313, %323 : vector<8x128xf32>
    %334 = arith.addf %332, %333 : vector<8x128xf32>
    %335 = math.tanh %334 : vector<8x128xf32>
    %336 = arith.mulf %331, %335 : vector<8x128xf32>
    %c0_238 = arith.constant 0 : index
    %c0_239 = arith.constant 0 : index
    %337 = vector.load %arg11[%c0_238, %c0_239] : memref<8x128xf32, #tpu.memory_space<vmem>>, vector<8x128xf32>
    tpu.vector_store %arg11[%c0_238, %c0_239], %304 {strides = array<i32>} : memref<8x128xf32, #tpu.memory_space<vmem>>, vector<8x128xf32>,
    %c0_240 = arith.constant 0 : index
    %c0_241 = arith.constant 0 : index
    %338 = vector.load %arg12[%c0_240, %c0_241] : memref<8x128xf32, #tpu.memory_space<vmem>>, vector<8x128xf32>
    tpu.vector_store %arg12[%c0_240, %c0_241], %302 {strides = array<i32>} : memref<8x128xf32, #tpu.memory_space<vmem>>, vector<8x128xf32>,
    %c0_242 = arith.constant 0 : index
    %c0_243 = arith.constant 0 : index
    %339 = vector.load %arg13[%c0_242, %c0_243] : memref<8x128xf32, #tpu.memory_space<vmem>>, vector<8x128xf32>
    tpu.vector_store %arg13[%c0_242, %c0_243], %336 {strides = array<i32>} : memref<8x128xf32, #tpu.memory_space<vmem>>, vector<8x128xf32>,
    %c0_244 = arith.constant 0 : index
    %c0_245 = arith.constant 0 : index
    %340 = vector.load %arg14[%c0_244, %c0_245] : memref<8x128xf32, #tpu.memory_space<vmem>>, vector<8x128xf32>
    tpu.vector_store %arg14[%c0_244, %c0_245], %334 {strides = array<i32>} : memref<8x128xf32, #tpu.memory_space<vmem>>, vector<8x128xf32>,
    %c2_246 = arith.constant 2 : index
    %c0_247 = arith.constant 0 : index
    %c0_248 = arith.constant 0 : index
    %341 = vector.load %arg6[%c2_246, %c0_247, %c0_248] : memref<4x8x128xf32, #tpu.memory_space<vmem>>, vector<1x8x128xf32>
    %342 = vector.shape_cast %341 : vector<1x8x128xf32> to vector<8x128xf32>
    %343 = vector.shape_cast %304 : vector<8x128xf32> to vector<1x8x128xf32>
    tpu.vector_store %arg6[%c2_246, %c0_247, %c0_248], %343 {strides = array<i32>} : memref<4x8x128xf32, #tpu.memory_space<vmem>>, vector<1x8x128xf32>,
    %c1_249 = arith.constant 1 : index
    %c0_250 = arith.constant 0 : index
    %c0_251 = arith.constant 0 : index
    %344 = vector.load %arg7[%c1_249, %c0_250, %c0_251] : memref<4x8x128xf32, #tpu.memory_space<vmem>>, vector<1x8x128xf32>
    %345 = vector.shape_cast %344 : vector<1x8x128xf32> to vector<8x128xf32>
    %346 = vector.shape_cast %336 : vector<8x128xf32> to vector<1x8x128xf32>
    tpu.vector_store %arg7[%c1_249, %c0_250, %c0_251], %346 {strides = array<i32>} : memref<4x8x128xf32, #tpu.memory_space<vmem>>, vector<1x8x128xf32>,
    %c3_252 = arith.constant 3 : index
    %c0_253 = arith.constant 0 : index
    %c0_254 = arith.constant 0 : index
    %347 = vector.load %arg9[%c3_252, %c0_253, %c0_254] : memref<4x8x512xf32, #tpu.memory_space<vmem>>, vector<1x8x512xf32>
    %348 = vector.shape_cast %347 : vector<1x8x512xf32> to vector<8x512xf32>
    %c0_255 = arith.constant 0 : index
    %c0_256 = arith.constant 0 : index
    %349 = vector.load %arg11[%c0_255, %c0_256] : memref<8x128xf32, #tpu.memory_space<vmem>>, vector<8x128xf32>
    %c0_257 = arith.constant 0 : index
    %c0_258 = arith.constant 0 : index
    %c0_259 = arith.constant 0 : index
    %350 = vector.load %arg4[%c0_257, %c0_258, %c0_259] : memref<2x128x512xf32, #tpu.memory_space<vmem>>, vector<1x128x512xf32>
    %351 = vector.shape_cast %350 : vector<1x128x512xf32> to vector<128x512xf32>
    %cst_260 = arith.constant dense<0.000000e+00> : vector<8x512xf32>
    %352 = tpu.matmul %349, %351, %cst_260 {dimension_numbers = #tpu.dot_dimension_numbers<[1], [0], [0], [1], [0, 0, 1, 1], [], []>} : vector<8x128xf32>, vector<128x512xf32>, vector<8x512xf32> -> vector<8x512xf32>
    %353 = arith.addf %348, %352 : vector<8x512xf32>
    %c0_261 = arith.constant 0 : index
    %c0_262 = arith.constant 0 : index
    %c0_263 = arith.constant 0 : index
    %354 = vector.load %arg10[%c0_261, %c0_262, %c0_263] : memref<4x8x512xf32, #tpu.memory_space<vmem>>, vector<1x8x512xf32>
    %355 = vector.shape_cast %354 : vector<1x8x512xf32> to vector<8x512xf32>
    %c0_264 = arith.constant 0 : index
    %c0_265 = arith.constant 0 : index
    %356 = vector.load %arg13[%c0_264, %c0_265] : memref<8x128xf32, #tpu.memory_space<vmem>>, vector<8x128xf32>
    %c1_266 = arith.constant 1 : index
    %c0_267 = arith.constant 0 : index
    %c0_268 = arith.constant 0 : index
    %357 = vector.load %arg4[%c1_266, %c0_267, %c0_268] : memref<2x128x512xf32, #tpu.memory_space<vmem>>, vector<1x128x512xf32>
    %358 = vector.shape_cast %357 : vector<1x128x512xf32> to vector<128x512xf32>
    %cst_269 = arith.constant dense<0.000000e+00> : vector<8x512xf32>
    %359 = tpu.matmul %356, %358, %cst_269 {dimension_numbers = #tpu.dot_dimension_numbers<[1], [0], [0], [1], [0, 0, 1, 1], [], []>} : vector<8x128xf32>, vector<128x512xf32>, vector<8x512xf32> -> vector<8x512xf32>
    %360 = arith.addf %355, %359 : vector<8x512xf32>
    %c0_270 = arith.constant 0 : index
    %c0_271 = arith.constant 0 : index
    %361 = vector.load %arg12[%c0_270, %c0_271] : memref<8x128xf32, #tpu.memory_space<vmem>>, vector<8x128xf32>
    %362 = vector.extract_strided_slice %353 {offsets = [0, 0], sizes = [8, 128], strides = [1, 1]} : vector<8x512xf32> to vector<8x128xf32>
    %cst_272 = arith.constant 5.000000e-01 : f32
    %363 = vector.broadcast %cst_272 : f32 to vector<8x128xf32>
    %364 = arith.mulf %363, %362 : vector<8x128xf32>
    %365 = math.tanh %364 : vector<8x128xf32>
    %cst_273 = arith.constant 5.000000e-01 : f32
    %366 = vector.broadcast %cst_273 : f32 to vector<8x128xf32>
    %367 = arith.mulf %366, %365 : vector<8x128xf32>
    %cst_274 = arith.constant 5.000000e-01 : f32
    %368 = vector.broadcast %cst_274 : f32 to vector<8x128xf32>
    %369 = arith.addf %367, %368 : vector<8x128xf32>
    %370 = vector.extract_strided_slice %353 {offsets = [0, 128], sizes = [8, 128], strides = [1, 1]} : vector<8x512xf32> to vector<8x128xf32>
    %cst_275 = arith.constant 5.000000e-01 : f32
    %371 = vector.broadcast %cst_275 : f32 to vector<8x128xf32>
    %372 = arith.mulf %371, %370 : vector<8x128xf32>
    %373 = math.tanh %372 : vector<8x128xf32>
    %cst_276 = arith.constant 5.000000e-01 : f32
    %374 = vector.broadcast %cst_276 : f32 to vector<8x128xf32>
    %375 = arith.mulf %374, %373 : vector<8x128xf32>
    %cst_277 = arith.constant 5.000000e-01 : f32
    %376 = vector.broadcast %cst_277 : f32 to vector<8x128xf32>
    %377 = arith.addf %375, %376 : vector<8x128xf32>
    %378 = vector.extract_strided_slice %353 {offsets = [0, 256], sizes = [8, 128], strides = [1, 1]} : vector<8x512xf32> to vector<8x128xf32>
    %379 = math.tanh %378 : vector<8x128xf32>
    %380 = vector.extract_strided_slice %353 {offsets = [0, 384], sizes = [8, 128], strides = [1, 1]} : vector<8x512xf32> to vector<8x128xf32>
    %cst_278 = arith.constant 5.000000e-01 : f32
    %381 = vector.broadcast %cst_278 : f32 to vector<8x128xf32>
    %382 = arith.mulf %381, %380 : vector<8x128xf32>
    %383 = math.tanh %382 : vector<8x128xf32>
    %cst_279 = arith.constant 5.000000e-01 : f32
    %384 = vector.broadcast %cst_279 : f32 to vector<8x128xf32>
    %385 = arith.mulf %384, %383 : vector<8x128xf32>
    %cst_280 = arith.constant 5.000000e-01 : f32
    %386 = vector.broadcast %cst_280 : f32 to vector<8x128xf32>
    %387 = arith.addf %385, %386 : vector<8x128xf32>
    %388 = arith.mulf %377, %361 : vector<8x128xf32>
    %389 = arith.mulf %369, %379 : vector<8x128xf32>
    %390 = arith.addf %388, %389 : vector<8x128xf32>
    %391 = math.tanh %390 : vector<8x128xf32>
    %392 = arith.mulf %387, %391 : vector<8x128xf32>
    %c0_281 = arith.constant 0 : index
    %c0_282 = arith.constant 0 : index
    %393 = vector.load %arg14[%c0_281, %c0_282] : memref<8x128xf32, #tpu.memory_space<vmem>>, vector<8x128xf32>
    %394 = vector.extract_strided_slice %360 {offsets = [0, 0], sizes = [8, 128], strides = [1, 1]} : vector<8x512xf32> to vector<8x128xf32>
    %cst_283 = arith.constant 5.000000e-01 : f32
    %395 = vector.broadcast %cst_283 : f32 to vector<8x128xf32>
    %396 = arith.mulf %395, %394 : vector<8x128xf32>
    %397 = math.tanh %396 : vector<8x128xf32>
    %cst_284 = arith.constant 5.000000e-01 : f32
    %398 = vector.broadcast %cst_284 : f32 to vector<8x128xf32>
    %399 = arith.mulf %398, %397 : vector<8x128xf32>
    %cst_285 = arith.constant 5.000000e-01 : f32
    %400 = vector.broadcast %cst_285 : f32 to vector<8x128xf32>
    %401 = arith.addf %399, %400 : vector<8x128xf32>
    %402 = vector.extract_strided_slice %360 {offsets = [0, 128], sizes = [8, 128], strides = [1, 1]} : vector<8x512xf32> to vector<8x128xf32>
    %cst_286 = arith.constant 5.000000e-01 : f32
    %403 = vector.broadcast %cst_286 : f32 to vector<8x128xf32>
    %404 = arith.mulf %403, %402 : vector<8x128xf32>
    %405 = math.tanh %404 : vector<8x128xf32>
    %cst_287 = arith.constant 5.000000e-01 : f32
    %406 = vector.broadcast %cst_287 : f32 to vector<8x128xf32>
    %407 = arith.mulf %406, %405 : vector<8x128xf32>
    %cst_288 = arith.constant 5.000000e-01 : f32
    %408 = vector.broadcast %cst_288 : f32 to vector<8x128xf32>
    %409 = arith.addf %407, %408 : vector<8x128xf32>
    %410 = vector.extract_strided_slice %360 {offsets = [0, 256], sizes = [8, 128], strides = [1, 1]} : vector<8x512xf32> to vector<8x128xf32>
    %411 = math.tanh %410 : vector<8x128xf32>
    %412 = vector.extract_strided_slice %360 {offsets = [0, 384], sizes = [8, 128], strides = [1, 1]} : vector<8x512xf32> to vector<8x128xf32>
    %cst_289 = arith.constant 5.000000e-01 : f32
    %413 = vector.broadcast %cst_289 : f32 to vector<8x128xf32>
    %414 = arith.mulf %413, %412 : vector<8x128xf32>
    %415 = math.tanh %414 : vector<8x128xf32>
    %cst_290 = arith.constant 5.000000e-01 : f32
    %416 = vector.broadcast %cst_290 : f32 to vector<8x128xf32>
    %417 = arith.mulf %416, %415 : vector<8x128xf32>
    %cst_291 = arith.constant 5.000000e-01 : f32
    %418 = vector.broadcast %cst_291 : f32 to vector<8x128xf32>
    %419 = arith.addf %417, %418 : vector<8x128xf32>
    %420 = arith.mulf %409, %393 : vector<8x128xf32>
    %421 = arith.mulf %401, %411 : vector<8x128xf32>
    %422 = arith.addf %420, %421 : vector<8x128xf32>
    %423 = math.tanh %422 : vector<8x128xf32>
    %424 = arith.mulf %419, %423 : vector<8x128xf32>
    %c0_292 = arith.constant 0 : index
    %c0_293 = arith.constant 0 : index
    %425 = vector.load %arg11[%c0_292, %c0_293] : memref<8x128xf32, #tpu.memory_space<vmem>>, vector<8x128xf32>
    tpu.vector_store %arg11[%c0_292, %c0_293], %392 {strides = array<i32>} : memref<8x128xf32, #tpu.memory_space<vmem>>, vector<8x128xf32>,
    %c0_294 = arith.constant 0 : index
    %c0_295 = arith.constant 0 : index
    %426 = vector.load %arg12[%c0_294, %c0_295] : memref<8x128xf32, #tpu.memory_space<vmem>>, vector<8x128xf32>
    tpu.vector_store %arg12[%c0_294, %c0_295], %390 {strides = array<i32>} : memref<8x128xf32, #tpu.memory_space<vmem>>, vector<8x128xf32>,
    %c0_296 = arith.constant 0 : index
    %c0_297 = arith.constant 0 : index
    %427 = vector.load %arg13[%c0_296, %c0_297] : memref<8x128xf32, #tpu.memory_space<vmem>>, vector<8x128xf32>
    tpu.vector_store %arg13[%c0_296, %c0_297], %424 {strides = array<i32>} : memref<8x128xf32, #tpu.memory_space<vmem>>, vector<8x128xf32>,
    %c0_298 = arith.constant 0 : index
    %c0_299 = arith.constant 0 : index
    %428 = vector.load %arg14[%c0_298, %c0_299] : memref<8x128xf32, #tpu.memory_space<vmem>>, vector<8x128xf32>
    tpu.vector_store %arg14[%c0_298, %c0_299], %422 {strides = array<i32>} : memref<8x128xf32, #tpu.memory_space<vmem>>, vector<8x128xf32>,
    %c3_300 = arith.constant 3 : index
    %c0_301 = arith.constant 0 : index
    %c0_302 = arith.constant 0 : index
    %429 = vector.load %arg6[%c3_300, %c0_301, %c0_302] : memref<4x8x128xf32, #tpu.memory_space<vmem>>, vector<1x8x128xf32>
    %430 = vector.shape_cast %429 : vector<1x8x128xf32> to vector<8x128xf32>
    %431 = vector.shape_cast %392 : vector<8x128xf32> to vector<1x8x128xf32>
    tpu.vector_store %arg6[%c3_300, %c0_301, %c0_302], %431 {strides = array<i32>} : memref<4x8x128xf32, #tpu.memory_space<vmem>>, vector<1x8x128xf32>,
    %c0_303 = arith.constant 0 : index
    %c0_304 = arith.constant 0 : index
    %c0_305 = arith.constant 0 : index
    %432 = vector.load %arg7[%c0_303, %c0_304, %c0_305] : memref<4x8x128xf32, #tpu.memory_space<vmem>>, vector<1x8x128xf32>
    %433 = vector.shape_cast %432 : vector<1x8x128xf32> to vector<8x128xf32>
    %434 = vector.shape_cast %424 : vector<8x128xf32> to vector<1x8x128xf32>
    tpu.vector_store %arg7[%c0_303, %c0_304, %c0_305], %434 {strides = array<i32>} : memref<4x8x128xf32, #tpu.memory_space<vmem>>, vector<1x8x128xf32>,
    %c1_i32 = arith.constant 1 : i32
    %435 = arith.cmpi eq, %arg0, %c1_i32 : i32
    %436 = arith.extui %435 : i1 to i32
    %c0_i32_306 = arith.constant 0 : i32
    %437 = arith.cmpi ne, %436, %c0_i32_306 : i32
    scf.if %437 {
      %c0_307 = arith.constant 0 : index
      %c0_308 = arith.constant 0 : index
      %438 = vector.load %arg12[%c0_307, %c0_308] : memref<8x128xf32, #tpu.memory_space<vmem>>, vector<8x128xf32>
      %c0_309 = arith.constant 0 : index
      %c0_310 = arith.constant 0 : index
      %c0_311 = arith.constant 0 : index
      %439 = vector.load %arg8[%c0_309, %c0_310, %c0_311] : memref<2x8x128xf32, #tpu.memory_space<vmem>>, vector<1x8x128xf32>
      %440 = vector.shape_cast %439 : vector<1x8x128xf32> to vector<8x128xf32>
      %441 = vector.shape_cast %438 : vector<8x128xf32> to vector<1x8x128xf32>
      tpu.vector_store %arg8[%c0_309, %c0_310, %c0_311], %441 {strides = array<i32>} : memref<2x8x128xf32, #tpu.memory_space<vmem>>, vector<1x8x128xf32>,
      %c0_312 = arith.constant 0 : index
      %c0_313 = arith.constant 0 : index
      %442 = vector.load %arg14[%c0_312, %c0_313] : memref<8x128xf32, #tpu.memory_space<vmem>>, vector<8x128xf32>
      %c1_314 = arith.constant 1 : index
      %c0_315 = arith.constant 0 : index
      %c0_316 = arith.constant 0 : index
      %443 = vector.load %arg8[%c1_314, %c0_315, %c0_316] : memref<2x8x128xf32, #tpu.memory_space<vmem>>, vector<1x8x128xf32>
      %444 = vector.shape_cast %443 : vector<1x8x128xf32> to vector<8x128xf32>
      %445 = vector.shape_cast %442 : vector<8x128xf32> to vector<1x8x128xf32>
      tpu.vector_store %arg8[%c1_314, %c0_315, %c0_316], %445 {strides = array<i32>} : memref<2x8x128xf32, #tpu.memory_space<vmem>>, vector<1x8x128xf32>,
    } else {
    }
    return
  }
  func.func @transform_0(%arg0: i32) -> (i32, i32, i32, i32) {
    %c0_i32 = arith.constant 0 : i32
    %c0_i32_0 = arith.constant 0 : i32
    %c0_i32_1 = arith.constant 0 : i32
    %c0_i32_2 = arith.constant 0 : i32
    return %arg0, %c0_i32, %c0_i32_0, %c0_i32_1 : i32, i32, i32, i32
  }
  func.func @transform_1(%arg0: i32) -> (i32, i32, i32, i32) {
    %c1_i32 = arith.constant 1 : i32
    %0 = arith.subi %c1_i32, %arg0 : i32
    %c0_i32 = arith.constant 0 : i32
    %c0_i32_0 = arith.constant 0 : i32
    %c0_i32_1 = arith.constant 0 : i32
    %c0_i32_2 = arith.constant 0 : i32
    return %0, %c0_i32, %c0_i32_0, %c0_i32_1 : i32, i32, i32, i32
  }
  func.func @transform_2(%arg0: i32) -> (i32, i32, i32) {
    %c0_i32 = arith.constant 0 : i32
    %c0_i32_0 = arith.constant 0 : i32
    %c0_i32_1 = arith.constant 0 : i32
    %c0_i32_2 = arith.constant 0 : i32
    return %c0_i32, %c0_i32_0, %c0_i32_1 : i32, i32, i32
  }
  func.func @transform_3(%arg0: i32) -> (i32, i32, i32) {
    %c0_i32 = arith.constant 0 : i32
    %c0_i32_0 = arith.constant 0 : i32
    %c0_i32_1 = arith.constant 0 : i32
    %c0_i32_2 = arith.constant 0 : i32
    return %c0_i32, %c0_i32_0, %c0_i32_1 : i32, i32, i32
  }
  func.func @transform_4(%arg0: i32) -> (i32, i32, i32) {
    %c0_i32 = arith.constant 0 : i32
    %c0_i32_0 = arith.constant 0 : i32
    %c0_i32_1 = arith.constant 0 : i32
    %c0_i32_2 = arith.constant 0 : i32
    return %c0_i32, %c0_i32_0, %c0_i32_1 : i32, i32, i32
  }
  func.func @transform_5(%arg0: i32) -> (i32, i32, i32) {
    %c0_i32 = arith.constant 0 : i32
    %c0_i32_0 = arith.constant 0 : i32
    %c0_i32_1 = arith.constant 0 : i32
    return %arg0, %c0_i32, %c0_i32_0 : i32, i32, i32
  }
  func.func @transform_6(%arg0: i32) -> (i32, i32, i32) {
    %c1_i32 = arith.constant 1 : i32
    %0 = arith.subi %c1_i32, %arg0 : i32
    %c0_i32 = arith.constant 0 : i32
    %c0_i32_0 = arith.constant 0 : i32
    %c0_i32_1 = arith.constant 0 : i32
    return %0, %c0_i32, %c0_i32_0 : i32, i32, i32
  }
  func.func @transform_7(%arg0: i32) -> (i32, i32, i32) {
    %c0_i32 = arith.constant 0 : i32
    %c0_i32_0 = arith.constant 0 : i32
    %c0_i32_1 = arith.constant 0 : i32
    %c0_i32_2 = arith.constant 0 : i32
    return %c0_i32, %c0_i32_0, %c0_i32_1 : i32, i32, i32
  }
}

</mosaic_0001>

<bundles_post_ra>
// kernel: lstm_forward.1
= control target key start
LH: loop header
LB: loop body
LE: loop exit
PB: predicated region body
PF: predicated region fallthrough
CT: control target
= control target key end

     0   :  { %s4154_s24 = smov 0   ;;  %s6337_s0 = inlined_call_operand.vmem [shape: f32[2,4,8,16], index: 0, kind: input, shape index: {}, may-alias: {0,1}]   ;;  %s6338_s1 = inlined_call_operand.vmem [shape: f32[2,4,8,16], index: 1, kind: input, shape index: {}, may-alias: {0,1}]   ;;  %s6339_s2 = inlined_call_operand.vmem [shape: f32[2,16,512], index: 2, kind: input, shape index: {}]   ;;  %s6340_s3 = inlined_call_operand.vmem [shape: f32[2,128,512], index: 3, kind: input, shape index: {}]   ;;  %s6341_s4 = inlined_call_operand.vmem [shape: f32[2,1,512], index: 4, kind: input, shape index: {}]   ;;  %s6342_s5 = inlined_call_operand.vmem [shape: f32[8,8,128], index: 5, kind: output, shape index: {0}]   ;;  %s6343_s6 = inlined_call_operand.vmem [shape: f32[8,8,128], index: 6, kind: output, shape index: {1}]   ;;  %s6344_s7 = inlined_call_operand.vmem [shape: f32[2,8,128], index: 7, kind: output, shape index: {2}]  }
   0x1 LB: > { %s4160_s25 = sadd.s32 4294967295, %s4110_s24   ;;  %p3681_p0 = scmp.ge.s32.totalorder %s4110_s24, 1  ;;  %s4110_s24 = sphi %s4154_s24, %s18_s24  }
   0x2   : > { %p253_p1 = scmp.lt.s32.totalorder %s4110_s24, 3 }
   0x4   : > { %p254_p2 = pnand %p3681_p0, %p253_p1 }
   0x6   : > { %257 = sbr.rel (%p254_p2) target bundleno = 1096 (0x448), region = 40 }
   0xb   : > { %p297_p3 = scmp.lt.s32.totalorder %s4160_s25, 1  ;;  %s302_s26 = ssub.s32 1, %s4160_s25 }
   0xc   : > { %p303_p4 = scmp.lt.s32.totalorder %s302_s26, 1  ;;  %s3686_s27 = sshll.u32 %s4160_s25, 2 }
   0xd   : > { %s298_s28 = scalar_select %p297_p3, %s4160_s25, 1 }
   0xe   : > { %s304_s29 = scalar_select %p303_p4, %s302_s26, 1 }
   0xf   : > { %s4012_s30 = sshll.u32 %s298_s28, 5  ;;  %p310_p5 = scmp.lt.s32.totalorder %s3686_s27, 7 }
  0x10   : > { %s4171_s10 = scalar_lea.vmem %s6337_s0, %s4012_s30  ;;  %s4013_s11 = sshll.u32 %s304_s29, 5 }
  0x11   : > { %s4176_s14 = scalar_lea.vmem %s6338_s1, %s4013_s11  ;;  %s3688_s15 = sshll.u32 %s302_s26, 2 }
  0x12   : > { %s6792_s27 = smov (!%p310_p5, %s3686_s27), 7  ;;  %p317_p6 = scmp.lt.s32.totalorder %s3688_s15, 7 }
  0x13   : > { %s3687_s16 = sshll.u32 %s6792_s27, 3  ;;  %p3690_p7 = scmp.ne.s32.totalorder %s4160_s25, 0 }
  0x14   : > { %s4181_s19 = scalar_lea.vmem %s6342_s5, %s3687_s16  ;;  %s6794_s15 = smov (!%p317_p6, %s3688_s15), 7 }
  0x15   : > { %s3689_s20 = sshll.u32 %s6794_s15, 3  ;;  %326 = sbr.rel (%p3690_p7) target bundleno = 29 (0x1d), region = 44 }
  0x16   : > { %s4186_s23 = scalar_lea.vmem %s6343_s6, %s3689_s20 }
  0x1a   : > { %v4112_v0 = vmov 0.0  }
  0x1b   : > { %327 = vst [vmem:[#allocation4] sm:$0xff] %v4112_v0  ;;  %328 = vst [vmem:[#allocation5] sm:$0xff] %v4112_v0 }
  0x1c   : > { %329 = vst [vmem:[#allocation6] sm:$0xff] %v4112_v0  ;;  %330 = vst [vmem:[#allocation7] sm:$0xff] %v4112_v0 }
  0x1d PF: > { %v4192_v1 = vld [vmem:[%s6339_s2 + $0x28] sm:$0xff]  ;;  %v4197_v2 = vld [vmem:[%s6339_s2 + $0x38] sm:$0xff]  ;;  %v4202_v3 = vld [vmem:[%s6339_s2 + $0x20] sm:$0xff]  ;;  %vm385_vm0 = vcmask 130048   ;;  %v6345_v11 = vmov 0.0   ;;  %p4008_p8 = scmp.ne.s32.totalorder %s4160_s25, 1 }
  0x1e   : > { %417 = vmatprep.subr.mxu0 %v4192_v1  ;;  %488 = vmatprep.subr.mxu1 %v4197_v2  ;;  %v4209_v4 = vld [vmem:[%s6339_s2 + $0x30] sm:$0xff]  ;;  %v4214_v5 = vld [vmem:[%s6339_s2 + $0x8] sm:$0xff]  ;;  %v4219_v6 = vld [vmem:[%s6339_s2 + $0x18] sm:$0xff] }
  0x1f   : > { %418 = vmatpush1.msra.mxu0 %v4202_v3  ;;  %489 = vmatpush1.msra.mxu1 %v4209_v4  ;;  %v4226_v7 = vld [vmem:[%s6339_s2] sm:$0xff]  ;;  %v4231_v8 = vld [vmem:[%s6339_s2 + $0x10] sm:$0xff]  ;;  %v4239_v10 = vld [vmem:[%s6339_s2 + $0x68] sm:$0xff] }
  0x20   : > { %v376_v9 = vld [vmem:[%s4171_s10] sm:$0xff]  ;;  %419 = vmatprep.subr.mxu0 %v4214_v5  ;;  %490 = vmatprep.subr.mxu1 %v4219_v6  ;;  %v4246_v12 = vld [vmem:[%s6339_s2 + $0x78] sm:$0xff]  ;;  %v4258_v14 = vld [vmem:[%s6339_s2 + $0x70] sm:$0xff] }
  0x21   : > { %420 = vmatpush1.msra.mxu0 %v4226_v7  ;;  %453 = vmatprep.mubr.f32.mxu0 %v6345_v11  ;;  %v4253_v13 = vld [vmem:[%s6339_s2 + $0x60] sm:$0xff]  ;;  %v4265_v15 = vld [vmem:[%s6339_s2 + $0x48] sm:$0xff]  ;;  %v4270_v16 = vld [vmem:[%s6339_s2 + $0x58] sm:$0xff] }
  0x22   : > { %491 = vmatpush1.msra.mxu1 %v4231_v8  ;;  %3692 = vmatmul.mubr.msk.f32.vlgmr.msra.gmra.mxu0 %vm385_vm0, %v376_v9  ;;  %v4277_v17 = vld [vmem:[%s6339_s2 + $0x40] sm:$0xff]  ;;  %v4284_v18 = vld [vmem:[%s6339_s2 + $0x50] sm:$0xff]  ;;  %v3704_v20 = vld [vmem:[%s4171_s10 + $0x8] sm:$0xff] }
  0x23   : > { %524 = vmatprep.mubr.f32.mxu1 %v6345_v11  ;;  %576 = vmatprep.subr.mxu0 %v4239_v10  ;;  %v535_v19 = vld [vmem:[%s4176_s14] sm:$0xff]  ;;  %v3707_v21 = vld [vmem:[%s4176_s14 + $0x8] sm:$0xff]  ;;  %v3718_v22 = vld [vmem:[%s4171_s10 + $0x10] sm:$0xff] }
  0x24   : > { %647 = vmatprep.subr.mxu1 %v4246_v12  ;;  %3693 = vmatmul.mubr.msk.f32.vlgmr.msra.gmra.mxu1 %vm385_vm0, %v376_v9  ;;  %v3721_v23 = vld [vmem:[%s4176_s14 + $0x10] sm:$0xff]  ;;  %v3732_v24 = vld [vmem:[%s4171_s10 + $0x18] sm:$0xff]  ;;  %v4370_v26 = vld [vmem:[%s6340_s3 + $0x1e8] sm:$0xff] }
  0x25   : > { %577 = vmatpush1.msra.mxu0 %v4253_v13  ;;  %648 = vmatpush1.msra.mxu1 %v4258_v14  ;;  %v3735_v25 = vld [vmem:[%s4176_s14 + $0x18] sm:$0xff]  ;;  %v4384_v28 = vld [vmem:[%s6340_s3 + $0x1e0] sm:$0xff]  ;;  %v4389_v29 = vld [vmem:[%s6340_s3 + $0x1f0] sm:$0xff] }
  0x26   : > { %578 = vmatprep.subr.mxu0 %v4265_v15  ;;  %649 = vmatprep.subr.mxu1 %v4270_v16  ;;  %v4377_v27 = vld [vmem:[%s6340_s3 + $0x1f8] sm:$0xff]  ;;  %v4396_v30 = vld [vmem:[%s6340_s3 + $0x1c8] sm:$0xff]  ;;  %v4408_v32 = vld [vmem:[%s6340_s3 + $0x1c0] sm:$0xff] }
  0x27   : > { %579 = vmatpush1.msra.mxu0 %v4277_v17  ;;  %612 = vmatprep.mubr.f32.mxu0 %v6345_v11  ;;  %v4401_v31 = vld [vmem:[%s6340_s3 + $0x1d8] sm:$0xff]  ;;  %v4413_v33 = vld [vmem:[%s6340_s3 + $0x1d0] sm:$0xff]  ;;  %v4420_v34 = vld [vmem:[%s6340_s3 + $0x1a8] sm:$0xff] }
  0x28   : > { %650 = vmatpush1.msra.mxu1 %v4284_v18  ;;  %3702 = vmatmul.mubr.msk.f32.vlgmr.msra.gmra.mxu0 %vm385_vm0, %v535_v19  ;;  %v4425_v35 = vld [vmem:[%s6340_s3 + $0x1b8] sm:$0xff]  ;;  %v4432_v36 = vld [vmem:[%s6340_s3 + $0x1a0] sm:$0xff]  ;;  %v4437_v37 = vld [vmem:[%s6340_s3 + $0x1b0] sm:$0xff] }
  0x29   : > { %683 = vmatprep.mubr.f32.mxu1 %v6345_v11  ;;  %735 = vmatprep.subr.mxu0 %v4192_v1  ;;  %v4444_v38 = vld [vmem:[%s6340_s3 + $0x188] sm:$0xff]  ;;  %v4449_v39 = vld [vmem:[%s6340_s3 + $0x198] sm:$0xff]  ;;  %v4456_v40 = vld [vmem:[%s6340_s3 + $0x180] sm:$0xff] }
  0x2a   : > { %806 = vmatprep.subr.mxu1 %v4197_v2  ;;  %3703 = vmatmul.mubr.msk.f32.vlgmr.msra.gmra.mxu1 %vm385_vm0, %v535_v19  ;;  %v4461_v41 = vld [vmem:[%s6340_s3 + $0x190] sm:$0xff]  ;;  %v4468_v42 = vld [vmem:[%s6340_s3 + $0x168] sm:$0xff]  ;;  %v4473_v43 = vld [vmem:[%s6340_s3 + $0x178] sm:$0xff] }
  0x2b   : > { %736 = vmatpush1.msra.mxu0 %v4202_v3  ;;  %807 = vmatpush1.msra.mxu1 %v4209_v4  ;;  %v4480_v44 = vld [vmem:[%s6340_s3 + $0x160] sm:$0xff]  ;;  %v4485_v45 = vld [vmem:[%s6340_s3 + $0x170] sm:$0xff]  ;;  %v4492_v46 = vld [vmem:[%s6340_s3 + $0x148] sm:$0xff] }
  0x2c   : > { %737 = vmatprep.subr.mxu0 %v4214_v5  ;;  %808 = vmatprep.subr.mxu1 %v4219_v6  ;;  %v4497_v47 = vld [vmem:[%s6340_s3 + $0x158] sm:$0xff]  ;;  %v4504_v48 = vld [vmem:[%s6340_s3 + $0x140] sm:$0xff]  ;;  %v4509_v49 = vld [vmem:[%s6340_s3 + $0x150] sm:$0xff] }
  0x2d   : > { %738 = vmatpush1.msra.mxu0 %v4226_v7  ;;  %771 = vmatprep.mubr.f32.mxu0 %v6345_v11  ;;  %v4516_v50 = vld [vmem:[%s6340_s3 + $0x128] sm:$0xff]  ;;  %v4521_v51 = vld [vmem:[%s6340_s3 + $0x138] sm:$0xff]  ;;  %v4528_v52 = vld [vmem:[%s6340_s3 + $0x120] sm:$0xff] }
  0x2e   : > { %809 = vmatpush1.msra.mxu1 %v4231_v8  ;;  %3705 = vmatmul.mubr.msk.f32.vlgmr.msra.gmra.mxu0 %vm385_vm0, %v3704_v20  ;;  %v4533_v53 = vld [vmem:[%s6340_s3 + $0x130] sm:$0xff]  ;;  %v4540_v54 = vld [vmem:[%s6340_s3 + $0x108] sm:$0xff]  ;;  %v4545_v55 = vld [vmem:[%s6340_s3 + $0x118] sm:$0xff] }
  0x2f   : > { %842 = vmatprep.mubr.f32.mxu1 %v6345_v11  ;;  %895 = vmatprep.subr.mxu0 %v4239_v10  ;;  %v4552_v56 = vld [vmem:[%s6340_s3 + $0x100] sm:$0xff]  ;;  %v4557_v57 = vld [vmem:[%s6340_s3 + $0x110] sm:$0xff]  ;;  %v4564_v58 = vld [vmem:[%s6340_s3 + $0xe8] sm:$0xff] }
  0x30   : > { %966 = vmatprep.subr.mxu1 %v4246_v12  ;;  %3706 = vmatmul.mubr.msk.f32.vlgmr.msra.gmra.mxu1 %vm385_vm0, %v3704_v20  ;;  %v4569_v59 = vld [vmem:[%s6340_s3 + $0xf8] sm:$0xff]  ;;  %v4576_v60 = vld [vmem:[%s6340_s3 + $0xe0] sm:$0xff]  ;;  %v4581_v61 = vld [vmem:[%s6340_s3 + $0xf0] sm:$0xff] }
  0x31   : > { %896 = vmatpush1.msra.mxu0 %v4253_v13  ;;  %967 = vmatpush1.msra.mxu1 %v4258_v14  ;;  %v4588_v62 = vld [vmem:[%s6340_s3 + $0xc8] sm:$0xff]  ;;  %v4593_v63 = vld [vmem:[%s6340_s3 + $0xd8] sm:$0xff]  ;;  %v4600_v0 = vld [vmem:[%s6340_s3 + $0xc0] sm:$0xff] }
  0x32   : > { %897 = vmatprep.subr.mxu0 %v4265_v15  ;;  %968 = vmatprep.subr.mxu1 %v4270_v16  ;;  %v4653_v9 = vld [vmem:[%s6340_s3 + $0x90] sm:$0xff]  ;;  %v4708_v19 = vld [vmem:[%s6340_s3 + $0x28] sm:$0xff]  ;;  %v4713_v20 = vld [vmem:[%s6340_s3 + $0x38] sm:$0xff] }
  0x33   : > { %898 = vmatpush1.msra.mxu0 %v4277_v17  ;;  %931 = vmatprep.mubr.f32.mxu0 %v6345_v11  ;;  %6485 = vst [vmem:[#allocation9_spill] sm:$0xff] %v4708_v19  ;;  %6486 = vst [vmem:[#allocation10_spill] sm:$0xff] %v4713_v20 }
  0x34   : > { %969 = vmatpush1.msra.mxu1 %v4284_v18  ;;  %3716 = vmatmul.mubr.msk.f32.vlgmr.msra.gmra.mxu0 %vm385_vm0, %v3707_v21 }
  0x35   : > { %1002 = vmatprep.mubr.f32.mxu1 %v6345_v11  ;;  %1055 = vmatprep.subr.mxu0 %v4192_v1 }
  0x36   : > { %1126 = vmatprep.subr.mxu1 %v4197_v2  ;;  %3717 = vmatmul.mubr.msk.f32.vlgmr.msra.gmra.mxu1 %vm385_vm0, %v3707_v21  ;;  %v4720_v21 = vld [vmem:[%s6340_s3 + $0x20] sm:$0xff] }
  0x37   : > { %1056 = vmatpush1.msra.mxu0 %v4202_v3  ;;  %1127 = vmatpush1.msra.mxu1 %v4209_v4  ;;  %6487 = vst [vmem:[#allocation11_spill] sm:$0xff] %v4720_v21 }
  0x38   : > { %1057 = vmatprep.subr.mxu0 %v4214_v5  ;;  %1128 = vmatprep.subr.mxu1 %v4219_v6 }
  0x39   : > { %1058 = vmatpush1.msra.mxu0 %v4226_v7  ;;  %1091 = vmatprep.mubr.f32.mxu0 %v6345_v11 }
  0x3a   : > { %1129 = vmatpush1.msra.mxu1 %v4231_v8  ;;  %3719 = vmatmul.mubr.msk.f32.vlgmr.msra.gmra.mxu0 %vm385_vm0, %v3718_v22 }
  0x3b   : > { %1162 = vmatprep.mubr.f32.mxu1 %v6345_v11  ;;  %1215 = vmatprep.subr.mxu0 %v4239_v10 }
  0x3c   : > { %1286 = vmatprep.subr.mxu1 %v4246_v12  ;;  %3720 = vmatmul.mubr.msk.f32.vlgmr.msra.gmra.mxu1 %vm385_vm0, %v3718_v22  ;;  %v4725_v22 = vld [vmem:[%s6340_s3 + $0x30] sm:$0xff] }
  0x3d   : > { %1216 = vmatpush1.msra.mxu0 %v4253_v13  ;;  %1287 = vmatpush1.msra.mxu1 %v4258_v14  ;;  %6488 = vst [vmem:[#allocation12_spill] sm:$0xff] %v4725_v22 }
  0x3e   : > { %1217 = vmatprep.subr.mxu0 %v4265_v15  ;;  %1288 = vmatprep.subr.mxu1 %v4270_v16 }
  0x3f   : > { %1218 = vmatpush1.msra.mxu0 %v4277_v17  ;;  %1251 = vmatprep.mubr.f32.mxu0 %v6345_v11 }
  0x40   : > { %1289 = vmatpush1.msra.mxu1 %v4284_v18  ;;  %3730 = vmatmul.mubr.msk.f32.vlgmr.msra.gmra.mxu0 %vm385_vm0, %v3721_v23 }
  0x41   : > { %1322 = vmatprep.mubr.f32.mxu1 %v6345_v11  ;;  %1375 = vmatprep.subr.mxu0 %v4192_v1  ;;  %v4605_v1 = vld [vmem:[%s6340_s3 + $0xd0] sm:$0xff] }
  0x42   : > { %1446 = vmatprep.subr.mxu1 %v4197_v2  ;;  %3731 = vmatmul.mubr.msk.f32.vlgmr.msra.gmra.mxu1 %vm385_vm0, %v3721_v23  ;;  %v4612_v2 = vld [vmem:[%s6340_s3 + $0xa8] sm:$0xff] }
  0x43   : > { %1376 = vmatpush1.msra.mxu0 %v4202_v3  ;;  %1447 = vmatpush1.msra.mxu1 %v4209_v4  ;;  %v4617_v3 = vld [vmem:[%s6340_s3 + $0xb8] sm:$0xff]  ;;  %v4624_v4 = vld [vmem:[%s6340_s3 + $0xa0] sm:$0xff]  ;;  %v4732_v23 = vld [vmem:[%s6340_s3 + $0x8] sm:$0xff] }
  0x44   : > { %1377 = vmatprep.subr.mxu0 %v4214_v5  ;;  %1448 = vmatprep.subr.mxu1 %v4219_v6  ;;  %v4629_v5 = vld [vmem:[%s6340_s3 + $0xb0] sm:$0xff]  ;;  %v4636_v6 = vld [vmem:[%s6340_s3 + $0x88] sm:$0xff]  ;;  %6489 = vst [vmem:[#allocation13_spill] sm:$0xff] %v4732_v23 }
  0x45   : > { %1378 = vmatpush1.msra.mxu0 %v4226_v7  ;;  %1411 = vmatprep.mubr.f32.mxu0 %v6345_v11  ;;  %v4641_v7 = vld [vmem:[%s6340_s3 + $0x98] sm:$0xff] }
  0x46   : > { %1449 = vmatpush1.msra.mxu1 %v4231_v8  ;;  %3733 = vmatmul.mubr.msk.f32.vlgmr.msra.gmra.mxu0 %vm385_vm0, %v3732_v24  ;;  %v4648_v8 = vld [vmem:[%s6340_s3 + $0x80] sm:$0xff] }
  0x47   : > { %1482 = vmatprep.mubr.f32.mxu1 %v6345_v11  ;;  %1535 = vmatprep.subr.mxu0 %v4239_v10  ;;  %v4660_v10 = vld [vmem:[%s6340_s3 + $0x68] sm:$0xff] }
  0x48   : > { %1606 = vmatprep.subr.mxu1 %v4246_v12  ;;  %3734 = vmatmul.mubr.msk.f32.vlgmr.msra.gmra.mxu1 %vm385_vm0, %v3732_v24  ;;  %v4665_v12 = vld [vmem:[%s6340_s3 + $0x78] sm:$0xff] }
  0x49   : > { %1536 = vmatpush1.msra.mxu0 %v4253_v13  ;;  %1607 = vmatpush1.msra.mxu1 %v4258_v14  ;;  %v4672_v13 = vld [vmem:[%s6340_s3 + $0x60] sm:$0xff]  ;;  %v4677_v14 = vld [vmem:[%s6340_s3 + $0x70] sm:$0xff]  ;;  %v4737_v24 = vld [vmem:[%s6340_s3 + $0x18] sm:$0xff] }
  0x4a   : > { %1537 = vmatprep.subr.mxu0 %v4265_v15  ;;  %1608 = vmatprep.subr.mxu1 %v4270_v16  ;;  %v4684_v15 = vld [vmem:[%s6340_s3 + $0x48] sm:$0xff]  ;;  %v4689_v16 = vld [vmem:[%s6340_s3 + $0x58] sm:$0xff]  ;;  %6490 = vst [vmem:[#allocation14_spill] sm:$0xff] %v4737_v24 }
  0x4b   : > { %1538 = vmatpush1.msra.mxu0 %v4277_v17  ;;  %1571 = vmatprep.mubr.f32.mxu0 %v6345_v11  ;;  %v4696_v17 = vld [vmem:[%s6340_s3 + $0x40] sm:$0xff] }
  0x4c   : > { %1609 = vmatpush1.msra.mxu1 %v4284_v18  ;;  %3744 = vmatmul.mubr.msk.f32.vlgmr.msra.gmra.mxu0 %vm385_vm0, %v3735_v25  ;;  %v4701_v18 = vld [vmem:[%s6340_s3 + $0x50] sm:$0xff] }
  0x4d   : > { %1642 = vmatprep.mubr.f32.mxu1 %v6345_v11  ;;  %1723 = vmatprep.subr.mxu0 %v4370_v26  ;;  %6484 = vst [vmem:[#allocation8_spill] sm:$0xff] %v4701_v18  ;;  %v4751_v11 = vld [vmem:[%s6340_s3 + $0x10] sm:$0xff] }
  0x4e   : > { %1794 = vmatprep.subr.mxu1 %v4377_v27  ;;  %3745 = vmatmul.mubr.msk.f32.vlgmr.msra.gmra.mxu1 %vm385_vm0, %v3735_v25  ;;  %v4744_v25 = vld [vmem:[%s6340_s3] sm:$0xff]  ;;  %6492 = vst [vmem:[#allocation16_spill] sm:$0xff] %v4751_v11 }
  0x4f   : > { %1724 = vmatpush1.msra.mxu0 %v4384_v28  ;;  %1795 = vmatpush1.msra.mxu1 %v4389_v29  ;;  %6491 = vst [vmem:[#allocation15_spill] sm:$0xff] %v4744_v25 }
  0x50   : > { %1725 = vmatprep.subr.mxu0 %v4396_v30  ;;  %1796 = vmatprep.subr.mxu1 %v4401_v31 }
  0x51   : > { %1726 = vmatpush1.msra.mxu0 %v4408_v32  ;;  %1797 = vmatpush1.msra.mxu1 %v4413_v33 }
  0x52   : > { %1727 = vmatprep.subr.mxu0 %v4420_v34  ;;  %1798 = vmatprep.subr.mxu1 %v4425_v35 }
  0x53   : > { %1728 = vmatpush1.msra.mxu0 %v4432_v36  ;;  %1799 = vmatpush1.msra.mxu1 %v4437_v37 }
  0x54   : > { %1729 = vmatprep.subr.mxu0 %v4444_v38  ;;  %1800 = vmatprep.subr.mxu1 %v4449_v39 }
  0x55   : > { %1730 = vmatpush1.msra.mxu0 %v4456_v40  ;;  %1801 = vmatpush1.msra.mxu1 %v4461_v41 }
  0x56   : > { %1731 = vmatprep.subr.mxu0 %v4468_v42  ;;  %1802 = vmatprep.subr.mxu1 %v4473_v43 }
  0x57   : > { %1732 = vmatpush1.msra.mxu0 %v4480_v44  ;;  %1803 = vmatpush1.msra.mxu1 %v4485_v45 }
  0x58   : > { %1733 = vmatprep.subr.mxu0 %v4492_v46  ;;  %1804 = vmatprep.subr.mxu1 %v4497_v47 }
  0x59   : > { %1734 = vmatpush1.msra.mxu0 %v4504_v48  ;;  %1805 = vmatpush1.msra.mxu1 %v4509_v49 }
  0x5a   : > { %1735 = vmatprep.subr.mxu0 %v4516_v50  ;;  %1806 = vmatprep.subr.mxu1 %v4521_v51 }
  0x5b   : > { %1736 = vmatpush1.msra.mxu0 %v4528_v52  ;;  %1807 = vmatpush1.msra.mxu1 %v4533_v53 }
  0x5c   : > { %1737 = vmatprep.subr.mxu0 %v4540_v54  ;;  %1808 = vmatprep.subr.mxu1 %v4545_v55 }
  0x5d   : > { %1738 = vmatpush1.msra.mxu0 %v4552_v56  ;;  %1809 = vmatpush1.msra.mxu1 %v4557_v57 }
  0x5e   : > { %1739 = vmatprep.subr.mxu0 %v4564_v58  ;;  %1810 = vmatprep.subr.mxu1 %v4569_v59 }
  0x5f   : > { %1740 = vmatpush1.msra.mxu0 %v4576_v60  ;;  %1811 = vmatpush1.msra.mxu1 %v4581_v61 }
  0x60   : > { %1741 = vmatprep.subr.mxu0 %v4588_v62  ;;  %1812 = vmatprep.subr.mxu1 %v4593_v63 }
  0x61   : > { %1742 = vmatpush1.msra.mxu0 %v4600_v0  ;;  %1813 = vmatpush1.msra.mxu1 %v4605_v1 }
  0x62   : > { %1743 = vmatprep.subr.mxu0 %v4612_v2  ;;  %1814 = vmatprep.subr.mxu1 %v4617_v3 }
  0x63   : > { %1744 = vmatpush1.msra.mxu0 %v4624_v4  ;;  %1815 = vmatpush1.msra.mxu1 %v4629_v5 }
  0x64   : > { %1745 = vmatprep.subr.mxu0 %v4636_v6  ;;  %1816 = vmatprep.subr.mxu1 %v4641_v7 }
  0x65   : > { %1746 = vmatpush1.msra.mxu0 %v4648_v8  ;;  %1817 = vmatpush1.msra.mxu1 %v4653_v9 }
  0x66   : > { %1747 = vmatprep.subr.mxu0 %v4660_v10  ;;  %1818 = vmatprep.subr.mxu1 %v4665_v12 }
  0x67   : > { %1748 = vmatpush1.msra.mxu0 %v4672_v13  ;;  %1819 = vmatpush1.msra.mxu1 %v4677_v14 }
  0x68   : > { %1749 = vmatprep.subr.mxu0 %v4684_v15  ;;  %1820 = vmatprep.subr.mxu1 %v4689_v16 }
  0x69   : > { %1750 = vmatpush1.msra.mxu0 %v4696_v17  ;;  %1821 = vmatpush1.msra.mxu1 %v4701_v18  ;;  %v4794_v18 = vld [vmem:[%s6340_s3 + $0x3c0] sm:$0xff] }
  0x6a   : > { %1751 = vmatprep.subr.mxu0 %v4708_v19  ;;  %1822 = vmatprep.subr.mxu1 %v4713_v20  ;;  %v1658_v19 = vld [vmem:[#allocation4] sm:$0xff]  ;;  %v6493_v20 = vmov 0.0   ;;  %6500 = vst [vmem:[#allocation23_spill] sm:$0xff] %v4794_v18 }
  0x6b   : > { %1752 = vmatpush1.msra.mxu0 %v4720_v21  ;;  %1823 = vmatpush1.msra.mxu1 %v4725_v22  ;;  %v4760_v21 = vld [vmem:[%s6340_s3 + $0x3e8] sm:$0xff]  ;;  %v4765_v22 = vld [vmem:[%s6340_s3 + $0x3f8] sm:$0xff] }
  0x6c   : > { %1753 = vmatprep.subr.mxu0 %v4732_v23  ;;  %1824 = vmatprep.subr.mxu1 %v4737_v24  ;;  %6494 = vst [vmem:[#allocation17_spill] sm:$0xff] %v4760_v21  ;;  %6495 = vst [vmem:[#allocation18_spill] sm:$0xff] %v4765_v22  ;;  %v4777_v24 = vld [vmem:[%s6340_s3 + $0x3f0] sm:$0xff]  ;;  %v4782_v23 = vld [vmem:[%s6340_s3 + $0x3c8] sm:$0xff] }
  0x6d   : > { %1754 = vmatpush1.msra.mxu0 %v4744_v25  ;;  %1787 = vmatprep.mubr.f32.mxu0 %v6493_v20  ;;  %v4772_v25 = vld [vmem:[%s6340_s3 + $0x3e0] sm:$0xff]  ;;  %6497 = vst [vmem:[#allocation20_spill] sm:$0xff] %v4777_v24  ;;  %6498 = vst [vmem:[#allocation21_spill] sm:$0xff] %v4782_v23 }
  0x6e   : > { %1825 = vmatpush1.msra.mxu1 %v4751_v11  ;;  %1858 = vmatprep.mubr.f32.mxu1 %v6493_v20  ;;  %6496 = vst [vmem:[#allocation19_spill] sm:$0xff] %v4772_v25  ;;  %v4787_v11 = vld [vmem:[%s6340_s3 + $0x3d8] sm:$0xff] }
  0x6f   : > { %1788 = vmatmul.mubr.f32.vlgmr.msra.gmra.mxu0 %v1658_v19  ;;  %1859 = vmatmul.mubr.f32.vlgmr.msra.gmra.mxu1 %v1658_v19  ;;  %6499 = vst [vmem:[#allocation22_spill] sm:$0xff] %v4787_v11  ;;  %v4799_v19 = vld [vmem:[%s6340_s3 + $0x3d0] sm:$0xff] }
  0x70   : > { %1939 = vmatprep.subr.mxu0 %v4760_v21  ;;  %2010 = vmatprep.subr.mxu1 %v4765_v22  ;;  %6501 = vst [vmem:[#allocation24_spill] sm:$0xff] %v4799_v19  ;;  %v4806_v21 = vld [vmem:[%s6340_s3 + $0x3a8] sm:$0xff]  ;;  %v4811_v22 = vld [vmem:[%s6340_s3 + $0x3b8] sm:$0xff] }
  0x71   : > { %1940 = vmatpush1.msra.mxu0 %v4772_v25  ;;  %2011 = vmatpush1.msra.mxu1 %v4777_v24  ;;  %6502 = vst [vmem:[#allocation25_spill] sm:$0xff] %v4806_v21  ;;  %6503 = vst [vmem:[#allocation26_spill] sm:$0xff] %v4811_v22  ;;  %v4818_v25 = vld [vmem:[%s6340_s3 + $0x3a0] sm:$0xff]  ;;  %v4823_v24 = vld [vmem:[%s6340_s3 + $0x3b0] sm:$0xff] }
  0x72   : > { %1941 = vmatprep.subr.mxu0 %v4782_v23  ;;  %2012 = vmatprep.subr.mxu1 %v4787_v11  ;;  %6504 = vst [vmem:[#allocation27_spill] sm:$0xff] %v4818_v25  ;;  %6505 = vst [vmem:[#allocation28_spill] sm:$0xff] %v4823_v24  ;;  %v4830_v23 = vld [vmem:[%s6340_s3 + $0x388] sm:$0xff]  ;;  %v4835_v11 = vld [vmem:[%s6340_s3 + $0x398] sm:$0xff] }
  0x73   : > { %1942 = vmatpush1.msra.mxu0 %v4794_v18  ;;  %2013 = vmatpush1.msra.mxu1 %v4799_v19  ;;  %6506 = vst [vmem:[#allocation29_spill] sm:$0xff] %v4830_v23  ;;  %6507 = vst [vmem:[#allocation30_spill] sm:$0xff] %v4835_v11  ;;  %v4842_v18 = vld [vmem:[%s6340_s3 + $0x380] sm:$0xff]  ;;  %v4847_v19 = vld [vmem:[%s6340_s3 + $0x390] sm:$0xff] }
  0x74   : > { %1943 = vmatprep.subr.mxu0 %v4806_v21  ;;  %2014 = vmatprep.subr.mxu1 %v4811_v22  ;;  %6508 = vst [vmem:[#allocation31_spill] sm:$0xff] %v4842_v18  ;;  %6509 = vst [vmem:[#allocation32_spill] sm:$0xff] %v4847_v19  ;;  %v4854_v21 = vld [vmem:[%s6340_s3 + $0x368] sm:$0xff]  ;;  %v4859_v22 = vld [vmem:[%s6340_s3 + $0x378] sm:$0xff] }
  0x75   : > { %1944 = vmatpush1.msra.mxu0 %v4818_v25  ;;  %2015 = vmatpush1.msra.mxu1 %v4823_v24  ;;  %6510 = vst [vmem:[#allocation33_spill] sm:$0xff] %v4854_v21  ;;  %6511 = vst [vmem:[#allocation34_spill] sm:$0xff] %v4859_v22  ;;  %v4866_v25 = vld [vmem:[%s6340_s3 + $0x360] sm:$0xff]  ;;  %v4871_v24 = vld [vmem:[%s6340_s3 + $0x370] sm:$0xff] }
  0x76   : > { %1945 = vmatprep.subr.mxu0 %v4830_v23  ;;  %2016 = vmatprep.subr.mxu1 %v4835_v11  ;;  %6512 = vst [vmem:[#allocation35_spill] sm:$0xff] %v4866_v25  ;;  %6513 = vst [vmem:[#allocation36_spill] sm:$0xff] %v4871_v24  ;;  %v4878_v23 = vld [vmem:[%s6340_s3 + $0x348] sm:$0xff]  ;;  %v4883_v11 = vld [vmem:[%s6340_s3 + $0x358] sm:$0xff] }
  0x77   : > { %1946 = vmatpush1.msra.mxu0 %v4842_v18  ;;  %2017 = vmatpush1.msra.mxu1 %v4847_v19  ;;  %6514 = vst [vmem:[#allocation37_spill] sm:$0xff] %v4878_v23  ;;  %6515 = vst [vmem:[#allocation38_spill] sm:$0xff] %v4883_v11  ;;  %v4890_v18 = vld [vmem:[%s6340_s3 + $0x340] sm:$0xff]  ;;  %v4895_v19 = vld [vmem:[%s6340_s3 + $0x350] sm:$0xff] }
  0x78   : > { %1947 = vmatprep.subr.mxu0 %v4854_v21  ;;  %2018 = vmatprep.subr.mxu1 %v4859_v22  ;;  %6516 = vst [vmem:[#allocation39_spill] sm:$0xff] %v4890_v18  ;;  %6517 = vst [vmem:[#allocation40_spill] sm:$0xff] %v4895_v19  ;;  %v4902_v21 = vld [vmem:[%s6340_s3 + $0x328] sm:$0xff]  ;;  %v4907_v22 = vld [vmem:[%s6340_s3 + $0x338] sm:$0xff] }
  0x79   : > { %1948 = vmatpush1.msra.mxu0 %v4866_v25  ;;  %2019 = vmatpush1.msra.mxu1 %v4871_v24  ;;  %6518 = vst [vmem:[#allocation41_spill] sm:$0xff] %v4902_v21  ;;  %6519 = vst [vmem:[#allocation42_spill] sm:$0xff] %v4907_v22  ;;  %v4914_v25 = vld [vmem:[%s6340_s3 + $0x320] sm:$0xff]  ;;  %v4919_v24 = vld [vmem:[%s6340_s3 + $0x330] sm:$0xff] }
  0x7a   : > { %1949 = vmatprep.subr.mxu0 %v4878_v23  ;;  %2020 = vmatprep.subr.mxu1 %v4883_v11  ;;  %6520 = vst [vmem:[#allocation43_spill] sm:$0xff] %v4914_v25  ;;  %6521 = vst [vmem:[#allocation44_spill] sm:$0xff] %v4919_v24  ;;  %v4926_v23 = vld [vmem:[%s6340_s3 + $0x308] sm:$0xff]  ;;  %v4931_v11 = vld [vmem:[%s6340_s3 + $0x318] sm:$0xff] }
  0x7b   : > { %1950 = vmatpush1.msra.mxu0 %v4890_v18  ;;  %2021 = vmatpush1.msra.mxu1 %v4895_v19  ;;  %6522 = vst [vmem:[#allocation45_spill] sm:$0xff] %v4926_v23  ;;  %6523 = vst [vmem:[#allocation46_spill] sm:$0xff] %v4931_v11  ;;  %v4938_v18 = vld [vmem:[%s6340_s3 + $0x300] sm:$0xff]  ;;  %v4943_v19 = vld [vmem:[%s6340_s3 + $0x310] sm:$0xff] }
  0x7c   : > { %1951 = vmatprep.subr.mxu0 %v4902_v21  ;;  %2022 = vmatprep.subr.mxu1 %v4907_v22  ;;  %6524 = vst [vmem:[#allocation47_spill] sm:$0xff] %v4938_v18  ;;  %6525 = vst [vmem:[#allocation48_spill] sm:$0xff] %v4943_v19  ;;  %v4950_v21 = vld [vmem:[%s6340_s3 + $0x2e8] sm:$0xff]  ;;  %v4955_v22 = vld [vmem:[%s6340_s3 + $0x2f8] sm:$0xff] }
  0x7d   : > { %1952 = vmatpush1.msra.mxu0 %v4914_v25  ;;  %2023 = vmatpush1.msra.mxu1 %v4919_v24  ;;  %6526 = vst [vmem:[#allocation49_spill] sm:$0xff] %v4950_v21  ;;  %6527 = vst [vmem:[#allocation50_spill] sm:$0xff] %v4955_v22  ;;  %v4962_v25 = vld [vmem:[%s6340_s3 + $0x2e0] sm:$0xff]  ;;  %v4967_v24 = vld [vmem:[%s6340_s3 + $0x2f0] sm:$0xff] }
  0x7e   : > { %1953 = vmatprep.subr.mxu0 %v4926_v23  ;;  %2024 = vmatprep.subr.mxu1 %v4931_v11  ;;  %6528 = vst [vmem:[#allocation51_spill] sm:$0xff] %v4962_v25  ;;  %6529 = vst [vmem:[#allocation52_spill] sm:$0xff] %v4967_v24  ;;  %v4974_v23 = vld [vmem:[%s6340_s3 + $0x2c8] sm:$0xff]  ;;  %v4979_v11 = vld [vmem:[%s6340_s3 + $0x2d8] sm:$0xff] }
  0x7f   : > { %1954 = vmatpush1.msra.mxu0 %v4938_v18  ;;  %2025 = vmatpush1.msra.mxu1 %v4943_v19  ;;  %6530 = vst [vmem:[#allocation53_spill] sm:$0xff] %v4974_v23  ;;  %6531 = vst [vmem:[#allocation54_spill] sm:$0xff] %v4979_v11  ;;  %v4986_v18 = vld [vmem:[%s6340_s3 + $0x2c0] sm:$0xff]  ;;  %v4991_v19 = vld [vmem:[%s6340_s3 + $0x2d0] sm:$0xff] }
  0x80   : > { %1955 = vmatprep.subr.mxu0 %v4950_v21  ;;  %2026 = vmatprep.subr.mxu1 %v4955_v22  ;;  %6532 = vst [vmem:[#allocation55_spill] sm:$0xff] %v4986_v18  ;;  %6533 = vst [vmem:[#allocation56_spill] sm:$0xff] %v4991_v19  ;;  %v4998_v21 = vld [vmem:[%s6340_s3 + $0x2a8] sm:$0xff]  ;;  %v5003_v22 = vld [vmem:[%s6340_s3 + $0x2b8] sm:$0xff] }
  0x81   : > { %1956 = vmatpush1.msra.mxu0 %v4962_v25  ;;  %2027 = vmatpush1.msra.mxu1 %v4967_v24  ;;  %6534 = vst [vmem:[#allocation57_spill] sm:$0xff] %v4998_v21  ;;  %6535 = vst [vmem:[#allocation58_spill] sm:$0xff] %v5003_v22  ;;  %v5010_v25 = vld [vmem:[%s6340_s3 + $0x2a0] sm:$0xff]  ;;  %v5015_v24 = vld [vmem:[%s6340_s3 + $0x2b0] sm:$0xff] }
  0x82   : > { %1957 = vmatprep.subr.mxu0 %v4974_v23  ;;  %2028 = vmatprep.subr.mxu1 %v4979_v11  ;;  %6536 = vst [vmem:[#allocation59_spill] sm:$0xff] %v5010_v25  ;;  %6537 = vst [vmem:[#allocation60_spill] sm:$0xff] %v5015_v24  ;;  %v5022_v23 = vld [vmem:[%s6340_s3 + $0x288] sm:$0xff]  ;;  %v5027_v11 = vld [vmem:[%s6340_s3 + $0x298] sm:$0xff] }
  0x83   : > { %1958 = vmatpush1.msra.mxu0 %v4986_v18  ;;  %2029 = vmatpush1.msra.mxu1 %v4991_v19  ;;  %6538 = vst [vmem:[#allocation61_spill] sm:$0xff] %v5022_v23  ;;  %6539 = vst [vmem:[#allocation62_spill] sm:$0xff] %v5027_v11  ;;  %v5034_v18 = vld [vmem:[%s6340_s3 + $0x280] sm:$0xff]  ;;  %v5039_v19 = vld [vmem:[%s6340_s3 + $0x290] sm:$0xff] }
  0x84   : > { %1959 = vmatprep.subr.mxu0 %v4998_v21  ;;  %2030 = vmatprep.subr.mxu1 %v5003_v22  ;;  %6540 = vst [vmem:[#allocation63_spill] sm:$0xff] %v5034_v18  ;;  %6541 = vst [vmem:[#allocation64_spill] sm:$0xff] %v5039_v19  ;;  %v5046_v21 = vld [vmem:[%s6340_s3 + $0x268] sm:$0xff]  ;;  %v5051_v22 = vld [vmem:[%s6340_s3 + $0x278] sm:$0xff] }
  0x85   : > { %1960 = vmatpush1.msra.mxu0 %v5010_v25  ;;  %2031 = vmatpush1.msra.mxu1 %v5015_v24  ;;  %6542 = vst [vmem:[#allocation65_spill] sm:$0xff] %v5046_v21  ;;  %6543 = vst [vmem:[#allocation66_spill] sm:$0xff] %v5051_v22  ;;  %v5058_v25 = vld [vmem:[%s6340_s3 + $0x260] sm:$0xff]  ;;  %v5063_v24 = vld [vmem:[%s6340_s3 + $0x270] sm:$0xff] }
  0x86   : > { %1961 = vmatprep.subr.mxu0 %v5022_v23  ;;  %2032 = vmatprep.subr.mxu1 %v5027_v11  ;;  %6544 = vst [vmem:[#allocation67_spill] sm:$0xff] %v5058_v25  ;;  %6545 = vst [vmem:[#allocation68_spill] sm:$0xff] %v5063_v24  ;;  %v5070_v23 = vld [vmem:[%s6340_s3 + $0x248] sm:$0xff]  ;;  %v5075_v11 = vld [vmem:[%s6340_s3 + $0x258] sm:$0xff] }
  0x87   : > { %1962 = vmatpush1.msra.mxu0 %v5034_v18  ;;  %2033 = vmatpush1.msra.mxu1 %v5039_v19  ;;  %6546 = vst [vmem:[#allocation69_spill] sm:$0xff] %v5070_v23  ;;  %6547 = vst [vmem:[#allocation70_spill] sm:$0xff] %v5075_v11  ;;  %v5082_v18 = vld [vmem:[%s6340_s3 + $0x240] sm:$0xff]  ;;  %v5087_v19 = vld [vmem:[%s6340_s3 + $0x250] sm:$0xff] }
  0x88   : > { %1963 = vmatprep.subr.mxu0 %v5046_v21  ;;  %2034 = vmatprep.subr.mxu1 %v5051_v22  ;;  %6548 = vst [vmem:[#allocation71_spill] sm:$0xff] %v5082_v18  ;;  %6549 = vst [vmem:[#allocation72_spill] sm:$0xff] %v5087_v19  ;;  %v5094_v21 = vld [vmem:[%s6340_s3 + $0x228] sm:$0xff]  ;;  %v5099_v22 = vld [vmem:[%s6340_s3 + $0x238] sm:$0xff] }
  0x89   : > { %1964 = vmatpush1.msra.mxu0 %v5058_v25  ;;  %2035 = vmatpush1.msra.mxu1 %v5063_v24  ;;  %6550 = vst [vmem:[#allocation73_spill] sm:$0xff] %v5094_v21  ;;  %v5106_v25 = vld [vmem:[%s6340_s3 + $0x220] sm:$0xff]  ;;  %v5111_v24 = vld [vmem:[%s6340_s3 + $0x230] sm:$0xff] }
  0x8a   : > { %1965 = vmatprep.subr.mxu0 %v5070_v23  ;;  %2036 = vmatprep.subr.mxu1 %v5075_v11  ;;  %v5118_v23 = vld [vmem:[%s6340_s3 + $0x208] sm:$0xff]  ;;  %v5123_v11 = vld [vmem:[%s6340_s3 + $0x218] sm:$0xff] }
  0x8b   : > { %1966 = vmatpush1.msra.mxu0 %v5082_v18  ;;  %2037 = vmatpush1.msra.mxu1 %v5087_v19  ;;  %v5130_v18 = vld [vmem:[%s6340_s3 + $0x200] sm:$0xff]  ;;  %v5137_v19 = vld [vmem:[%s6340_s3 + $0x210] sm:$0xff] }
  0x8c   : > { %1967 = vmatprep.subr.mxu0 %v5094_v21  ;;  %2038 = vmatprep.subr.mxu1 %v5099_v22  ;;  %v1873_v21 = vld [vmem:[#allocation6] sm:$0xff] }
  0x8d   : > { %1968 = vmatpush1.msra.mxu0 %v5106_v25  ;;  %2039 = vmatpush1.msra.mxu1 %v5111_v24 }
  0x8e   : > { %1969 = vmatprep.subr.mxu0 %v5118_v23  ;;  %2040 = vmatprep.subr.mxu1 %v5123_v11 }
  0x8f   : > { %1970 = vmatpush1.msra.mxu0 %v5130_v18  ;;  %2003 = vmatprep.mubr.f32.mxu0 %v6493_v20 }
  0x90   : > { %2041 = vmatpush1.msra.mxu1 %v5137_v19  ;;  %2074 = vmatprep.mubr.f32.mxu1 %v6493_v20 }
  0x91   : > { %2004 = vmatmul.mubr.f32.vlgmr.msra.gmra.mxu0 %v1873_v21  ;;  %2075 = vmatmul.mubr.f32.vlgmr.msra.gmra.mxu1 %v1873_v21 }
  0x92   : > { %2199 = vmatprep.subr.mxu0 %v4370_v26  ;;  %2270 = vmatprep.subr.mxu1 %v4377_v27  ;;  %v6551_v26 = vld [vmem:[#allocation8_spill] sm:$0xff]  ;;  %v6552_v27 = vld [vmem:[#allocation9_spill] sm:$0xff] }
  0x93   : > { %2200 = vmatpush1.msra.mxu0 %v4384_v28  ;;  %2271 = vmatpush1.msra.mxu1 %v4389_v29  ;;  %v6553_v28 = vld [vmem:[#allocation10_spill] sm:$0xff]  ;;  %v6554_v29 = vld [vmem:[#allocation11_spill] sm:$0xff] }
  0x94   : > { %2201 = vmatprep.subr.mxu0 %v4396_v30  ;;  %2272 = vmatprep.subr.mxu1 %v4401_v31  ;;  %v6555_v30 = vld [vmem:[#allocation12_spill] sm:$0xff]  ;;  %v6556_v31 = vld [vmem:[#allocation13_spill] sm:$0xff] }
  0x95   : > { %2202 = vmatpush1.msra.mxu0 %v4408_v32  ;;  %2273 = vmatpush1.msra.mxu1 %v4413_v33  ;;  %v6557_v32 = vld [vmem:[#allocation14_spill] sm:$0xff]  ;;  %v6558_v33 = vld [vmem:[#allocation15_spill] sm:$0xff] }
  0x96   : > { %2203 = vmatprep.subr.mxu0 %v4420_v34  ;;  %2274 = vmatprep.subr.mxu1 %v4425_v35  ;;  %v6559_v34 = vld [vmem:[#allocation16_spill] sm:$0xff]  ;;  %v6560_v35 = vld [vmem:[#allocation17_spill] sm:$0xff] }
  0x97   : > { %2204 = vmatpush1.msra.mxu0 %v4432_v36  ;;  %2275 = vmatpush1.msra.mxu1 %v4437_v37  ;;  %v6561_v36 = vld [vmem:[#allocation18_spill] sm:$0xff]  ;;  %v333_v37 = vlaneseq }
  0x98   : > { %2205 = vmatprep.subr.mxu0 %v4444_v38  ;;  %2276 = vmatprep.subr.mxu1 %v4449_v39 }
  0x99   : > { %2206 = vmatpush1.msra.mxu0 %v4456_v40  ;;  %2277 = vmatpush1.msra.mxu1 %v4461_v41  ;;  %v334_v38 = vshrl.u32 %v333_v37, 7  ;;  %v3691_v40 = vld [vmem:[%s6341_s4 + $0x4] sm:$0xf] }
  0x9a   : > { %2207 = vmatprep.subr.mxu0 %v4468_v42  ;;  %2278 = vmatprep.subr.mxu1 %v4473_v43 }
  0x9b   : > { %2208 = vmatpush1.msra.mxu0 %v4480_v44  ;;  %2279 = vmatpush1.msra.mxu1 %v4485_v45  ;;  %v335_v41 = vsub.s32 0, %v334_v38  ;;  %v339_v44 = vsub.s32 1, %v334_v38 }
  0x9c   : > { %2209 = vmatprep.subr.mxu0 %v4492_v46  ;;  %2280 = vmatprep.subr.mxu1 %v4497_v47  ;;  %v343_v46 = vsub.s32 2, %v334_v38 }
  0x9d   : > { %2210 = vmatpush1.msra.mxu0 %v4504_v48  ;;  %2281 = vmatpush1.msra.mxu1 %v4509_v49  ;;  %v5222_v45 = vrot.slane %v3691_v40, %v335_v41  ;;  %v5226_v48 = vrot.slane %v3691_v40, %v339_v44  ;;  %v347_v49 = vsub.s32 3, %v334_v38 }
  0x9e   : > { %2211 = vmatprep.subr.mxu0 %v4516_v50  ;;  %2282 = vmatprep.subr.mxu1 %v4521_v51  ;;  %v5228_v50 = vrot.slane %v3691_v40, %v343_v46 }
  0x9f   : > { %2212 = vmatpush1.msra.mxu0 %v4528_v52  ;;  %2283 = vmatpush1.msra.mxu1 %v4533_v53  ;;  %v5233_v53 = vrot.slane %v3691_v40, %v347_v49 }
  0xa0   : > { %2213 = vmatprep.subr.mxu0 %v4540_v54  ;;  %2284 = vmatprep.subr.mxu1 %v4545_v55  ;;  %v331_v54 = vld [vmem:[%s6341_s4] sm:$0xf] }
  0xa1   : > { %2214 = vmatpush1.msra.mxu0 %v4552_v56  ;;  %2285 = vmatpush1.msra.mxu1 %v4557_v57 }
  0xa2   : > { %2215 = vmatprep.subr.mxu0 %v4564_v58  ;;  %2286 = vmatprep.subr.mxu1 %v4569_v59 }
  0xa3   : > { %2216 = vmatpush1.msra.mxu0 %v4576_v60  ;;  %2287 = vmatpush1.msra.mxu1 %v4581_v61  ;;  %v336_v60 = vrot.slane %v331_v54, %v335_v41 }
  0xa4   : > { %2217 = vmatprep.subr.mxu0 %v4588_v62  ;;  %2288 = vmatprep.subr.mxu1 %v4593_v63  ;;  %v340_v63 = vrot.slane %v331_v54, %v339_v44 }
  0xa5   : > { %2218 = vmatpush1.msra.mxu0 %v4600_v0  ;;  %2289 = vmatpush1.msra.mxu1 %v4605_v1  ;;  %v344_v0 = vrot.slane %v331_v54, %v343_v46 }
  0xa6   : > { %2219 = vmatprep.subr.mxu0 %v4612_v2  ;;  %2290 = vmatprep.subr.mxu1 %v4617_v3 }
  0xa7   : > { %2220 = vmatpush1.msra.mxu0 %v4624_v4  ;;  %2291 = vmatpush1.msra.mxu1 %v4629_v5  ;;  %v348_v4 = vrot.slane %v331_v54, %v347_v49 }
  0xa8   : > { %2221 = vmatprep.subr.mxu0 %v4636_v6  ;;  %2292 = vmatprep.subr.mxu1 %v4641_v7 }
  0xa9   : > { %2222 = vmatpush1.msra.mxu0 %v4648_v8  ;;  %2293 = vmatpush1.msra.mxu1 %v4653_v9 }
  0xaa   : > { %2223 = vmatprep.subr.mxu0 %v4660_v10  ;;  %2294 = vmatprep.subr.mxu1 %v4665_v12 }
  0xab   : > { %2224 = vmatpush1.msra.mxu0 %v4672_v13  ;;  %2295 = vmatpush1.msra.mxu1 %v4677_v14 }
  0xac   : > { %2225 = vmatprep.subr.mxu0 %v4684_v15  ;;  %2296 = vmatprep.subr.mxu1 %v4689_v16 }
  0xad   : > { %2226 = vmatpush1.msra.mxu0 %v4696_v17  ;;  %2297 = vmatpush1.msra.mxu1 %v6551_v26 }
  0xae   : > { %2227 = vmatprep.subr.mxu0 %v6552_v27  ;;  %2298 = vmatprep.subr.mxu1 %v6553_v28 }
  0xaf   : > { %2228 = vmatpush1.msra.mxu0 %v6554_v29  ;;  %2299 = vmatpush1.msra.mxu1 %v6555_v30 }
  0xb0   : > { %2229 = vmatprep.subr.mxu0 %v6556_v31  ;;  %2300 = vmatprep.subr.mxu1 %v6557_v32 }
  0xb1   : > { %2230 = vmatpush1.msra.mxu0 %v6558_v33  ;;  %2263 = vmatprep.mubr.f32.mxu0 %v6493_v20 }
  0xb2   : > { %2301 = vmatpush1.msra.mxu1 %v6559_v34  ;;  %2334 = vmatprep.mubr.f32.mxu1 %v6493_v20 }
  0xb3   : > { %2414 = vmatprep.subr.mxu0 %v6560_v35  ;;  %2485 = vmatprep.subr.mxu1 %v6561_v36 }
  0xe2   : > { %v5213_v39 = vpop.f32.mrf.mxu0 }
  0xe4   : > { %v5218_v42 = vpop.f32.mrf.mxu0  ;;  %v5220_v43 = vpop.f32.mrf.mxu1 }
  0xe6   : > { %v5224_v47 = vpop.f32.mrf.mxu1 }
  0xe8   : > { %v614_v51 = vpop.f32.mrf.mxu0 }
  0xe9   : > { %v5231_v52 = vadd.f32 %v614_v51, %v5222_v45 }
  0xea   : > { %v616_v55 = vpop.f32.mrf.mxu0  ;;  %v685_v56 = vpop.f32.mrf.mxu1 }
  0xeb   : > { %6562 = vst [vmem:[#allocation8_spill] sm:$0xff] %v5231_v52  ;;  %v5239_v57 = vadd.f32 %v616_v55, %v5226_v48  ;;  %v5242_v58 = vadd.f32 %v685_v56, %v5228_v50  ;;  %v5620_v52 = vld [vmem:[%s6340_s3 + $0xa8] sm:$0xff] }
  0xec   : > { %v687_v59 = vpop.f32.mrf.mxu1 }
  0xed   : > { %6563 = vst [vmem:[#allocation9_spill] sm:$0xff] %v5239_v57  ;;  %6564 = vst [vmem:[#allocation10_spill] sm:$0xff] %v5242_v58  ;;  %v5245_v61 = vadd.f32 %v687_v59, %v5233_v53  ;;  %v5608_v58 = vld [vmem:[%s6340_s3 + $0xc0] sm:$0xff]  ;;  %v5613_v57 = vld [vmem:[%s6340_s3 + $0xd0] sm:$0xff] }
  0xee   : > { %v773_v62 = vpop.f32.mrf.mxu0 }
  0xef   : > { %6565 = vst [vmem:[#allocation11_spill] sm:$0xff] %v5245_v61  ;;  %v5247_v1 = vadd.f32 %v773_v62, %v336_v60  ;;  %v5601_v61 = vld [vmem:[%s6340_s3 + $0xd8] sm:$0xff] }
  0xf0   : > { %v775_v2 = vpop.f32.mrf.mxu0  ;;  %v844_v3 = vpop.f32.mrf.mxu1 }
  0xf1   : > { %v5249_v5 = vadd.f32 %v775_v2, %v340_v63  ;;  %v5251_v6 = vadd.f32 %v844_v3, %v344_v0 }
  0xf2   : > { %v846_v7 = vpop.f32.mrf.mxu1 }
  0xf3   : > { %v5253_v8 = vadd.f32 %v846_v7, %v348_v4  ;;  %v456_v7 = vadd.f32 %v5213_v39, %v336_v60 }
  0xf4   : > { %v933_v9 = vpop.f32.mrf.mxu0 }
  0xf5   : > { %v5256_v10 = vadd.f32 %v933_v9, %v5222_v45 }
  0xf6   : > { %v935_v12 = vpop.f32.mrf.mxu0  ;;  %v1004_v13 = vpop.f32.mrf.mxu1 }
  0xf7   : > { %6566 = vst [vmem:[#allocation12_spill] sm:$0xff] %v5256_v10  ;;  %v5259_v14 = vadd.f32 %v935_v12, %v5226_v48  ;;  %v5262_v15 = vadd.f32 %v1004_v13, %v5228_v50  ;;  %v458_v12 = vadd.f32 %v5218_v42, %v340_v63  ;;  %v5668_v10 = vld [vmem:[%s6340_s3 + $0x68] sm:$0xff] }
  0xf8   : > { %v1006_v16 = vpop.f32.mrf.mxu1 }
  0xf9   : > { %6567 = vst [vmem:[#allocation13_spill] sm:$0xff] %v5259_v14  ;;  %6568 = vst [vmem:[#allocation14_spill] sm:$0xff] %v5262_v15  ;;  %v5265_v17 = vadd.f32 %v1006_v16, %v5233_v53  ;;  %v5656_v15 = vld [vmem:[%s6340_s3 + $0x80] sm:$0xff]  ;;  %v5661_v14 = vld [vmem:[%s6340_s3 + $0x90] sm:$0xff] }
  0xfa   : > { %v1093_v21 = vpop.f32.mrf.mxu0 }
  0xfb   : > { %6569 = vst [vmem:[#allocation15_spill] sm:$0xff] %v5265_v17  ;;  %v5267_v26 = vadd.f32 %v1093_v21, %v336_v60  ;;  %v5649_v17 = vld [vmem:[%s6340_s3 + $0x98] sm:$0xff] }
  0xfc   : > { %v1095_v27 = vpop.f32.mrf.mxu0  ;;  %v1164_v28 = vpop.f32.mrf.mxu1 }
  0xfd   : > { %6570 = vst [vmem:[#allocation16_spill] sm:$0xff] %v5267_v26  ;;  %v5269_v29 = vadd.f32 %v1095_v27, %v340_v63  ;;  %v5271_v30 = vadd.f32 %v1164_v28, %v344_v0  ;;  %v5692_v26 = vld [vmem:[%s6340_s3 + $0x48] sm:$0xff] }
  0xfe   : > { %v1166_v31 = vpop.f32.mrf.mxu1 }
  0xff   : > { %6571 = vst [vmem:[#allocation17_spill] sm:$0xff] %v5269_v29  ;;  %6572 = vst [vmem:[#allocation18_spill] sm:$0xff] %v5271_v30  ;;  %v5273_v32 = vadd.f32 %v1166_v31, %v348_v4  ;;  %v5680_v30 = vld [vmem:[%s6340_s3 + $0x60] sm:$0xff]  ;;  %v5685_v29 = vld [vmem:[%s6340_s3 + $0x70] sm:$0xff] }
 0x100   : > { %v1253_v33 = vpop.f32.mrf.mxu0 }
 0x101   : > { %6573 = vst [vmem:[#allocation74_spill] sm:$0xff] %v5273_v32  ;;  %v5276_v34 = vadd.f32 %v1253_v33, %v5222_v45  ;;  %v527_v33 = vadd.f32 %v5220_v43, %v344_v0  ;;  %v5673_v32 = vld [vmem:[%s6340_s3 + $0x78] sm:$0xff] }
 0x102   : > { %v1255_v35 = vpop.f32.mrf.mxu0  ;;  %v1324_v36 = vpop.f32.mrf.mxu1 }
 0x103   : > { %v5279_v37 = vadd.f32 %v1255_v35, %v5226_v48  ;;  %v5282_v38 = vadd.f32 %v1324_v36, %v5228_v50 }
 0x104   : > { %v1326_v40 = vpop.f32.mrf.mxu1 }
 0x105   : > { %v5285_v41 = vadd.f32 %v1326_v40, %v5233_v53 }
 0x106   : > { %v1413_v44 = vpop.f32.mrf.mxu0 }
 0x107   : > { %v5287_v46 = vadd.f32 %v1413_v44, %v336_v60  ;;  %v529_v44 = vadd.f32 %v5224_v47, %v348_v4 }
 0x108   : > { %v1415_v49 = vpop.f32.mrf.mxu0  ;;  %v1484_v51 = vpop.f32.mrf.mxu1 }
 0x109   : > { %6574 = vst [vmem:[#allocation75_spill] sm:$0xff] %v5287_v46  ;;  %v5289_v54 = vadd.f32 %v1415_v49, %v340_v63  ;;  %v5291_v55 = vadd.f32 %v1484_v51, %v344_v0  ;;  %v5644_v46 = vld [vmem:[%s6340_s3 + $0x88] sm:$0xff] }
 0x10a   : > { %v1486_v56 = vpop.f32.mrf.mxu1 }
 0x10b   : > { %6575 = vst [vmem:[#allocation76_spill] sm:$0xff] %v5289_v54  ;;  %6576 = vst [vmem:[#allocation77_spill] sm:$0xff] %v5291_v55  ;;  %v5293_v59 = vadd.f32 %v1486_v56, %v348_v4  ;;  %v5632_v55 = vld [vmem:[%s6340_s3 + $0xa0] sm:$0xff]  ;;  %v5637_v54 = vld [vmem:[%s6340_s3 + $0xb0] sm:$0xff] }
 0x10c   : > { %v1573_v62 = vpop.f32.mrf.mxu0 }
 0x10d   : > { %6577 = vst [vmem:[#allocation78_spill] sm:$0xff] %v5293_v59  ;;  %v1574_v47 = vadd.f32 %v1573_v62, %v5222_v45  ;;  %v5625_v59 = vld [vmem:[%s6340_s3 + $0xb8] sm:$0xff] }
 0x10e   : > { %v1575_v2 = vpop.f32.mrf.mxu0  ;;  %v1644_v3 = vpop.f32.mrf.mxu1 }
 0x110   : > { %v1646_v16 = vpop.f32.mrf.mxu1 }
 0x12f   : > { %v1789_v9 = vpop.f32.mrf.mxu0  ;;  %v1860_v31 = vpop.f32.mrf.mxu1 }
 0x130   : > { %v1865_v13 = vadd.f32 %v1789_v9, %v456_v7  ;;  %v1867_v36 = vadd.f32 %v1860_v31, %v527_v33  ;;  %v2085_v7 = vld [vmem:[#allocation5] sm:$0xff] }
 0x131   : > { %v1791_v21 = vpop.f32.mrf.mxu0  ;;  %v1862_v40 = vpop.f32.mrf.mxu1 }
 0x132   : > { %v2086_v27 = vmul.f32 0.5, %v1865_v13  ;;  %v1866_v28 = vadd.f32 %v1791_v21, %v458_v12  ;;  %v1868_v39 = vadd.f32 %v1862_v40, %v529_v44  ;;  %v1645_v44 = vadd.f32 %v1644_v3, %v5228_v50  ;;  %v6580_v50 = vld [vmem:[#allocation21_spill] sm:$0xff]  ;;  %v6581_v3 = vld [vmem:[#allocation22_spill] sm:$0xff] }
 0x133   : > { %6635 = vst [vmem:[#allocation21_spill] sm:$0xff] %v5613_v57  ;;  %6636 = vst [vmem:[#allocation22_spill] sm:$0xff] %v5620_v52 }
 0x134   : > { %4024 = vtanh.f32 %v2086_v27  ;;  %v2090_v35 = vmul.f32 0.5, %v1866_v28  ;;  %v2095_v60 = vmul.f32 0.5, %v1868_v39  ;;  %v1576_v27 = vadd.f32 %v1575_v2, %v5226_v48  ;;  %v6578_v48 = vld [vmem:[#allocation19_spill] sm:$0xff]  ;;  %v6579_v2 = vld [vmem:[#allocation20_spill] sm:$0xff] }
 0x135   : > { %6633 = vst [vmem:[#allocation19_spill] sm:$0xff] %v5601_v61  ;;  %6634 = vst [vmem:[#allocation20_spill] sm:$0xff] %v5608_v58 }
 0x136   : > { %4026 = vtanh.f32 %v2090_v35 }
 0x137   : > { %4028 = vtanh.f32 %v1867_v36 }
 0x138   : > { %4030 = vtanh.f32 %v2095_v60 }
 0x141   : > { %v4025_v49 = vpop.eup %4024 }
 0x142   : > { %v2088_v42 = vmul.f32 0.5, %v4025_v49 }
 0x143   : > { %v4027_v63 = vpop.eup %4026 }
 0x144   : > { %v2089_v51 = vadd.f32 0.5, %v2088_v42  ;;  %v2092_v56 = vmul.f32 0.5, %v4027_v63  ;;  %v4029_v12 = vpop.eup %4028  ;;  %v1647_v63 = vadd.f32 %v1646_v16, %v5233_v53  ;;  %v6585_v53 = vld [vmem:[#allocation26_spill] sm:$0xff]  ;;  %v6586_v16 = vld [vmem:[#allocation27_spill] sm:$0xff] }
 0x145   : > { %v4031_v4 = vpop.eup %4030  ;;  %6640 = vst [vmem:[#allocation26_spill] sm:$0xff] %v5644_v46  ;;  %6641 = vst [vmem:[#allocation27_spill] sm:$0xff] %v5649_v17 }
 0x146   : > { %v2093_v9 = vadd.f32 0.5, %v2092_v56  ;;  %v2100_v0 = vmul.f32 %v4029_v12, %v2089_v51  ;;  %v2097_v33 = vmul.f32 0.5, %v4031_v4  ;;  %v6582_v56 = vld [vmem:[#allocation23_spill] sm:$0xff]  ;;  %v6587_v12 = vld [vmem:[#allocation28_spill] sm:$0xff] }
 0x147   : > { %6637 = vst [vmem:[#allocation23_spill] sm:$0xff] %v5625_v59  ;;  %6642 = vst [vmem:[#allocation28_spill] sm:$0xff] %v5656_v15 }
 0x148   : > { %v2099_v43 = vmul.f32 %v2093_v9, %v2085_v7  ;;  %v2098_v60 = vadd.f32 0.5, %v2097_v33  ;;  %v6583_v7 = vld [vmem:[#allocation24_spill] sm:$0xff]  ;;  %v6584_v9 = vld [vmem:[#allocation25_spill] sm:$0xff]  ;;  %v6593_v33 = vld [vmem:[#allocation34_spill] sm:$0xff] }
 0x149   : > { %6638 = vst [vmem:[#allocation24_spill] sm:$0xff] %v5632_v55  ;;  %6639 = vst [vmem:[#allocation25_spill] sm:$0xff] %v5637_v54 }
 0x14a   : > { %v5299_v13 = vadd.f32 %v2100_v0, %v2099_v43  ;;  %v6588_v0 = vld [vmem:[#allocation29_spill] sm:$0xff]  ;;  %6648 = vst [vmem:[#allocation34_spill] sm:$0xff] %v5692_v26 }
 0x14b   : > { %6643 = vst [vmem:[#allocation29_spill] sm:$0xff] %v5661_v14 }
 0x14c   : > { %4032 = vtanh.f32 %v5299_v13 }
 0x151   : > { %v2005_v21 = vpop.f32.mrf.mxu0  ;;  %v2076_v40 = vpop.f32.mrf.mxu1 }
 0x152   : > { %v2081_v28 = vadd.f32 %v2005_v21, %v1574_v47  ;;  %v2083_v49 = vadd.f32 %v2076_v40, %v1645_v44  ;;  %v6589_v47 = vld [vmem:[#allocation30_spill] sm:$0xff]  ;;  %v6590_v21 = vld [vmem:[#allocation31_spill] sm:$0xff]  ;;  %v6595_v40 = vld [vmem:[#allocation36_spill] sm:$0xff] }
 0x153   : > { %v2007_v31 = vpop.f32.mrf.mxu0  ;;  %v2078_v62 = vpop.f32.mrf.mxu1  ;;  %6644 = vst [vmem:[#allocation30_spill] sm:$0xff] %v5668_v10  ;;  %6645 = vst [vmem:[#allocation31_spill] sm:$0xff] %v5673_v32 }
 0x154   : > { %v2105_v35 = vmul.f32 0.5, %v2081_v28  ;;  %v2082_v36 = vadd.f32 %v2007_v31, %v1576_v27  ;;  %v2084_v51 = vadd.f32 %v2078_v62, %v1647_v63  ;;  %v6591_v27 = vld [vmem:[#allocation32_spill] sm:$0xff]  ;;  %v6592_v31 = vld [vmem:[#allocation33_spill] sm:$0xff] }
 0x155   : > { %v6599_v62 = vld [vmem:[#allocation40_spill] sm:$0xff]  ;;  %6646 = vst [vmem:[#allocation32_spill] sm:$0xff] %v5680_v30  ;;  %6647 = vst [vmem:[#allocation33_spill] sm:$0xff] %v5685_v29 }
 0x156   : > { %4034 = vtanh.f32 %v2105_v35  ;;  %v2109_v39 = vmul.f32 0.5, %v2082_v36  ;;  %v2114_v43 = vmul.f32 0.5, %v2084_v51  ;;  %v6594_v36 = vld [vmem:[#allocation35_spill] sm:$0xff] }
 0x158   : > { %4036 = vtanh.f32 %v2109_v39 }
 0x159   : > { %v4033_v42 = vpop.eup %4032  ;;  %4038 = vtanh.f32 %v2083_v49  ;;  %v6597_v49 = vld [vmem:[#allocation38_spill] sm:$0xff] }
 0x15a   : > { %v2103_v45 = vmul.f32 %v4033_v42, %v2098_v60  ;;  %4040 = vtanh.f32 %v2114_v43  ;;  %v6596_v60 = vld [vmem:[#allocation37_spill] sm:$0xff]  ;;  %v2104_v42 = vld [vmem:[#allocation7] sm:$0xff] }
 0x15c   : > { %2127 = vst [vmem:[%s4181_s19] sm:$0xff] %v2103_v45  ;;  %2264 = vmatmul.mubr.f32.vlgmr.msra.gmra.mxu0 %v2103_v45  ;;  %2335 = vmatmul.mubr.f32.vlgmr.msra.gmra.mxu1 %v2103_v45  ;;  %v6598_v45 = vld [vmem:[#allocation39_spill] sm:$0xff] }
 0x15d   : > { %2415 = vmatpush1.msra.mxu0 %v6578_v48  ;;  %2486 = vmatpush1.msra.mxu1 %v6579_v2  ;;  %v6600_v48 = vld [vmem:[#allocation41_spill] sm:$0xff]  ;;  %v6601_v2 = vld [vmem:[#allocation42_spill] sm:$0xff] }
 0x15e   : > { %2416 = vmatprep.subr.mxu0 %v6580_v50  ;;  %2487 = vmatprep.subr.mxu1 %v6581_v3  ;;  %v6602_v50 = vld [vmem:[#allocation43_spill] sm:$0xff]  ;;  %v6603_v3 = vld [vmem:[#allocation44_spill] sm:$0xff] }
 0x15f   : > { %2417 = vmatpush1.msra.mxu0 %v6582_v56  ;;  %2488 = vmatpush1.msra.mxu1 %v6583_v7 }
 0x160   : > { %2418 = vmatprep.subr.mxu0 %v6584_v9  ;;  %2489 = vmatprep.subr.mxu1 %v6585_v53  ;;  %v6604_v9 = vld [vmem:[#allocation45_spill] sm:$0xff]  ;;  %v6605_v53 = vld [vmem:[#allocation46_spill] sm:$0xff] }
 0x161   : > { %2419 = vmatpush1.msra.mxu0 %v6586_v16  ;;  %2490 = vmatpush1.msra.mxu1 %v6587_v12  ;;  %v6606_v16 = vld [vmem:[#allocation47_spill] sm:$0xff]  ;;  %v6607_v12 = vld [vmem:[#allocation48_spill] sm:$0xff] }
 0x162   : > { %2420 = vmatprep.subr.mxu0 %v6588_v0  ;;  %2491 = vmatprep.subr.mxu1 %v6589_v47  ;;  %v6608_v0 = vld [vmem:[#allocation49_spill] sm:$0xff]  ;;  %v6609_v47 = vld [vmem:[#allocation50_spill] sm:$0xff] }
 0x163   : > { %v4035_v4 = vpop.eup %4034  ;;  %2421 = vmatpush1.msra.mxu0 %v6590_v21  ;;  %2492 = vmatpush1.msra.mxu1 %v6591_v27  ;;  %v6611_v21 = vld [vmem:[#allocation52_spill] sm:$0xff]  ;;  %v6612_v27 = vld [vmem:[#allocation53_spill] sm:$0xff] }
 0x164   : > { %v2107_v28 = vmul.f32 0.5, %v4035_v4  ;;  %2422 = vmatprep.subr.mxu0 %v6592_v31  ;;  %2493 = vmatprep.subr.mxu1 %v6593_v33  ;;  %v6610_v4 = vld [vmem:[#allocation51_spill] sm:$0xff]  ;;  %v6615_v33 = vld [vmem:[#allocation56_spill] sm:$0xff] }
 0x165   : > { %v4037_v35 = vpop.eup %4036  ;;  %2423 = vmatpush1.msra.mxu0 %v6594_v36  ;;  %2494 = vmatpush1.msra.mxu1 %v6595_v40  ;;  %v6614_v31 = vld [vmem:[#allocation55_spill] sm:$0xff]  ;;  %v6617_v36 = vld [vmem:[#allocation58_spill] sm:$0xff] }
 0x166   : > { %v2108_v44 = vadd.f32 0.5, %v2107_v28  ;;  %v2111_v39 = vmul.f32 0.5, %v4037_v35  ;;  %2424 = vmatprep.subr.mxu0 %v6596_v60  ;;  %2495 = vmatprep.subr.mxu1 %v6597_v49  ;;  %v4039_v51 = vpop.eup %4038  ;;  %v6613_v28 = vld [vmem:[#allocation54_spill] sm:$0xff]  ;;  %v6616_v35 = vld [vmem:[#allocation57_spill] sm:$0xff]  ;;  %v6618_v40 = vld [vmem:[#allocation59_spill] sm:$0xff] }
 0x167   : > { %2425 = vmatpush1.msra.mxu0 %v6598_v45  ;;  %2496 = vmatpush1.msra.mxu1 %v6599_v62  ;;  %v6621_v60 = vld [vmem:[#allocation62_spill] sm:$0xff]  ;;  %v4041_v49 = vpop.eup %4040  ;;  %v6623_v45 = vld [vmem:[#allocation64_spill] sm:$0xff]  ;;  %v6624_v62 = vld [vmem:[#allocation65_spill] sm:$0xff] }
 0x168   : > { %v2112_v63 = vadd.f32 0.5, %v2111_v39  ;;  %2426 = vmatprep.subr.mxu0 %v6600_v48  ;;  %2497 = vmatprep.subr.mxu1 %v6601_v2  ;;  %v2119_v7 = vmul.f32 %v4039_v51, %v2108_v44  ;;  %v6619_v44 = vld [vmem:[#allocation60_spill] sm:$0xff]  ;;  %v6620_v39 = vld [vmem:[#allocation61_spill] sm:$0xff]  ;;  %v6626_v48 = vld [vmem:[#allocation67_spill] sm:$0xff]  ;;  %v2116_v51 = vmul.f32 0.5, %v4041_v49 }
 0x169   : > { %2427 = vmatpush1.msra.mxu0 %v6602_v50  ;;  %2498 = vmatpush1.msra.mxu1 %v6603_v3  ;;  %v6627_v2 = vld [vmem:[#allocation68_spill] sm:$0xff]  ;;  %v6628_v50 = vld [vmem:[#allocation69_spill] sm:$0xff]  ;;  %v6629_v3 = vld [vmem:[#allocation70_spill] sm:$0xff] }
 0x16a   : > { %v2118_v56 = vmul.f32 %v2112_v63, %v2104_v42  ;;  %2428 = vmatprep.subr.mxu0 %v6604_v9  ;;  %2499 = vmatprep.subr.mxu1 %v6605_v53  ;;  %v6622_v42 = vld [vmem:[#allocation63_spill] sm:$0xff]  ;;  %v6625_v63 = vld [vmem:[#allocation66_spill] sm:$0xff]  ;;  %v6632_v9 = vld [vmem:[#allocation73_spill] sm:$0xff]  ;;  %v2117_v53 = vadd.f32 0.5, %v2116_v51 }
 0x16b   : > { %2429 = vmatpush1.msra.mxu0 %v6606_v16  ;;  %2500 = vmatpush1.msra.mxu1 %v6607_v12  ;;  %v5505_v49 = vld [vmem:[%s6340_s3 + $0x158] sm:$0xff]  ;;  %v5548_v51 = vld [vmem:[%s6340_s3 + $0x108] sm:$0xff] }
 0x16c   : > { %v5337_v43 = vadd.f32 %v2119_v7, %v2118_v56  ;;  %2430 = vmatprep.subr.mxu0 %v6608_v0  ;;  %2501 = vmatprep.subr.mxu1 %v6609_v47  ;;  %v6630_v56 = vld [vmem:[#allocation71_spill] sm:$0xff]  ;;  %v6631_v7 = vld [vmem:[#allocation72_spill] sm:$0xff]  ;;  %v5421_v0 = vld [vmem:[%s6340_s3 + $0x1d0] sm:$0xff] }
 0x16d   : > { %2431 = vmatpush1.msra.mxu0 %v6610_v4  ;;  %2502 = vmatpush1.msra.mxu1 %v6611_v21  ;;  %v5428_v47 = vld [vmem:[%s6340_s3 + $0x1a8] sm:$0xff]  ;;  %v5433_v4 = vld [vmem:[%s6340_s3 + $0x1b8] sm:$0xff]  ;;  %v5440_v21 = vld [vmem:[%s6340_s3 + $0x1a0] sm:$0xff] }
 0x16e   : > { %4042 = vtanh.f32 %v5337_v43  ;;  %2432 = vmatprep.subr.mxu0 %v6612_v27  ;;  %2503 = vmatprep.subr.mxu1 %v6613_v28  ;;  %v5445_v27 = vld [vmem:[%s6340_s3 + $0x1b0] sm:$0xff]  ;;  %v5452_v28 = vld [vmem:[%s6340_s3 + $0x188] sm:$0xff] }
 0x16f   : > { %2433 = vmatpush1.msra.mxu0 %v6614_v31  ;;  %2504 = vmatpush1.msra.mxu1 %v6615_v33  ;;  %v5457_v31 = vld [vmem:[%s6340_s3 + $0x198] sm:$0xff]  ;;  %v5464_v33 = vld [vmem:[%s6340_s3 + $0x180] sm:$0xff] }
 0x170   : > { %2434 = vmatprep.subr.mxu0 %v6616_v35  ;;  %2505 = vmatprep.subr.mxu1 %v6617_v36  ;;  %v5469_v35 = vld [vmem:[%s6340_s3 + $0x190] sm:$0xff]  ;;  %v5476_v36 = vld [vmem:[%s6340_s3 + $0x168] sm:$0xff] }
 0x171   : > { %2435 = vmatpush1.msra.mxu0 %v6618_v40  ;;  %2506 = vmatpush1.msra.mxu1 %v6619_v44  ;;  %v5481_v40 = vld [vmem:[%s6340_s3 + $0x178] sm:$0xff]  ;;  %v5488_v44 = vld [vmem:[%s6340_s3 + $0x160] sm:$0xff] }
 0x172   : > { %2436 = vmatprep.subr.mxu0 %v6620_v39  ;;  %2507 = vmatprep.subr.mxu1 %v6621_v60  ;;  %v5493_v39 = vld [vmem:[%s6340_s3 + $0x170] sm:$0xff]  ;;  %v5500_v60 = vld [vmem:[%s6340_s3 + $0x148] sm:$0xff] }
 0x173   : > { %2437 = vmatpush1.msra.mxu0 %v6622_v42  ;;  %2508 = vmatpush1.msra.mxu1 %v6623_v45  ;;  %v5512_v42 = vld [vmem:[%s6340_s3 + $0x140] sm:$0xff]  ;;  %v5517_v45 = vld [vmem:[%s6340_s3 + $0x150] sm:$0xff] }
 0x174   : > { %2438 = vmatprep.subr.mxu0 %v6624_v62  ;;  %2509 = vmatprep.subr.mxu1 %v6625_v63  ;;  %v5524_v62 = vld [vmem:[%s6340_s3 + $0x128] sm:$0xff]  ;;  %v5529_v63 = vld [vmem:[%s6340_s3 + $0x138] sm:$0xff] }
 0x175   : > { %2439 = vmatpush1.msra.mxu0 %v6626_v48  ;;  %2510 = vmatpush1.msra.mxu1 %v6627_v2  ;;  %v5536_v48 = vld [vmem:[%s6340_s3 + $0x120] sm:$0xff]  ;;  %v5541_v2 = vld [vmem:[%s6340_s3 + $0x130] sm:$0xff] }
 0x176   : > { %2440 = vmatprep.subr.mxu0 %v6628_v50  ;;  %2511 = vmatprep.subr.mxu1 %v6629_v3  ;;  %v5553_v50 = vld [vmem:[%s6340_s3 + $0x118] sm:$0xff]  ;;  %v5560_v3 = vld [vmem:[%s6340_s3 + $0x100] sm:$0xff] }
 0x177   : > { %2441 = vmatpush1.msra.mxu0 %v6630_v56  ;;  %2512 = vmatpush1.msra.mxu1 %v6631_v7  ;;  %v5565_v56 = vld [vmem:[%s6340_s3 + $0x110] sm:$0xff]  ;;  %v5572_v7 = vld [vmem:[%s6340_s3 + $0xe8] sm:$0xff] }
 0x178   : > { %2442 = vmatprep.subr.mxu0 %v6632_v9  ;;  %2513 = vmatprep.subr.mxu1 %v5099_v22  ;;  %v5392_v22 = vld [vmem:[%s6340_s3 + $0x1e0] sm:$0xff]  ;;  %v5577_v9 = vld [vmem:[%s6340_s3 + $0xf8] sm:$0xff] }
 0x179   : > { %2443 = vmatpush1.msra.mxu0 %v5106_v25  ;;  %2514 = vmatpush1.msra.mxu1 %v5111_v24  ;;  %v5404_v24 = vld [vmem:[%s6340_s3 + $0x1c8] sm:$0xff]  ;;  %v5409_v25 = vld [vmem:[%s6340_s3 + $0x1d8] sm:$0xff] }
 0x17a   : > { %2444 = vmatprep.subr.mxu0 %v5118_v23  ;;  %2515 = vmatprep.subr.mxu1 %v5123_v11  ;;  %v5380_v11 = vld [vmem:[%s6340_s3 + $0x1e8] sm:$0xff]  ;;  %v5397_v23 = vld [vmem:[%s6340_s3 + $0x1f0] sm:$0xff] }
 0x17b   : > { %v4043_v16 = vpop.eup %4042  ;;  %2445 = vmatpush1.msra.mxu0 %v5130_v18  ;;  %2478 = vmatprep.mubr.f32.mxu0 %v6493_v20  ;;  %v5385_v18 = vld [vmem:[%s6340_s3 + $0x1f8] sm:$0xff] }
 0x17c   : > { %v2122_v12 = vmul.f32 %v4043_v16, %v2117_v53  ;;  %2516 = vmatpush1.msra.mxu1 %v5137_v19  ;;  %2549 = vmatprep.mubr.f32.mxu1 %v6493_v20  ;;  %v5416_v19 = vld [vmem:[%s6340_s3 + $0x1c0] sm:$0xff]  ;;  %v5589_v16 = vld [vmem:[%s6340_s3 + $0xf0] sm:$0xff] }
 0x17d   : > { %2675 = vmatprep.subr.mxu0 %v5380_v11  ;;  %2746 = vmatprep.subr.mxu1 %v5385_v18  ;;  %v5584_v53 = vld [vmem:[%s6340_s3 + $0xe0] sm:$0xff] }
 0x17e   : > { %3810 = vst [vmem:[%s4186_s23 + $0x18] sm:$0xff] %v2122_v12  ;;  %2479 = vmatmul.mubr.f32.vlgmr.msra.gmra.mxu0 %v2122_v12  ;;  %2550 = vmatmul.mubr.f32.vlgmr.msra.gmra.mxu1 %v2122_v12  ;;  %v5596_v12 = vld [vmem:[%s6340_s3 + $0xc8] sm:$0xff] }
 0x17f   : > { %2739 = vmatprep.mubr.f32.mxu0 %v6493_v20  ;;  %2810 = vmatprep.mubr.f32.mxu1 %v6493_v20 }
 0x180   : > { %2676 = vmatpush1.msra.mxu0 %v5392_v22  ;;  %2747 = vmatpush1.msra.mxu1 %v5397_v23 }
 0x181   : > { %2677 = vmatprep.subr.mxu0 %v5404_v24  ;;  %2748 = vmatprep.subr.mxu1 %v5409_v25 }
 0x182   : > { %2678 = vmatpush1.msra.mxu0 %v5416_v19  ;;  %2749 = vmatpush1.msra.mxu1 %v5421_v0 }
 0x183   : > { %2679 = vmatprep.subr.mxu0 %v5428_v47  ;;  %2750 = vmatprep.subr.mxu1 %v5433_v4 }
 0x184   : > { %2680 = vmatpush1.msra.mxu0 %v5440_v21  ;;  %2751 = vmatpush1.msra.mxu1 %v5445_v27 }
 0x185   : > { %2681 = vmatprep.subr.mxu0 %v5452_v28  ;;  %2752 = vmatprep.subr.mxu1 %v5457_v31 }
 0x186   : > { %2682 = vmatpush1.msra.mxu0 %v5464_v33  ;;  %2753 = vmatpush1.msra.mxu1 %v5469_v35 }
 0x187   : > { %2683 = vmatprep.subr.mxu0 %v5476_v36  ;;  %2754 = vmatprep.subr.mxu1 %v5481_v40 }
 0x188   : > { %2684 = vmatpush1.msra.mxu0 %v5488_v44  ;;  %2755 = vmatpush1.msra.mxu1 %v5493_v39 }
 0x189   : > { %2685 = vmatprep.subr.mxu0 %v5500_v60  ;;  %2756 = vmatprep.subr.mxu1 %v5505_v49 }
 0x18a   : > { %2686 = vmatpush1.msra.mxu0 %v5512_v42  ;;  %2757 = vmatpush1.msra.mxu1 %v5517_v45 }
 0x18b   : > { %2687 = vmatprep.subr.mxu0 %v5524_v62  ;;  %2758 = vmatprep.subr.mxu1 %v5529_v63 }
 0x18c   : > { %2688 = vmatpush1.msra.mxu0 %v5536_v48  ;;  %2759 = vmatpush1.msra.mxu1 %v5541_v2 }
 0x18d   : > { %2689 = vmatprep.subr.mxu0 %v5548_v51  ;;  %2760 = vmatprep.subr.mxu1 %v5553_v50 }
 0x18e   : > { %2690 = vmatpush1.msra.mxu0 %v5560_v3  ;;  %2761 = vmatpush1.msra.mxu1 %v5565_v56 }
 0x18f   : > { %2691 = vmatprep.subr.mxu0 %v5572_v7  ;;  %2762 = vmatprep.subr.mxu1 %v5577_v9 }
 0x190   : > { %2692 = vmatpush1.msra.mxu0 %v5584_v53  ;;  %2763 = vmatpush1.msra.mxu1 %v5589_v16 }
 0x191   : > { %2693 = vmatprep.subr.mxu0 %v5596_v12  ;;  %2764 = vmatprep.subr.mxu1 %v5601_v61 }
 0x192   : > { %2694 = vmatpush1.msra.mxu0 %v5608_v58  ;;  %2765 = vmatpush1.msra.mxu1 %v5613_v57 }
 0x193   : > { %2695 = vmatprep.subr.mxu0 %v5620_v52  ;;  %2766 = vmatprep.subr.mxu1 %v5625_v59 }
 0x194   : > { %2696 = vmatpush1.msra.mxu0 %v5632_v55  ;;  %2767 = vmatpush1.msra.mxu1 %v5637_v54 }
 0x195   : > { %2697 = vmatprep.subr.mxu0 %v5644_v46  ;;  %2768 = vmatprep.subr.mxu1 %v5649_v17 }
 0x196   : > { %2698 = vmatpush1.msra.mxu0 %v5656_v15  ;;  %2769 = vmatpush1.msra.mxu1 %v5661_v14 }
 0x197   : > { %2699 = vmatprep.subr.mxu0 %v5668_v10  ;;  %2770 = vmatprep.subr.mxu1 %v5673_v32  ;;  %v5697_v32 = vld [vmem:[%s6340_s3 + $0x58] sm:$0xff] }
 0x198   : > { %2700 = vmatpush1.msra.mxu0 %v5680_v30  ;;  %2771 = vmatpush1.msra.mxu1 %v5685_v29  ;;  %6649 = vst [vmem:[#allocation35_spill] sm:$0xff] %v5697_v32  ;;  %v5704_v30 = vld [vmem:[%s6340_s3 + $0x40] sm:$0xff]  ;;  %v5709_v29 = vld [vmem:[%s6340_s3 + $0x50] sm:$0xff] }
 0x199   : > { %2701 = vmatprep.subr.mxu0 %v5692_v26  ;;  %2772 = vmatprep.subr.mxu1 %v5697_v32  ;;  %6650 = vst [vmem:[#allocation36_spill] sm:$0xff] %v5704_v30  ;;  %6651 = vst [vmem:[#allocation37_spill] sm:$0xff] %v5709_v29  ;;  %v5716_v26 = vld [vmem:[%s6340_s3 + $0x28] sm:$0xff]  ;;  %v5721_v32 = vld [vmem:[%s6340_s3 + $0x38] sm:$0xff] }
 0x19a   : > { %2702 = vmatpush1.msra.mxu0 %v5704_v30  ;;  %2773 = vmatpush1.msra.mxu1 %v5709_v29  ;;  %6652 = vst [vmem:[#allocation38_spill] sm:$0xff] %v5716_v26  ;;  %6653 = vst [vmem:[#allocation39_spill] sm:$0xff] %v5721_v32  ;;  %v5728_v30 = vld [vmem:[%s6340_s3 + $0x20] sm:$0xff]  ;;  %v5733_v29 = vld [vmem:[%s6340_s3 + $0x30] sm:$0xff] }
 0x19b   : > { %2703 = vmatprep.subr.mxu0 %v5716_v26  ;;  %2774 = vmatprep.subr.mxu1 %v5721_v32  ;;  %6654 = vst [vmem:[#allocation40_spill] sm:$0xff] %v5728_v30  ;;  %6655 = vst [vmem:[#allocation41_spill] sm:$0xff] %v5733_v29  ;;  %v5740_v26 = vld [vmem:[%s6340_s3 + $0x8] sm:$0xff]  ;;  %v5745_v32 = vld [vmem:[%s6340_s3 + $0x18] sm:$0xff] }
 0x19c   : > { %2704 = vmatpush1.msra.mxu0 %v5728_v30  ;;  %2775 = vmatpush1.msra.mxu1 %v5733_v29  ;;  %6656 = vst [vmem:[#allocation42_spill] sm:$0xff] %v5740_v26  ;;  %6657 = vst [vmem:[#allocation43_spill] sm:$0xff] %v5745_v32  ;;  %v5752_v30 = vld [vmem:[%s6340_s3] sm:$0xff]  ;;  %v5757_v29 = vld [vmem:[%s6340_s3 + $0x10] sm:$0xff] }
 0x19d   : > { %2705 = vmatprep.subr.mxu0 %v5740_v26  ;;  %2776 = vmatprep.subr.mxu1 %v5745_v32  ;;  %6658 = vst [vmem:[#allocation44_spill] sm:$0xff] %v5752_v30  ;;  %6659 = vst [vmem:[#allocation45_spill] sm:$0xff] %v5757_v29  ;;  %v5764_v26 = vld [vmem:[%s6340_s3 + $0x3e8] sm:$0xff]  ;;  %v5769_v32 = vld [vmem:[%s6340_s3 + $0x3f8] sm:$0xff] }
 0x19e   : > { %2706 = vmatpush1.msra.mxu0 %v5752_v30  ;;  %2777 = vmatpush1.msra.mxu1 %v5757_v29  ;;  %6660 = vst [vmem:[#allocation46_spill] sm:$0xff] %v5764_v26  ;;  %6661 = vst [vmem:[#allocation47_spill] sm:$0xff] %v5769_v32 }
 0x19f   : > { %2890 = vmatprep.subr.mxu0 %v5764_v26  ;;  %2961 = vmatprep.subr.mxu1 %v5769_v32 }
 0x21c   : > { %v2265_v10 = vpop.f32.mrf.mxu0  ;;  %v2336_v30 = vpop.f32.mrf.mxu1 }
 0x21d   : > { %v2341_v14 = vadd.f32 %v2265_v10, %v5247_v1  ;;  %v2343_v46 = vadd.f32 %v2336_v30, %v5251_v6 }
 0x21e   : > { %v2267_v15 = vpop.f32.mrf.mxu0  ;;  %v2338_v55 = vpop.f32.mrf.mxu1 }
 0x21f   : > { %v2561_v29 = vmul.f32 0.5, %v2341_v14  ;;  %v2342_v17 = vadd.f32 %v2267_v15, %v5249_v5  ;;  %v2344_v59 = vadd.f32 %v2338_v55, %v5253_v8  ;;  %v5792_v55 = vld [vmem:[%s6340_s3 + $0x3f0] sm:$0xff] }
 0x221   : > { %4044 = vtanh.f32 %v2561_v29  ;;  %v2565_v54 = vmul.f32 0.5, %v2342_v17  ;;  %v2570_v26 = vmul.f32 0.5, %v2344_v59  ;;  %v5802_v59 = vld [vmem:[%s6340_s3 + $0x3d8] sm:$0xff] }
 0x223   : > { %4046 = vtanh.f32 %v2565_v54 }
 0x224   : > { %4048 = vtanh.f32 %v2343_v46 }
 0x225   : > { %4050 = vtanh.f32 %v2570_v26 }
 0x22e   : > { %v4045_v52 = vpop.eup %4044 }
 0x22f   : > { %v2563_v32 = vmul.f32 0.5, %v4045_v52 }
 0x230   : > { %v4047_v57 = vpop.eup %4046 }
 0x231   : > { %v2564_v58 = vadd.f32 0.5, %v2563_v32  ;;  %v2567_v1 = vmul.f32 0.5, %v4047_v57  ;;  %v4049_v10 = vpop.eup %4048 }
 0x232   : > { %v4051_v6 = vpop.eup %4050 }
 0x233   : > { %v2568_v14 = vadd.f32 0.5, %v2567_v1  ;;  %v2575_v61 = vmul.f32 %v4049_v10, %v2564_v58  ;;  %v2572_v52 = vmul.f32 0.5, %v4051_v6  ;;  %v5813_v1 = vld [vmem:[%s6340_s3 + $0x3d0] sm:$0xff]  ;;  %v5820_v10 = vld [vmem:[%s6340_s3 + $0x3a8] sm:$0xff]  ;;  %v5833_v6 = vld [vmem:[%s6340_s3 + $0x3a0] sm:$0xff] }
 0x235   : > { %v2574_v5 = vmul.f32 %v2568_v14, %v5299_v13  ;;  %v2573_v46 = vadd.f32 0.5, %v2572_v52  ;;  %v5808_v13 = vld [vmem:[%s6340_s3 + $0x3c0] sm:$0xff]  ;;  %v5825_v14 = vld [vmem:[%s6340_s3 + $0x3b8] sm:$0xff]  ;;  %v5869_v52 = vld [vmem:[%s6340_s3 + $0x368] sm:$0xff] }
 0x236   : > { %6666 = vst [vmem:[#allocation52_spill] sm:$0xff] %v5869_v52 }
 0x237   : > { %v5778_v15 = vadd.f32 %v2575_v61, %v2574_v5 }
 0x239   : > { %4052 = vtanh.f32 %v5778_v15 }
 0x23e   : > { %v2480_v17 = vpop.f32.mrf.mxu0  ;;  %v2551_v29 = vpop.f32.mrf.mxu1 }
 0x23f   : > { %v2556_v8 = vadd.f32 %v2480_v17, %v5276_v34  ;;  %v2558_v58 = vadd.f32 %v2551_v29, %v5282_v38  ;;  %v5787_v34 = vld [vmem:[%s6340_s3 + $0x3e0] sm:$0xff]  ;;  %v5797_v38 = vld [vmem:[%s6340_s3 + $0x3c8] sm:$0xff]  ;;  %v5838_v17 = vld [vmem:[%s6340_s3 + $0x3b0] sm:$0xff] }
 0x240   : > { %v2482_v30 = vpop.f32.mrf.mxu0  ;;  %v5857_v29 = vld [vmem:[%s6340_s3 + $0x380] sm:$0xff] }
 0x241   : > { %v2580_v32 = vmul.f32 0.5, %v2556_v8  ;;  %v2557_v57 = vadd.f32 %v2482_v30, %v5279_v37  ;;  %v2553_v37 = vpop.f32.mrf.mxu1  ;;  %v5850_v8 = vld [vmem:[%s6340_s3 + $0x398] sm:$0xff]  ;;  %6664 = vst [vmem:[#allocation50_spill] sm:$0xff] %v5857_v29  ;;  %v5862_v30 = vld [vmem:[%s6340_s3 + $0x390] sm:$0xff] }
 0x242   : > { %v2559_v5 = vadd.f32 %v2553_v37, %v5285_v41  ;;  %v5845_v41 = vld [vmem:[%s6340_s3 + $0x388] sm:$0xff]  ;;  %6663 = vst [vmem:[#allocation49_spill] sm:$0xff] %v5850_v8  ;;  %6665 = vst [vmem:[#allocation51_spill] sm:$0xff] %v5862_v30 }
 0x243   : > { %4054 = vtanh.f32 %v2580_v32  ;;  %v2584_v26 = vmul.f32 0.5, %v2557_v57  ;;  %6662 = vst [vmem:[#allocation48_spill] sm:$0xff] %v5845_v41  ;;  %v5874_v32 = vld [vmem:[%s6340_s3 + $0x378] sm:$0xff] }
 0x244   : > { %6667 = vst [vmem:[#allocation53_spill] sm:$0xff] %v5874_v32  ;;  %v2589_v57 = vmul.f32 0.5, %v2559_v5  ;;  %v5905_v5 = vld [vmem:[%s6340_s3 + $0x340] sm:$0xff] }
 0x245   : > { %4056 = vtanh.f32 %v2584_v26  ;;  %v5886_v26 = vld [vmem:[%s6340_s3 + $0x370] sm:$0xff]  ;;  %6671 = vst [vmem:[#allocation57_spill] sm:$0xff] %v5905_v5 }
 0x246   : > { %v4053_v61 = vpop.eup %4052  ;;  %4058 = vtanh.f32 %v2558_v58  ;;  %v5881_v58 = vld [vmem:[%s6340_s3 + $0x360] sm:$0xff]  ;;  %6669 = vst [vmem:[#allocation55_spill] sm:$0xff] %v5886_v26 }
 0x247   : > { %v2578_v54 = vmul.f32 %v4053_v61, %v2573_v46  ;;  %6668 = vst [vmem:[#allocation54_spill] sm:$0xff] %v5881_v58  ;;  %v5893_v61 = vld [vmem:[%s6340_s3 + $0x348] sm:$0xff]  ;;  %4060 = vtanh.f32 %v2589_v57  ;;  %v5946_v57 = vld [vmem:[%s6340_s3 + $0x318] sm:$0xff] }
 0x248   : > { %6675 = vst [vmem:[#allocation61_spill] sm:$0xff] %v5946_v57 }
 0x249   : > { %3875 = vst [vmem:[%s4181_s19 + $0x8] sm:$0xff] %v2578_v54  ;;  %2740 = vmatmul.mubr.f32.vlgmr.msra.gmra.mxu0 %v2578_v54  ;;  %2811 = vmatmul.mubr.f32.vlgmr.msra.gmra.mxu1 %v2578_v54  ;;  %v5898_v54 = vld [vmem:[%s6340_s3 + $0x358] sm:$0xff] }
 0x24a   : > { %2891 = vmatpush1.msra.mxu0 %v5787_v34  ;;  %2962 = vmatpush1.msra.mxu1 %v5792_v55  ;;  %6670 = vst [vmem:[#allocation56_spill] sm:$0xff] %v5898_v54 }
 0x24b   : > { %2892 = vmatprep.subr.mxu0 %v5797_v38  ;;  %2963 = vmatprep.subr.mxu1 %v5802_v59 }
 0x24c   : > { %2893 = vmatpush1.msra.mxu0 %v5808_v13  ;;  %2964 = vmatpush1.msra.mxu1 %v5813_v1 }
 0x24d   : > { %2894 = vmatprep.subr.mxu0 %v5820_v10  ;;  %2965 = vmatprep.subr.mxu1 %v5825_v14 }
 0x24e   : > { %2895 = vmatpush1.msra.mxu0 %v5833_v6  ;;  %2966 = vmatpush1.msra.mxu1 %v5838_v17 }
 0x24f   : > { %2896 = vmatprep.subr.mxu0 %v5845_v41  ;;  %2967 = vmatprep.subr.mxu1 %v5850_v8 }
 0x250   : > { %v4055_v46 = vpop.eup %4054  ;;  %2897 = vmatpush1.msra.mxu0 %v5857_v29  ;;  %2968 = vmatpush1.msra.mxu1 %v5862_v30  ;;  %v5910_v30 = vld [vmem:[%s6340_s3 + $0x350] sm:$0xff] }
 0x251   : > { %v2582_v37 = vmul.f32 0.5, %v4055_v46  ;;  %2898 = vmatprep.subr.mxu0 %v5869_v52  ;;  %2969 = vmatprep.subr.mxu1 %v5874_v32  ;;  %6672 = vst [vmem:[#allocation58_spill] sm:$0xff] %v5910_v30  ;;  %v5917_v46 = vld [vmem:[%s6340_s3 + $0x328] sm:$0xff]  ;;  %v5922_v32 = vld [vmem:[%s6340_s3 + $0x338] sm:$0xff] }
 0x252   : > { %v4057_v29 = vpop.eup %4056  ;;  %2899 = vmatpush1.msra.mxu0 %v5881_v58  ;;  %2970 = vmatpush1.msra.mxu1 %v5886_v26  ;;  %v5929_v26 = vld [vmem:[%s6340_s3 + $0x320] sm:$0xff]  ;;  %v5934_v58 = vld [vmem:[%s6340_s3 + $0x330] sm:$0xff] }
 0x253   : > { %v2583_v52 = vadd.f32 0.5, %v2582_v37  ;;  %v2586_v8 = vmul.f32 0.5, %v4057_v29  ;;  %2900 = vmatprep.subr.mxu0 %v5893_v61  ;;  %2971 = vmatprep.subr.mxu1 %v5898_v54  ;;  %6673 = vst [vmem:[#allocation59_spill] sm:$0xff] %v5929_v26  ;;  %6674 = vst [vmem:[#allocation60_spill] sm:$0xff] %v5934_v58  ;;  %v4059_v41 = vpop.eup %4058  ;;  %v5941_v29 = vld [vmem:[%s6340_s3 + $0x308] sm:$0xff] }
 0x254   : > { %2901 = vmatpush1.msra.mxu0 %v5905_v5  ;;  %2972 = vmatpush1.msra.mxu1 %v5910_v30  ;;  %v5953_v30 = vld [vmem:[%s6340_s3 + $0x300] sm:$0xff]  ;;  %v5958_v5 = vld [vmem:[%s6340_s3 + $0x310] sm:$0xff] }
 0x255   : > { %v2587_v37 = vadd.f32 0.5, %v2586_v8  ;;  %v2594_v54 = vmul.f32 %v4059_v41, %v2583_v52  ;;  %2902 = vmatprep.subr.mxu0 %v5917_v46  ;;  %2973 = vmatprep.subr.mxu1 %v5922_v32  ;;  %6676 = vst [vmem:[#allocation62_spill] sm:$0xff] %v5953_v30  ;;  %6677 = vst [vmem:[#allocation63_spill] sm:$0xff] %v5958_v5  ;;  %v5965_v41 = vld [vmem:[%s6340_s3 + $0x2e8] sm:$0xff]  ;;  %v5970_v8 = vld [vmem:[%s6340_s3 + $0x2f8] sm:$0xff] }
 0x256   : > { %2903 = vmatpush1.msra.mxu0 %v5929_v26  ;;  %2974 = vmatpush1.msra.mxu1 %v5934_v58  ;;  %6678 = vst [vmem:[#allocation64_spill] sm:$0xff] %v5965_v41  ;;  %6679 = vst [vmem:[#allocation65_spill] sm:$0xff] %v5970_v8  ;;  %v5978_v58 = vld [vmem:[%s6340_s3 + $0x2e0] sm:$0xff]  ;;  %v5983_v26 = vld [vmem:[%s6340_s3 + $0x2f0] sm:$0xff] }
 0x257   : > { %v2593_v52 = vmul.f32 %v2587_v37, %v5337_v43  ;;  %2904 = vmatprep.subr.mxu0 %v5941_v29  ;;  %2975 = vmatprep.subr.mxu1 %v5946_v57  ;;  %6680 = vst [vmem:[#allocation66_spill] sm:$0xff] %v5978_v58  ;;  %6681 = vst [vmem:[#allocation67_spill] sm:$0xff] %v5983_v26  ;;  %v5990_v43 = vld [vmem:[%s6340_s3 + $0x2c8] sm:$0xff]  ;;  %v5995_v37 = vld [vmem:[%s6340_s3 + $0x2d8] sm:$0xff] }
 0x258   : > { %2905 = vmatpush1.msra.mxu0 %v5953_v30  ;;  %2976 = vmatpush1.msra.mxu1 %v5958_v5  ;;  %6682 = vst [vmem:[#allocation68_spill] sm:$0xff] %v5990_v43  ;;  %6683 = vst [vmem:[#allocation69_spill] sm:$0xff] %v5995_v37  ;;  %v6004_v5 = vld [vmem:[%s6340_s3 + $0x2c0] sm:$0xff]  ;;  %v6009_v30 = vld [vmem:[%s6340_s3 + $0x2d0] sm:$0xff] }
 0x259   : > { %v5997_v57 = vadd.f32 %v2594_v54, %v2593_v52  ;;  %2906 = vmatprep.subr.mxu0 %v5965_v41  ;;  %2977 = vmatprep.subr.mxu1 %v5970_v8  ;;  %6684 = vst [vmem:[#allocation70_spill] sm:$0xff] %v6004_v5  ;;  %6685 = vst [vmem:[#allocation71_spill] sm:$0xff] %v6009_v30  ;;  %v6016_v54 = vld [vmem:[%s6340_s3 + $0x2a8] sm:$0xff]  ;;  %v6021_v52 = vld [vmem:[%s6340_s3 + $0x2b8] sm:$0xff]  ;;  %v4061_v8 = vpop.eup %4060 }
 0x25a   : > { %2907 = vmatpush1.msra.mxu0 %v5978_v58  ;;  %2978 = vmatpush1.msra.mxu1 %v5983_v26  ;;  %6686 = vst [vmem:[#allocation72_spill] sm:$0xff] %v6016_v54  ;;  %6687 = vst [vmem:[#allocation73_spill] sm:$0xff] %v6021_v52  ;;  %v6029_v26 = vld [vmem:[%s6340_s3 + $0x2a0] sm:$0xff]  ;;  %v6034_v58 = vld [vmem:[%s6340_s3 + $0x2b0] sm:$0xff]  ;;  %v2591_v41 = vmul.f32 0.5, %v4061_v8 }
 0x25b   : > { %4062 = vtanh.f32 %v5997_v57  ;;  %2908 = vmatprep.subr.mxu0 %v5990_v43  ;;  %2979 = vmatprep.subr.mxu1 %v5995_v37  ;;  %6688 = vst [vmem:[#allocation79_spill] sm:$0xff] %v6029_v26  ;;  %6689 = vst [vmem:[#allocation80_spill] sm:$0xff] %v6034_v58  ;;  %v6041_v43 = vld [vmem:[%s6340_s3 + $0x288] sm:$0xff]  ;;  %v6046_v37 = vld [vmem:[%s6340_s3 + $0x298] sm:$0xff] }
 0x25c   : > { %2909 = vmatpush1.msra.mxu0 %v6004_v5  ;;  %2980 = vmatpush1.msra.mxu1 %v6009_v30  ;;  %6690 = vst [vmem:[#allocation81_spill] sm:$0xff] %v6041_v43  ;;  %6691 = vst [vmem:[#allocation82_spill] sm:$0xff] %v6046_v37  ;;  %v6053_v5 = vld [vmem:[%s6340_s3 + $0x280] sm:$0xff]  ;;  %v6058_v30 = vld [vmem:[%s6340_s3 + $0x290] sm:$0xff] }
 0x25d   : > { %2910 = vmatprep.subr.mxu0 %v6016_v54  ;;  %2981 = vmatprep.subr.mxu1 %v6021_v52  ;;  %6692 = vst [vmem:[#allocation83_spill] sm:$0xff] %v6053_v5  ;;  %6693 = vst [vmem:[#allocation84_spill] sm:$0xff] %v6058_v30  ;;  %v6065_v54 = vld [vmem:[%s6340_s3 + $0x268] sm:$0xff]  ;;  %v6070_v52 = vld [vmem:[%s6340_s3 + $0x278] sm:$0xff] }
 0x25e   : > { %2911 = vmatpush1.msra.mxu0 %v6029_v26  ;;  %2982 = vmatpush1.msra.mxu1 %v6034_v58  ;;  %6694 = vst [vmem:[#allocation85_spill] sm:$0xff] %v6065_v54  ;;  %6695 = vst [vmem:[#allocation86_spill] sm:$0xff] %v6070_v52  ;;  %v6077_v26 = vld [vmem:[%s6340_s3 + $0x260] sm:$0xff]  ;;  %v6082_v58 = vld [vmem:[%s6340_s3 + $0x270] sm:$0xff] }
 0x25f   : > { %2912 = vmatprep.subr.mxu0 %v6041_v43  ;;  %2983 = vmatprep.subr.mxu1 %v6046_v37  ;;  %6696 = vst [vmem:[#allocation87_spill] sm:$0xff] %v6077_v26  ;;  %6697 = vst [vmem:[#allocation88_spill] sm:$0xff] %v6082_v58  ;;  %v6089_v43 = vld [vmem:[%s6340_s3 + $0x248] sm:$0xff]  ;;  %v6094_v37 = vld [vmem:[%s6340_s3 + $0x258] sm:$0xff] }
 0x260   : > { %2913 = vmatpush1.msra.mxu0 %v6053_v5  ;;  %2984 = vmatpush1.msra.mxu1 %v6058_v30  ;;  %6698 = vst [vmem:[#allocation89_spill] sm:$0xff] %v6089_v43  ;;  %6699 = vst [vmem:[#allocation90_spill] sm:$0xff] %v6094_v37  ;;  %v6101_v5 = vld [vmem:[%s6340_s3 + $0x240] sm:$0xff]  ;;  %v6106_v30 = vld [vmem:[%s6340_s3 + $0x250] sm:$0xff] }
 0x261   : > { %2914 = vmatprep.subr.mxu0 %v6065_v54  ;;  %2985 = vmatprep.subr.mxu1 %v6070_v52  ;;  %6700 = vst [vmem:[#allocation91_spill] sm:$0xff] %v6101_v5  ;;  %6701 = vst [vmem:[#allocation92_spill] sm:$0xff] %v6106_v30  ;;  %v6113_v54 = vld [vmem:[%s6340_s3 + $0x228] sm:$0xff]  ;;  %v6118_v52 = vld [vmem:[%s6340_s3 + $0x238] sm:$0xff] }
 0x262   : > { %2915 = vmatpush1.msra.mxu0 %v6077_v26  ;;  %2986 = vmatpush1.msra.mxu1 %v6082_v58  ;;  %6702 = vst [vmem:[#allocation93_spill] sm:$0xff] %v6113_v54  ;;  %6703 = vst [vmem:[#allocation94_spill] sm:$0xff] %v6118_v52  ;;  %v6125_v26 = vld [vmem:[%s6340_s3 + $0x220] sm:$0xff]  ;;  %v6130_v58 = vld [vmem:[%s6340_s3 + $0x230] sm:$0xff] }
 0x263   : > { %2916 = vmatprep.subr.mxu0 %v6089_v43  ;;  %2987 = vmatprep.subr.mxu1 %v6094_v37  ;;  %v6137_v8 = vld [vmem:[%s6340_s3 + $0x208] sm:$0xff]  ;;  %v6142_v37 = vld [vmem:[%s6340_s3 + $0x218] sm:$0xff]  ;;  %v2592_v43 = vadd.f32 0.5, %v2591_v41  ;;  %v6735_v41 = vld [vmem:[#allocation18_spill] sm:$0xff] }
 0x264   : > { %2917 = vmatpush1.msra.mxu0 %v6101_v5  ;;  %2988 = vmatpush1.msra.mxu1 %v6106_v30  ;;  %v6149_v5 = vld [vmem:[%s6340_s3 + $0x200] sm:$0xff]  ;;  %v6156_v30 = vld [vmem:[%s6340_s3 + $0x210] sm:$0xff] }
 0x265   : > { %2918 = vmatprep.subr.mxu0 %v6113_v54  ;;  %2989 = vmatprep.subr.mxu1 %v6118_v52 }
 0x266   : > { %2919 = vmatpush1.msra.mxu0 %v6125_v26  ;;  %2990 = vmatpush1.msra.mxu1 %v6130_v58 }
 0x267   : > { %2920 = vmatprep.subr.mxu0 %v6137_v8  ;;  %2991 = vmatprep.subr.mxu1 %v6142_v37 }
 0x268   : > { %v4063_v52 = vpop.eup %4062  ;;  %2921 = vmatpush1.msra.mxu0 %v6149_v5  ;;  %2954 = vmatprep.mubr.f32.mxu0 %v6493_v20 }
 0x269   : > { %v2597_v54 = vmul.f32 %v4063_v52, %v2592_v43  ;;  %2992 = vmatpush1.msra.mxu1 %v6156_v30  ;;  %3025 = vmatprep.mubr.f32.mxu1 %v6493_v20 }
 0x26a   : > { %3151 = vmatprep.subr.mxu0 %v5380_v11  ;;  %3222 = vmatprep.subr.mxu1 %v5385_v18  ;;  %v6704_v11 = vld [vmem:[#allocation19_spill] sm:$0xff]  ;;  %v6705_v18 = vld [vmem:[#allocation20_spill] sm:$0xff] }
 0x26b   : > { %3876 = vst [vmem:[%s4186_s23 + $0x10] sm:$0xff] %v2597_v54  ;;  %2955 = vmatmul.mubr.f32.vlgmr.msra.gmra.mxu0 %v2597_v54  ;;  %3026 = vmatmul.mubr.f32.vlgmr.msra.gmra.mxu1 %v2597_v54 }
 0x26c   : > { %3152 = vmatpush1.msra.mxu0 %v5392_v22  ;;  %3223 = vmatpush1.msra.mxu1 %v5397_v23  ;;  %v6706_v22 = vld [vmem:[#allocation21_spill] sm:$0xff]  ;;  %v6707_v23 = vld [vmem:[#allocation22_spill] sm:$0xff] }
 0x26d   : > { %3153 = vmatprep.subr.mxu0 %v5404_v24  ;;  %3224 = vmatprep.subr.mxu1 %v5409_v25  ;;  %v6708_v24 = vld [vmem:[#allocation23_spill] sm:$0xff]  ;;  %v6709_v25 = vld [vmem:[#allocation24_spill] sm:$0xff] }
 0x26e   : > { %3154 = vmatpush1.msra.mxu0 %v5416_v19  ;;  %3225 = vmatpush1.msra.mxu1 %v5421_v0  ;;  %v6710_v19 = vld [vmem:[#allocation25_spill] sm:$0xff]  ;;  %v6711_v0 = vld [vmem:[#allocation26_spill] sm:$0xff] }
 0x26f   : > { %3155 = vmatprep.subr.mxu0 %v5428_v47  ;;  %3226 = vmatprep.subr.mxu1 %v5433_v4  ;;  %v6712_v47 = vld [vmem:[#allocation27_spill] sm:$0xff]  ;;  %v6713_v4 = vld [vmem:[#allocation28_spill] sm:$0xff] }
 0x270   : > { %3156 = vmatpush1.msra.mxu0 %v5440_v21  ;;  %3227 = vmatpush1.msra.mxu1 %v5445_v27  ;;  %v6714_v21 = vld [vmem:[#allocation29_spill] sm:$0xff]  ;;  %v6715_v27 = vld [vmem:[#allocation30_spill] sm:$0xff] }
 0x271   : > { %3157 = vmatprep.subr.mxu0 %v5452_v28  ;;  %3228 = vmatprep.subr.mxu1 %v5457_v31  ;;  %v6716_v28 = vld [vmem:[#allocation31_spill] sm:$0xff]  ;;  %v6717_v31 = vld [vmem:[#allocation32_spill] sm:$0xff] }
 0x272   : > { %3158 = vmatpush1.msra.mxu0 %v5464_v33  ;;  %3229 = vmatpush1.msra.mxu1 %v5469_v35  ;;  %v6718_v33 = vld [vmem:[#allocation33_spill] sm:$0xff]  ;;  %v6719_v35 = vld [vmem:[#allocation34_spill] sm:$0xff] }
 0x273   : > { %3159 = vmatprep.subr.mxu0 %v5476_v36  ;;  %3230 = vmatprep.subr.mxu1 %v5481_v40  ;;  %v6720_v36 = vld [vmem:[#allocation35_spill] sm:$0xff]  ;;  %v6721_v40 = vld [vmem:[#allocation36_spill] sm:$0xff] }
 0x274   : > { %3160 = vmatpush1.msra.mxu0 %v5488_v44  ;;  %3231 = vmatpush1.msra.mxu1 %v5493_v39  ;;  %v6722_v44 = vld [vmem:[#allocation37_spill] sm:$0xff]  ;;  %v6723_v39 = vld [vmem:[#allocation38_spill] sm:$0xff] }
 0x275   : > { %3161 = vmatprep.subr.mxu0 %v5500_v60  ;;  %3232 = vmatprep.subr.mxu1 %v5505_v49  ;;  %v6724_v60 = vld [vmem:[#allocation39_spill] sm:$0xff]  ;;  %v6725_v49 = vld [vmem:[#allocation40_spill] sm:$0xff] }
 0x276   : > { %3162 = vmatpush1.msra.mxu0 %v5512_v42  ;;  %3233 = vmatpush1.msra.mxu1 %v5517_v45  ;;  %v6726_v42 = vld [vmem:[#allocation41_spill] sm:$0xff]  ;;  %v6727_v45 = vld [vmem:[#allocation42_spill] sm:$0xff] }
 0x277   : > { %3163 = vmatprep.subr.mxu0 %v5524_v62  ;;  %3234 = vmatprep.subr.mxu1 %v5529_v63  ;;  %v6728_v62 = vld [vmem:[#allocation43_spill] sm:$0xff]  ;;  %v6729_v63 = vld [vmem:[#allocation44_spill] sm:$0xff] }
 0x278   : > { %3164 = vmatpush1.msra.mxu0 %v5536_v48  ;;  %3235 = vmatpush1.msra.mxu1 %v5541_v2  ;;  %v6730_v48 = vld [vmem:[#allocation45_spill] sm:$0xff]  ;;  %v6731_v2 = vld [vmem:[#allocation46_spill] sm:$0xff] }
 0x279   : > { %3165 = vmatprep.subr.mxu0 %v5548_v51  ;;  %3236 = vmatprep.subr.mxu1 %v5553_v50  ;;  %v6732_v51 = vld [vmem:[#allocation47_spill] sm:$0xff] }
 0x27a   : > { %3166 = vmatpush1.msra.mxu0 %v5560_v3  ;;  %3237 = vmatpush1.msra.mxu1 %v5565_v56  ;;  %v6733_v3 = vld [vmem:[#allocation16_spill] sm:$0xff] }
 0x27b   : > { %3167 = vmatprep.subr.mxu0 %v5572_v7  ;;  %3238 = vmatprep.subr.mxu1 %v5577_v9 }
 0x27c   : > { %3168 = vmatpush1.msra.mxu0 %v5584_v53  ;;  %3239 = vmatpush1.msra.mxu1 %v5589_v16  ;;  %v6734_v16 = vld [vmem:[#allocation17_spill] sm:$0xff] }
 0x27d   : > { %3169 = vmatprep.subr.mxu0 %v5596_v12  ;;  %3240 = vmatprep.subr.mxu1 %v6704_v11  ;;  %v6736_v11 = vld [vmem:[#allocation74_spill] sm:$0xff] }
 0x27e   : > { %3170 = vmatpush1.msra.mxu0 %v6705_v18  ;;  %3241 = vmatpush1.msra.mxu1 %v6706_v22 }
 0x27f   : > { %3171 = vmatprep.subr.mxu0 %v6707_v23  ;;  %3242 = vmatprep.subr.mxu1 %v6708_v24 }
 0x280   : > { %3172 = vmatpush1.msra.mxu0 %v6709_v25  ;;  %3243 = vmatpush1.msra.mxu1 %v6710_v19 }
 0x281   : > { %3173 = vmatprep.subr.mxu0 %v6711_v0  ;;  %3244 = vmatprep.subr.mxu1 %v6712_v47 }
 0x282   : > { %3174 = vmatpush1.msra.mxu0 %v6713_v4  ;;  %3245 = vmatpush1.msra.mxu1 %v6714_v21 }
 0x283   : > { %3175 = vmatprep.subr.mxu0 %v6715_v27  ;;  %3246 = vmatprep.subr.mxu1 %v6716_v28 }
 0x284   : > { %3176 = vmatpush1.msra.mxu0 %v6717_v31  ;;  %3247 = vmatpush1.msra.mxu1 %v6718_v33 }
 0x285   : > { %3177 = vmatprep.subr.mxu0 %v6719_v35  ;;  %3248 = vmatprep.subr.mxu1 %v6720_v36  ;;  %v6737_v35 = vld [vmem:[#allocation12_spill] sm:$0xff] }
 0x286   : > { %3178 = vmatpush1.msra.mxu0 %v6721_v40  ;;  %3249 = vmatpush1.msra.mxu1 %v6722_v44 }
 0x287   : > { %3179 = vmatprep.subr.mxu0 %v6723_v39  ;;  %3250 = vmatprep.subr.mxu1 %v6724_v60 }
 0x288   : > { %3180 = vmatpush1.msra.mxu0 %v6725_v49  ;;  %3251 = vmatpush1.msra.mxu1 %v6726_v42  ;;  %v6738_v49 = vld [vmem:[#allocation13_spill] sm:$0xff] }
 0x289   : > { %3181 = vmatprep.subr.mxu0 %v6727_v45  ;;  %3252 = vmatprep.subr.mxu1 %v6728_v62  ;;  %v6739_v45 = vld [vmem:[#allocation14_spill] sm:$0xff] }
 0x28a   : > { %3182 = vmatpush1.msra.mxu0 %v6729_v63  ;;  %3215 = vmatprep.mubr.f32.mxu0 %v6493_v20 }
 0x28b   : > { %3253 = vmatpush1.msra.mxu1 %v6730_v48  ;;  %3286 = vmatprep.mubr.f32.mxu1 %v6493_v20 }
 0x28c   : > { %3366 = vmatprep.subr.mxu0 %v6731_v2  ;;  %3437 = vmatprep.subr.mxu1 %v6732_v51 }
 0x309   : > { %v2741_v50 = vpop.f32.mrf.mxu0  ;;  %v2812_v7 = vpop.f32.mrf.mxu1 }
 0x30a   : > { %v2817_v56 = vadd.f32 %v2741_v50, %v6733_v3  ;;  %v2819_v43 = vadd.f32 %v2812_v7, %v6735_v41  ;;  %v6740_v50 = vld [vmem:[#allocation15_spill] sm:$0xff]  ;;  %v6743_v7 = vld [vmem:[#allocation50_spill] sm:$0xff]  ;;  %v6750_v41 = vld [vmem:[#allocation57_spill] sm:$0xff] }
 0x30b   : > { %v2743_v9 = vpop.f32.mrf.mxu0  ;;  %v2814_v52 = vpop.f32.mrf.mxu1 }
 0x30c   : > { %v3037_v53 = vmul.f32 0.5, %v2817_v56  ;;  %v2818_v12 = vadd.f32 %v2743_v9, %v6734_v16  ;;  %v2820_v18 = vadd.f32 %v2814_v52, %v6736_v11  ;;  %v6742_v56 = vld [vmem:[#allocation49_spill] sm:$0xff]  ;;  %v6747_v9 = vld [vmem:[#allocation54_spill] sm:$0xff]  ;;  %v6749_v16 = vld [vmem:[#allocation56_spill] sm:$0xff] }
 0x30d   : > { %v6752_v11 = vld [vmem:[#allocation59_spill] sm:$0xff] }
 0x30e   : > { %4064 = vtanh.f32 %v3037_v53  ;;  %v3041_v54 = vmul.f32 0.5, %v2818_v12  ;;  %v3046_v22 = vmul.f32 0.5, %v2820_v18  ;;  %v6753_v18 = vld [vmem:[#allocation60_spill] sm:$0xff] }
 0x310   : > { %4066 = vtanh.f32 %v3041_v54 }
 0x311   : > { %4068 = vtanh.f32 %v2819_v43  ;;  %v6751_v43 = vld [vmem:[#allocation58_spill] sm:$0xff] }
 0x312   : > { %4070 = vtanh.f32 %v3046_v22 }
 0x31b   : > { %v4065_v23 = vpop.eup %4064 }
 0x31c   : > { %v3039_v24 = vmul.f32 0.5, %v4065_v23  ;;  %v6755_v23 = vld [vmem:[#allocation62_spill] sm:$0xff] }
 0x31d   : > { %v4067_v25 = vpop.eup %4066 }
 0x31e   : > { %v3040_v19 = vadd.f32 0.5, %v3039_v24  ;;  %v3043_v0 = vmul.f32 0.5, %v4067_v25  ;;  %v4069_v47 = vpop.eup %4068  ;;  %v6756_v24 = vld [vmem:[#allocation63_spill] sm:$0xff] }
 0x31f   : > { %v4071_v31 = vpop.eup %4070 }
 0x320   : > { %v3044_v4 = vadd.f32 0.5, %v3043_v0  ;;  %v3051_v21 = vmul.f32 %v4069_v47, %v3040_v19  ;;  %v3048_v39 = vmul.f32 0.5, %v4071_v31  ;;  %v6757_v19 = vld [vmem:[#allocation64_spill] sm:$0xff]  ;;  %v6760_v0 = vld [vmem:[#allocation67_spill] sm:$0xff]  ;;  %v6763_v47 = vld [vmem:[#allocation70_spill] sm:$0xff] }
 0x321   : > { %v6767_v31 = vld [vmem:[#allocation79_spill] sm:$0xff] }
 0x322   : > { %v3050_v27 = vmul.f32 %v3044_v4, %v5778_v15  ;;  %v3049_v15 = vadd.f32 0.5, %v3048_v39  ;;  %v6764_v4 = vld [vmem:[#allocation71_spill] sm:$0xff]  ;;  %v6772_v39 = vld [vmem:[#allocation84_spill] sm:$0xff] }
 0x324   : > { %v6238_v28 = vadd.f32 %v3051_v21, %v3050_v27  ;;  %v6765_v21 = vld [vmem:[#allocation72_spill] sm:$0xff]  ;;  %v6766_v27 = vld [vmem:[#allocation73_spill] sm:$0xff] }
 0x326   : > { %4072 = vtanh.f32 %v6238_v28 }
 0x32b   : > { %v2956_v33 = vpop.f32.mrf.mxu0  ;;  %v3027_v40 = vpop.f32.mrf.mxu1 }
 0x32c   : > { %v3032_v36 = vadd.f32 %v2956_v33, %v6737_v35  ;;  %v3034_v62 = vadd.f32 %v3027_v40, %v6739_v45  ;;  %v6768_v33 = vld [vmem:[#allocation80_spill] sm:$0xff]  ;;  %v6769_v35 = vld [vmem:[#allocation81_spill] sm:$0xff] }
 0x32d   : > { %v2958_v44 = vpop.f32.mrf.mxu0  ;;  %v3029_v51 = vpop.f32.mrf.mxu1  ;;  %v6776_v45 = vld [vmem:[#allocation88_spill] sm:$0xff] }
 0x32e   : > { %v3056_v60 = vmul.f32 0.5, %v3032_v36  ;;  %v3033_v42 = vadd.f32 %v2958_v44, %v6738_v49  ;;  %v3035_v3 = vadd.f32 %v3029_v51, %v6740_v50  ;;  %v6770_v36 = vld [vmem:[#allocation82_spill] sm:$0xff]  ;;  %v6771_v44 = vld [vmem:[#allocation83_spill] sm:$0xff]  ;;  %v6781_v51 = vld [vmem:[#allocation93_spill] sm:$0xff] }
 0x32f   : > { %v6774_v49 = vld [vmem:[#allocation86_spill] sm:$0xff] }
 0x330   : > { %4074 = vtanh.f32 %v3056_v60  ;;  %v3060_v63 = vmul.f32 0.5, %v3033_v42  ;;  %v6773_v60 = vld [vmem:[#allocation85_spill] sm:$0xff]  ;;  %v6775_v42 = vld [vmem:[#allocation87_spill] sm:$0xff]  ;;  %v6782_v50 = vld [vmem:[#allocation94_spill] sm:$0xff] }
 0x332   : > { %4076 = vtanh.f32 %v3060_v63  ;;  %v6777_v63 = vld [vmem:[#allocation89_spill] sm:$0xff] }
 0x333   : > { %v4073_v48 = vpop.eup %4072  ;;  %4078 = vtanh.f32 %v3034_v62 }
 0x334   : > { %v3054_v2 = vmul.f32 %v4073_v48, %v3049_v15  ;;  %v6778_v15 = vld [vmem:[#allocation90_spill] sm:$0xff]  ;;  %v6779_v48 = vld [vmem:[#allocation91_spill] sm:$0xff] }
 0x336   : > { %3941 = vst [vmem:[%s4181_s19 + $0x10] sm:$0xff] %v3054_v2  ;;  %3216 = vmatmul.mubr.f32.vlgmr.msra.gmra.mxu0 %v3054_v2  ;;  %3287 = vmatmul.mubr.f32.vlgmr.msra.gmra.mxu1 %v3054_v2  ;;  %v6780_v2 = vld [vmem:[#allocation92_spill] sm:$0xff] }
 0x337   : > { %3367 = vmatpush1.msra.mxu0 %v5787_v34  ;;  %3438 = vmatpush1.msra.mxu1 %v5792_v55  ;;  %v3065_v34 = vmul.f32 0.5, %v3035_v3  ;;  %v6741_v55 = vld [vmem:[#allocation48_spill] sm:$0xff] }
 0x338   : > { %3368 = vmatprep.subr.mxu0 %v5797_v38  ;;  %3439 = vmatprep.subr.mxu1 %v5802_v59  ;;  %v6744_v59 = vld [vmem:[#allocation51_spill] sm:$0xff] }
 0x339   : > { %3369 = vmatpush1.msra.mxu0 %v5808_v13  ;;  %3440 = vmatpush1.msra.mxu1 %v5813_v1  ;;  %v6745_v1 = vld [vmem:[#allocation52_spill] sm:$0xff]  ;;  %4080 = vtanh.f32 %v3065_v34 }
 0x33a   : > { %3370 = vmatprep.subr.mxu0 %v5820_v10  ;;  %3441 = vmatprep.subr.mxu1 %v5825_v14  ;;  %v6746_v10 = vld [vmem:[#allocation53_spill] sm:$0xff] }
 0x33b   : > { %3371 = vmatpush1.msra.mxu0 %v5833_v6  ;;  %3442 = vmatpush1.msra.mxu1 %v5838_v17  ;;  %v6748_v6 = vld [vmem:[#allocation55_spill] sm:$0xff] }
 0x33c   : > { %3372 = vmatprep.subr.mxu0 %v6741_v55  ;;  %3443 = vmatprep.subr.mxu1 %v6742_v56 }
 0x33d   : > { %v4075_v38 = vpop.eup %4074  ;;  %3373 = vmatpush1.msra.mxu0 %v6743_v7  ;;  %3444 = vmatpush1.msra.mxu1 %v6744_v59 }
 0x33e   : > { %v3058_v13 = vmul.f32 0.5, %v4075_v38  ;;  %3374 = vmatprep.subr.mxu0 %v6745_v1  ;;  %3445 = vmatprep.subr.mxu1 %v6746_v10  ;;  %v6786_v10 = vld [vmem:[#allocation78_spill] sm:$0xff] }
 0x33f   : > { %v4077_v14 = vpop.eup %4076  ;;  %3375 = vmatpush1.msra.mxu0 %v6747_v9  ;;  %3446 = vmatpush1.msra.mxu1 %v6748_v6 }
 0x340   : > { %v3059_v17 = vadd.f32 0.5, %v3058_v13  ;;  %v3062_v53 = vmul.f32 0.5, %v4077_v14  ;;  %3376 = vmatprep.subr.mxu0 %v5893_v61  ;;  %3447 = vmatprep.subr.mxu1 %v6749_v16  ;;  %v4079_v12 = vpop.eup %4078  ;;  %v6754_v61 = vld [vmem:[#allocation61_spill] sm:$0xff] }
 0x341   : > { %3377 = vmatpush1.msra.mxu0 %v6750_v41  ;;  %3448 = vmatpush1.msra.mxu1 %v6751_v43 }
 0x342   : > { %v3063_v54 = vadd.f32 0.5, %v3062_v53  ;;  %v3070_v52 = vmul.f32 %v4079_v12, %v3059_v17  ;;  %3378 = vmatprep.subr.mxu0 %v5917_v46  ;;  %3449 = vmatprep.subr.mxu1 %v5922_v32  ;;  %v6758_v46 = vld [vmem:[#allocation65_spill] sm:$0xff]  ;;  %v6759_v32 = vld [vmem:[#allocation66_spill] sm:$0xff] }
 0x343   : > { %3379 = vmatpush1.msra.mxu0 %v6752_v11  ;;  %3450 = vmatpush1.msra.mxu1 %v6753_v18 }
 0x344   : > { %v3069_v22 = vmul.f32 %v3063_v54, %v5997_v57  ;;  %3380 = vmatprep.subr.mxu0 %v5941_v29  ;;  %3451 = vmatprep.subr.mxu1 %v6754_v61  ;;  %v6761_v57 = vld [vmem:[#allocation68_spill] sm:$0xff]  ;;  %v6762_v29 = vld [vmem:[#allocation69_spill] sm:$0xff] }
 0x345   : > { %3381 = vmatpush1.msra.mxu0 %v6755_v23  ;;  %3452 = vmatpush1.msra.mxu1 %v6756_v24 }
 0x346   : > { %v6277_v25 = vadd.f32 %v3070_v52, %v3069_v22  ;;  %3382 = vmatprep.subr.mxu0 %v6757_v19  ;;  %3453 = vmatprep.subr.mxu1 %v6758_v46  ;;  %v4081_v40 = vpop.eup %4080  ;;  %v6787_v22 = vld [vmem:[#allocation8_spill] sm:$0xff] }
 0x347   : > { %3383 = vmatpush1.msra.mxu0 %v6759_v32  ;;  %3454 = vmatpush1.msra.mxu1 %v6760_v0  ;;  %v3067_v62 = vmul.f32 0.5, %v4081_v40  ;;  %v6788_v32 = vld [vmem:[#allocation9_spill] sm:$0xff] }
 0x348   : > { %4082 = vtanh.f32 %v6277_v25  ;;  %3384 = vmatprep.subr.mxu0 %v6761_v57  ;;  %3455 = vmatprep.subr.mxu1 %v6762_v29  ;;  %v6789_v57 = vld [vmem:[#allocation10_spill] sm:$0xff] }
 0x349   : > { %3385 = vmatpush1.msra.mxu0 %v6763_v47  ;;  %3456 = vmatpush1.msra.mxu1 %v6764_v4  ;;  %v3068_v3 = vadd.f32 0.5, %v3067_v62 }
 0x34a   : > { %3386 = vmatprep.subr.mxu0 %v6765_v21  ;;  %3457 = vmatprep.subr.mxu1 %v6766_v27 }
 0x34b   : > { %3387 = vmatpush1.msra.mxu0 %v6767_v31  ;;  %3458 = vmatpush1.msra.mxu1 %v6768_v33  ;;  %v6790_v31 = vld [vmem:[#allocation11_spill] sm:$0xff] }
 0x34c   : > { %3388 = vmatprep.subr.mxu0 %v6769_v35  ;;  %3459 = vmatprep.subr.mxu1 %v6770_v36 }
 0x34d   : > { %3389 = vmatpush1.msra.mxu0 %v6771_v44  ;;  %3460 = vmatpush1.msra.mxu1 %v6772_v39 }
 0x34e   : > { %3390 = vmatprep.subr.mxu0 %v6773_v60  ;;  %3461 = vmatprep.subr.mxu1 %v6774_v49 }
 0x34f   : > { %3391 = vmatpush1.msra.mxu0 %v6775_v42  ;;  %3462 = vmatpush1.msra.mxu1 %v6776_v45 }
 0x350   : > { %3392 = vmatprep.subr.mxu0 %v6777_v63  ;;  %3463 = vmatprep.subr.mxu1 %v6778_v15 }
 0x351   : > { %3393 = vmatpush1.msra.mxu0 %v6779_v48  ;;  %3464 = vmatpush1.msra.mxu1 %v6780_v2 }
 0x352   : > { %3394 = vmatprep.subr.mxu0 %v6781_v51  ;;  %3465 = vmatprep.subr.mxu1 %v6782_v50 }
 0x353   : > { %3395 = vmatpush1.msra.mxu0 %v6125_v26  ;;  %3466 = vmatpush1.msra.mxu1 %v6130_v58  ;;  %v6783_v58 = vld [vmem:[#allocation75_spill] sm:$0xff] }
 0x354   : > { %3396 = vmatprep.subr.mxu0 %v6137_v8  ;;  %3467 = vmatprep.subr.mxu1 %v6142_v37  ;;  %v6784_v37 = vld [vmem:[#allocation76_spill] sm:$0xff] }
 0x355   : > { %v4083_v34 = vpop.eup %4082  ;;  %3397 = vmatpush1.msra.mxu0 %v6149_v5  ;;  %3430 = vmatprep.mubr.f32.mxu0 %v6493_v20  ;;  %v6785_v5 = vld [vmem:[#allocation77_spill] sm:$0xff] }
 0x356   : > { %v3073_v55 = vmul.f32 %v4083_v34, %v3068_v3  ;;  %3468 = vmatpush1.msra.mxu1 %v6156_v30  ;;  %3501 = vmatprep.mubr.f32.mxu1 %v6493_v20 }
 0x358   : > { %3942 = vst [vmem:[%s4186_s23 + $0x8] sm:$0xff] %v3073_v55  ;;  %3431 = vmatmul.mubr.f32.vlgmr.msra.gmra.mxu0 %v3073_v55  ;;  %3502 = vmatmul.mubr.f32.vlgmr.msra.gmra.mxu1 %v3073_v55 }
 0x3f6   : > { %v3217_v26 = vpop.f32.mrf.mxu0  ;;  %v3288_v38 = vpop.f32.mrf.mxu1 }
 0x3f7   : > { %v3293_v56 = vadd.f32 %v3217_v26, %v6783_v58  ;;  %v3295_v13 = vadd.f32 %v3288_v38, %v6785_v5 }
 0x3f8   : > { %v3219_v8 = vpop.f32.mrf.mxu0  ;;  %v3290_v30 = vpop.f32.mrf.mxu1 }
 0x3f9   : > { %v3513_v7 = vmul.f32 0.5, %v3293_v56  ;;  %v3294_v59 = vadd.f32 %v3219_v8, %v6784_v37  ;;  %v3296_v20 = vadd.f32 %v3290_v30, %v6786_v10 }
 0x3fb   : > { %4084 = vtanh.f32 %v3513_v7  ;;  %v3517_v1 = vmul.f32 0.5, %v3294_v59  ;;  %v3522_v14 = vmul.f32 0.5, %v3296_v20 }
 0x3fd   : > { %4086 = vtanh.f32 %v3517_v1 }
 0x3fe   : > { %4088 = vtanh.f32 %v3295_v13 }
 0x3ff   : > { %4090 = vtanh.f32 %v3522_v14 }
 0x408   : > { %v4085_v9 = vpop.eup %4084 }
 0x409   : > { %v3515_v6 = vmul.f32 0.5, %v4085_v9 }
 0x40a   : > { %v4087_v17 = vpop.eup %4086 }
 0x40b   : > { %v3516_v53 = vadd.f32 0.5, %v3515_v6  ;;  %v3519_v16 = vmul.f32 0.5, %v4087_v17  ;;  %v4089_v12 = vpop.eup %4088 }
 0x40c   : > { %v4091_v11 = vpop.eup %4090 }
 0x40d   : > { %v3520_v41 = vadd.f32 0.5, %v3519_v16  ;;  %v3527_v43 = vmul.f32 %v4089_v12, %v3516_v53  ;;  %v3524_v19 = vmul.f32 0.5, %v4091_v11 }
 0x40f   : > { %v3526_v54 = vmul.f32 %v3520_v41, %v6238_v28  ;;  %v3525_v4 = vadd.f32 0.5, %v3524_v19 }
 0x411   : > { %v3528_v52 = vadd.f32 %v3527_v43, %v3526_v54 }
 0x413   : > { %4092 = vtanh.f32 %v3528_v52  ;;  %3551 = vst [vmem:[#allocation5] sm:$0xff] %v3528_v52 }
 0x418   : > { %v3432_v18 = vpop.f32.mrf.mxu0  ;;  %v3503_v23 = vpop.f32.mrf.mxu1 }
 0x419   : > { %v3508_v61 = vadd.f32 %v3432_v18, %v6787_v22  ;;  %v3510_v29 = vadd.f32 %v3503_v23, %v6789_v57 }
 0x41a   : > { %v3434_v24 = vpop.f32.mrf.mxu0  ;;  %v3505_v27 = vpop.f32.mrf.mxu1 }
 0x41b   : > { %v3532_v46 = vmul.f32 0.5, %v3508_v61  ;;  %v3509_v0 = vadd.f32 %v3434_v24, %v6788_v32  ;;  %v3511_v33 = vadd.f32 %v3505_v27, %v6790_v31 }
 0x41d   : > { %4094 = vtanh.f32 %v3532_v46  ;;  %v3536_v47 = vmul.f32 0.5, %v3509_v0  ;;  %v3541_v35 = vmul.f32 0.5, %v3511_v33 }
 0x41f   : > { %4096 = vtanh.f32 %v3536_v47 }
 0x420   : > { %v4093_v28 = vpop.eup %4092  ;;  %4098 = vtanh.f32 %v3510_v29 }
 0x421   : > { %v3530_v21 = vmul.f32 %v4093_v28, %v3525_v4  ;;  %4100 = vtanh.f32 %v3541_v35 }
 0x423   : > { %3550 = vst [vmem:[#allocation4] sm:$0xff] %v3530_v21  ;;  %4007 = vst [vmem:[%s4181_s19 + $0x18] sm:$0xff] %v3530_v21 }
 0x42a   : > { %v4095_v36 = vpop.eup %4094 }
 0x42b   : > { %v3534_v40 = vmul.f32 0.5, %v4095_v36 }
 0x42c   : > { %v4097_v44 = vpop.eup %4096 }
 0x42d   : > { %v3535_v39 = vadd.f32 0.5, %v3534_v40  ;;  %v3538_v60 = vmul.f32 0.5, %v4097_v44  ;;  %v4099_v49 = vpop.eup %4098 }
 0x42e   : > { %v4101_v15 = vpop.eup %4100 }
 0x42f   : > { %v3539_v42 = vadd.f32 0.5, %v3538_v60  ;;  %v3546_v45 = vmul.f32 %v4099_v49, %v3535_v39  ;;  %v3543_v48 = vmul.f32 0.5, %v4101_v15 }
 0x431   : > { %v3545_v62 = vmul.f32 %v3539_v42, %v6277_v25  ;;  %v3544_v2 = vadd.f32 0.5, %v3543_v48 }
 0x433   : > { %v3547_v63 = vadd.f32 %v3546_v45, %v3545_v62 }
 0x435   : > { %4102 = vtanh.f32 %v3547_v63  ;;  %3553 = vst [vmem:[#allocation7] sm:$0xff] %v3547_v63 }
 0x441   : > { %3560 = sbr.rel (%p4008_p8) target bundleno = 1096 (0x448), region = 48 }
 0x442   : > { %v4103_v51 = vpop.eup %4102 }
 0x443   : > { %v3549_v50 = vmul.f32 %v4103_v51, %v3544_v2 }
 0x445   : > { %3552 = vst [vmem:[#allocation6] sm:$0xff] %v3549_v50  ;;  %3556 = vst [vmem:[%s4186_s23] sm:$0xff] %v3549_v50 }
 0x446   : > { %v3561_v3 = vld [vmem:[#allocation5] sm:$0xff]  ;;  %v3563_v34 = vld [vmem:[#allocation7] sm:$0xff] }
 0x447   : > { %3562 = vst [vmem:[%s6344_s7] sm:$0xff] %v3561_v3  ;;  %4009 = vst [vmem:[%s6344_s7 + $0x8] sm:$0xff] %v3563_v34 }
 0x448 PF: > { %s18_s24 = sadd.s32 1, %s4110_s24  }
 0x449   : > { %p15_p9 = scmp.ge.s32.totalorder %s18_s24, 4  }
 0x44b   :  { %17 = sbr.rel (!%p15_p9) target bundleno = 1 (0x1), region = 123 }

</bundles_post_ra>
